<compile_context>
chip_gen: v6e
topology: v6e:2x2x1
jax: 0.10.0
libtpu: 0.0.40
codegen_flags: <defaults>
</compile_context>

<pallas_src>
import functools

import jax
import jax.numpy as jnp
from jax.experimental import pallas as pl
from jax.experimental.pallas import tpu as pltpu


# ---------------------------------------------------------------------------
# Fused kernel: PReLU + overlap-add (D channels) + 1x1 conv (MXU) + 2*bias + ReLU
# ---------------------------------------------------------------------------
def _est_mask_kernel(alpha_ref, top_ref, bot_ref, w_ref, b2_ref, o_ref, *,
                     nk, ncols, out_4d):
    a = alpha_ref[0]                                   # PReLU scalar (SMEM)
    top = top_ref[0]                                   # [D, tr, K]  rows r      (f32)
    bot = bot_ref[0]                                   # [D, tr, K]  rows s + r  (f32)

    # Slice first, PReLU second (keeps temporaries at [D, tr, K-1]), then the
    # overlap-add in D-channel space (legal because the 1x1 conv is linear):
    #   z[d, r, h] = prelu(x[d, s+r, h]) + prelu(x[d, r, h+1])
    bot_s = bot[:, :, : nk - 1]
    top_s = top[:, :, 1:]
    z = (jnp.where(bot_s > 0, bot_s, a * bot_s)
         + jnp.where(top_s > 0, top_s, a * top_s))     # [D, tr, K-1]

    # Merged time is segment-major: in-VMEM transpose (the module's
    # .transpose(2, 3)), then present a lane-dense 2-D RHS to the MXU.
    zt = jnp.transpose(z, (0, 2, 1))                   # [D, K-1, tr]
    z2 = zt.reshape(zt.shape[0], -1)                   # [D, (K-1)*tr]
    if ncols < z2.shape[1]:                            # fold the static `rest` trim
        z2 = z2[:, :ncols]

    acc = jnp.dot(w_ref[...], z2,
                  preferred_element_type=jnp.float32)  # [CD, ncols]  f32 MXU
    acc = acc + b2_ref[...]                            # + 2 * bias (both conv adds)
    res = jnp.maximum(acc, 0.0).astype(o_ref.dtype)    # ReLU

    if out_4d:
        o_ref[0] = res.reshape(res.shape[0], nk - 1, -1)   # [CD, K-1, tr]
    else:
        o_ref[0] = res                                     # [CD, T]  lane-dense


# ---------------------------------------------------------------------------
# VMEM sizing (double buffering + in-kernel temporaries; per-generation safe)
# ---------------------------------------------------------------------------
def _vmem_budget_bytes():
    try:
        cap = pltpu.get_tpu_info().vmem_capacity_bytes   # 128 MiB v5e/v6e, 64 MiB v7x
    except Exception:
        cap = 64 << 20                                   # assume the smallest (v7x)
    return int(min(cap * 0.45, 48 << 20))


def _footprint_bytes(D, K, CD, tr):
    """Peak VMEM of one grid step, incl. double buffering and temporaries."""
    in_blk = D * tr * K * 4             # one half-row input stream block (f32)
    out_blk = CD * (K - 1) * tr * 4     # output block (f32)
    #  2 input streams x 2 buffers + ~5 input-sized temporaries
    #  (slices, PReLUs, z, z^T, reshaped z), output x 2 buffers
    #  + ~2 output-sized temporaries (matmul acc, relu), resident weight/bias.
    return 9 * in_blk + 4 * out_blk + 2 * CD * D * 4 + (64 << 10)


def _pick_row_tile(D, s, K, CD, budget):
    """Largest within-segment row tile `tr` (multiple of 8 dividing s) that
    fits `budget`.  tr == s enables the flat, trim-folded output path."""
    if _footprint_bytes(D, K, CD, s) <= budget:
        return s
    divisors = [t for t in range(s - 8, 0, -8) if s % t == 0]
    for align in (128, 8):              # prefer lane-dense (128-multiple) stores
        for t in divisors:
            if t % align == 0 and _footprint_bytes(D, K, CD, t) <= budget:
                return t
    # TODO(synk): for extreme D*K even the smallest row tile overflows; would
    # additionally need to tile D (contraction, with accumulation) or CD.
    return divisors[-1] if divisors else s


# ---------------------------------------------------------------------------
# Forward pass (Est_mask.forward)
# ---------------------------------------------------------------------------
@functools.partial(jax.jit, static_argnames=("rest", "nspk"))
def est_mask_forward(x, alpha, weight, bias, *, rest, nspk):
    """x: [B, D, L, K] f32, weight: [nspk*D, D], bias: [nspk*D], alpha: [1].
    `rest` is the static trim amount.  Returns mask [B, nspk, D, T]."""
    B, D, L, K = x.shape
    CD = weight.shape[0]
    assert L % 2 == 0 and K % 2 == 0, "Est_mask requires even L and even K"
    s = L // 2
    assert s % 8 == 0, "segment_size must be a multiple of 16 for this kernel"
    assert CD == nspk * D, (CD, nspk, D)
    Hs = (K - 1) * s                    # untrimmed merged length
    T = Hs - rest                       # final mask length

    budget = _vmem_budget_bytes()
    tr = _pick_row_tile(D, s, K, CD, budget)
    n_r = s // tr
    flat = n_r == 1                     # common case: whole per-batch slab fits VMEM

    alpha32 = jnp.asarray(alpha, jnp.float32).reshape(1)
    w32 = weight.astype(jnp.float32)    # keep f32: kernel is mem-bound, MXU has slack
    bias2 = (2.0 * bias.astype(jnp.float32)).reshape(CD, 1)

    in_specs = [
        pl.BlockSpec(memory_space=pltpu.SMEM),                          # alpha
        pl.BlockSpec((1, D, tr, K), lambda b, j: (b, 0, j, 0)),         # rows r       (tops)
        pl.BlockSpec((1, D, tr, K), lambda b, j: (b, 0, j + n_r, 0)),   # rows s + r   (bottoms)
        pl.BlockSpec((CD, D), lambda b, j: (0, 0)),                     # conv weight (resident)
        pl.BlockSpec((CD, 1), lambda b, j: (0, 0)),                     # 2 * bias
    ]
    if flat:
        # Flat, already-trimmed, lane-dense output; `rest` never hits HBM.
        ncols = T
        out_shape = jax.ShapeDtypeStruct((B, CD, T), jnp.float32)
        out_spec = pl.BlockSpec((1, CD, T), lambda b, j: (b, 0, 0))
        out_cols = T
    else:
        # VMEM-forced row tiling: segment-major 4-D layout, trim done by XLA.
        ncols = (K - 1) * tr
        out_shape = jax.ShapeDtypeStruct((B, CD, K - 1, s), jnp.float32)
        out_spec = pl.BlockSpec((1, CD, K - 1, tr), lambda b, j: (b, 0, 0, j))
        out_cols = Hs

    fp = _footprint_bytes(D, K, CD, tr)
    cost = pl.CostEstimate(
        flops=2 * B * D * CD * out_cols,
        transcendentals=0,
        bytes_accessed=B * D * L * K * 4 + B * CD * out_cols * 4 + CD * D * 4)

    # NOTE(v7x): grid is (B, s // tr); with tiny B and tr == s there are few
    # steps to spread across the two TensorCores -- acceptable since each step
    # already carries several MBs of DMA on realistic shapes.
    out = pl.pallas_call(
        functools.partial(_est_mask_kernel, nk=K, ncols=ncols, out_4d=not flat),
        out_shape=out_shape,
        grid=(B, n_r),
        in_specs=in_specs,
        out_specs=out_spec,
        compiler_params=pltpu.CompilerParams(
            dimension_semantics=("parallel", "parallel"),
            vmem_limit_bytes=int(min(max(fp * 5 // 4, 32 << 20), 48 << 20))),
        cost_estimate=cost,
    )(alpha32, x, x, w32, bias2)

    if flat:
        mask = out                                        # [B, CD, T]
    else:
        mask = out.reshape(B, CD, Hs)                     # free dim-merge
        if rest > 0:
            # TODO(synk): with a tiled row axis the trim is not a rectangular
            # partial block; it costs one extra XLA copy of the final mask.
            mask = mask[:, :, :T]
    # TODO(synk): emit bf16 instead of f32 if downstream tolerates it (halves
    # the largest remaining HBM stream).
    return mask.reshape(B, nspk, D, T)                    # free dim-split


# ---------------------------------------------------------------------------
# Pure-JAX reference mirroring the PyTorch module exactly.
# ---------------------------------------------------------------------------
def est_mask_reference(x, rest, alpha, weight, bias, nspk):
    px = jnp.where(x > 0, x, alpha[0] * x)
    y = jnp.einsum("bdlk,cd->bclk", px, weight,
                   precision=jax.lax.Precision.HIGHEST) + bias[None, :, None, None]
    B, CD, L, K = y.shape
    stride = L // 2
    yt = jnp.transpose(y, (0, 1, 3, 2)).reshape(B, CD, -1, 2 * L)
    in1 = yt[:, :, :, :L].reshape(B, CD, -1)[:, :, stride:]
    in2 = yt[:, :, :, L:].reshape(B, CD, -1)[:, :, :-stride]
    out = in1 + in2
    if rest > 0:
        out = out[:, :, :-rest]
    mask = jnp.maximum(out, 0.0)
    T = mask.shape[-1]
    return mask.reshape(B, nspk, -1, T)


if __name__ == "__main__":
    # Small, module-consistent shapes: [B, D, L, K], K even, L multiple of 16.
    B, D, L, K = 2, 32, 16, 32      # batch, feature_dim, segment_size, #segments
    nspk = 2
    rest = 5                        # static trim amount, as in the PyTorch API
    CD = D * nspk

    key = jax.random.PRNGKey(0)
    kx, kw, kb = jax.random.split(key, 3)
    x = jax.random.normal(kx, (B, D, L, K), dtype=jnp.float32)
    weight = jax.random.normal(kw, (CD, D), dtype=jnp.float32) * 0.1   # Conv2d(D, C*D, 1)
    bias = jax.random.normal(kb, (CD,), dtype=jnp.float32) * 0.1
    alpha = jnp.array([0.25], dtype=jnp.float32)                       # nn.PReLU default

    out = est_mask_forward(x, alpha, weight, bias, rest=rest, nspk=nspk)
    out = jax.block_until_ready(out)

    ref = est_mask_reference(x, rest, alpha, weight, bias, nspk)
    expected_T = (K // 2) * L - L // 2 - rest
    assert out.shape == (B, nspk, D, expected_T), out.shape
    max_err = float(jnp.max(jnp.abs(out - ref)))
    assert jnp.allclose(out, ref, atol=1e-2, rtol=1e-2), max_err

    print("KERNEL_OK")
</pallas_src>

<mosaic_0001>
module attributes {stable_mosaic.version = 11 : i64} {
  func.func @_est_mask_kernel(%arg0: i32, %arg1: i32, %arg2: memref<1xf32, #tpu.memory_space<smem>>, %arg3: memref<1x32x8x32xf32, #tpu.memory_space<vmem>>, %arg4: memref<1x32x8x32xf32, #tpu.memory_space<vmem>>, %arg5: memref<64x32xf32, #tpu.memory_space<vmem>>, %arg6: memref<64x1xf32, #tpu.memory_space<vmem>>, %arg7: memref<1x64x243xf32, #tpu.memory_space<vmem>>) attributes {dimension_semantics = [#tpu.dimension_semantics<parallel>, #tpu.dimension_semantics<parallel>], iteration_bounds = array<i64: 2, 1>, scalar_prefetch = 0 : i64, scratch_operands = 0 : i64, tpu.core_type = #tpu.core_type<tc>, window_params = [{transform_indices = @transform_0, window_bounds = array<i64: 1>}, {transform_indices = @transform_1, window_bounds = array<i64: 1, 32, 8, 32>}, {transform_indices = @transform_2, window_bounds = array<i64: 1, 32, 8, 32>}, {pipeline_mode = #tpu.pipeline_mode<synchronous>, transform_indices = @transform_3, window_bounds = array<i64: 64, 32>}, {pipeline_mode = #tpu.pipeline_mode<synchronous>, transform_indices = @transform_4, window_bounds = array<i64: 64, 1>}, {transform_indices = @transform_5, window_bounds = array<i64: 1, 64, 243>}]} {
    %c0 = arith.constant 0 : index
    %0 = memref.load %arg2[%c0] : memref<1xf32, #tpu.memory_space<smem>>
    %c0_0 = arith.constant 0 : index
    %c0_1 = arith.constant 0 : index
    %c0_2 = arith.constant 0 : index
    %c0_3 = arith.constant 0 : index
    %1 = vector.load %arg3[%c0_0, %c0_1, %c0_2, %c0_3] : memref<1x32x8x32xf32, #tpu.memory_space<vmem>>, vector<1x32x8x32xf32>
    %2 = vector.shape_cast %1 : vector<1x32x8x32xf32> to vector<32x8x32xf32>
    %c0_4 = arith.constant 0 : index
    %c0_5 = arith.constant 0 : index
    %c0_6 = arith.constant 0 : index
    %c0_7 = arith.constant 0 : index
    %3 = vector.load %arg4[%c0_4, %c0_5, %c0_6, %c0_7] : memref<1x32x8x32xf32, #tpu.memory_space<vmem>>, vector<1x32x8x32xf32>
    %4 = vector.shape_cast %3 : vector<1x32x8x32xf32> to vector<32x8x32xf32>
    %5 = vector.extract_strided_slice %4 {offsets = [0, 0, 0], sizes = [32, 8, 31], strides = [1, 1, 1]} : vector<32x8x32xf32> to vector<32x8x31xf32>
    %6 = vector.extract_strided_slice %2 {offsets = [0, 0, 1], sizes = [32, 8, 31], strides = [1, 1, 1]} : vector<32x8x32xf32> to vector<32x8x31xf32>
    %cst = arith.constant 0.000000e+00 : f32
    %7 = vector.broadcast %cst : f32 to vector<32x8x31xf32>
    %8 = arith.cmpf ogt, %5, %7 : vector<32x8x31xf32>
    %9 = vector.broadcast %0 : f32 to vector<32x8x31xf32>
    %10 = arith.mulf %9, %5 : vector<32x8x31xf32>
    %11 = arith.select %8, %5, %10 : vector<32x8x31xi1>, vector<32x8x31xf32>
    %cst_8 = arith.constant 0.000000e+00 : f32
    %12 = vector.broadcast %cst_8 : f32 to vector<32x8x31xf32>
    %13 = arith.cmpf ogt, %6, %12 : vector<32x8x31xf32>
    %14 = vector.broadcast %0 : f32 to vector<32x8x31xf32>
    %15 = arith.mulf %14, %6 : vector<32x8x31xf32>
    %16 = arith.select %13, %6, %15 : vector<32x8x31xi1>, vector<32x8x31xf32>
    %17 = arith.addf %11, %16 : vector<32x8x31xf32>
    %18 = tpu.transpose %17, [0, 2, 1] : vector<32x8x31xf32> -> vector<32x31x8xf32>
    %19 = vector.shape_cast %18 : vector<32x31x8xf32> to vector<32x248xf32>
    %20 = vector.extract_strided_slice %19 {offsets = [0, 0], sizes = [32, 243], strides = [1, 1]} : vector<32x248xf32> to vector<32x243xf32>
    %c0_9 = arith.constant 0 : index
    %c0_10 = arith.constant 0 : index
    %21 = vector.load %arg5[%c0_9, %c0_10] : memref<64x32xf32, #tpu.memory_space<vmem>>, vector<64x32xf32>
    %cst_11 = arith.constant dense<0.000000e+00> : vector<64x243xf32>
    %22 = tpu.matmul %21, %20, %cst_11 {dimension_numbers = #tpu.dot_dimension_numbers<[1], [0], [0], [1], [0, 0, 1, 1], [], []>} : vector<64x32xf32>, vector<32x243xf32>, vector<64x243xf32> -> vector<64x243xf32>
    %c0_12 = arith.constant 0 : index
    %c0_13 = arith.constant 0 : index
    %23 = vector.load %arg6[%c0_12, %c0_13] : memref<64x1xf32, #tpu.memory_space<vmem>>, vector<64x1xf32>
    %24 = vector.broadcast %23 : vector<64x1xf32> to vector<64x243xf32>
    %25 = arith.addf %22, %24 : vector<64x243xf32>
    %cst_14 = arith.constant 0.000000e+00 : f32
    %26 = vector.broadcast %cst_14 : f32 to vector<64x243xf32>
    %27 = arith.maximumf %25, %26 : vector<64x243xf32>
    %c0_15 = arith.constant 0 : index
    %c0_16 = arith.constant 0 : index
    %c0_17 = arith.constant 0 : index
    %28 = vector.load %arg7[%c0_15, %c0_16, %c0_17] : memref<1x64x243xf32, #tpu.memory_space<vmem>>, vector<1x64x243xf32>
    %29 = vector.shape_cast %28 : vector<1x64x243xf32> to vector<64x243xf32>
    %30 = vector.shape_cast %27 : vector<64x243xf32> to vector<1x64x243xf32>
    tpu.vector_store %arg7[%c0_15, %c0_16, %c0_17], %30 {strides = array<i32>} : memref<1x64x243xf32, #tpu.memory_space<vmem>>, vector<1x64x243xf32>,
    return
  }
  func.func @transform_0(%arg0: i32, %arg1: i32) -> i32 {
    %c0_i32 = arith.constant 0 : i32
    %c0_i32_0 = arith.constant 0 : i32
    return %c0_i32 : i32
  }
  func.func @transform_1(%arg0: i32, %arg1: i32) -> (i32, i32, i32, i32) {
    %c0_i32 = arith.constant 0 : i32
    %c0_i32_0 = arith.constant 0 : i32
    %c0_i32_1 = arith.constant 0 : i32
    return %arg0, %c0_i32, %arg1, %c0_i32_0 : i32, i32, i32, i32
  }
  func.func @transform_2(%arg0: i32, %arg1: i32) -> (i32, i32, i32, i32) {
    %c1_i32 = arith.constant 1 : i32
    %0 = arith.addi %arg1, %c1_i32 : i32
    %c0_i32 = arith.constant 0 : i32
    %c0_i32_0 = arith.constant 0 : i32
    %c0_i32_1 = arith.constant 0 : i32
    return %arg0, %c0_i32, %0, %c0_i32_0 : i32, i32, i32, i32
  }
  func.func @transform_3(%arg0: i32, %arg1: i32) -> (i32, i32) {
    %c0_i32 = arith.constant 0 : i32
    %c0_i32_0 = arith.constant 0 : i32
    %c0_i32_1 = arith.constant 0 : i32
    return %c0_i32, %c0_i32_0 : i32, i32
  }
  func.func @transform_4(%arg0: i32, %arg1: i32) -> (i32, i32) {
    %c0_i32 = arith.constant 0 : i32
    %c0_i32_0 = arith.constant 0 : i32
    %c0_i32_1 = arith.constant 0 : i32
    return %c0_i32, %c0_i32_0 : i32, i32
  }
  func.func @transform_5(%arg0: i32, %arg1: i32) -> (i32, i32, i32) {
    %c0_i32 = arith.constant 0 : i32
    %c0_i32_0 = arith.constant 0 : i32
    %c0_i32_1 = arith.constant 0 : i32
    return %arg0, %c0_i32, %c0_i32_0 : i32, i32, i32
  }
}

</mosaic_0001>

<bundles_post_ra>
// kernel: est_mask_forward.1
= control target key start
LH: loop header
LB: loop body
LE: loop exit
PB: predicated region body
PF: predicated region fallthrough
CT: control target
= control target key end

     0   :  { %s7519_s0 = inlined_call_operand.<no memory space> [shape: f32[1], index: 0, kind: input, shape index: {}]   ;;  %s7520_s1 = inlined_call_operand.hbm [shape: f32[2,32,16,32], index: 1, kind: input, shape index: {}, may-alias: {1,2}]   ;;  %s7521_s2 = inlined_call_operand.hbm [shape: f32[2,32,16,32], index: 2, kind: input, shape index: {}, may-alias: {1,2}]   ;;  %s7522_s3 = inlined_call_operand.vmem [shape: f32[64,32], index: 3, kind: input, shape index: {}]   ;;  %s7523_s4 = inlined_call_operand.vmem [shape: f32[64,1], index: 4, kind: input, shape index: {}]   ;;  %s7524_s5 = inlined_call_operand.hbm [shape: f32[2,64,243], index: 5, kind: output, shape index: {}]  }
   0x1   :  { %7677 = sst [smem:[#allocation133_spill]] %s7520_s1 }
   0x2   :  { %10 = sst [smem:[#allocation2]] %s7519_s0 }
   0x3   :  { %11 = vsyncpa [#allocation4], 0 }
   0x4   :  { %13 = vsyncpa [#allocation4 + $0x1], 0 }
   0x5   :  { %14 = vsyncpa [#allocation7], 0 }
   0x6   :  { %16 = vsyncpa [#allocation7 + $0x1], 0 }
   0x7   :  { %17 = vsyncpa [#allocation5], 0 }
   0x8   :  { %19 = vsyncpa [#allocation5 + $0x1], 0  ;;  %s5195_s20 = smov 0   ;;  %s5197_s21 = smov 0  }
   0x9   :  { %s5199_s22 = smov 0   ;;  %s5201_s23 = smov 0  }
   0xa   :  { %s5203_s24 = smov 0   ;;  %s5205_s25 = smov 0  }
   0xb LB: > { %7678 = sst [smem:[#allocation12_spill]] %s5121_s22  ;;  %s4861_s0 = sadd.s32 4294967295, %s5133_s25   ;;  %s5133_s25 = sphi %s5205_s25, %s25_s25   ;;  %s5129_s24 = sphi %s5203_s24, %s8004_s24   ;;  %s5125_s23 = sphi %s5201_s23, %s8003_s23   ;;  %s5121_s22 = sphi %s5199_s22, %s7999_s22   ;;  %s5117_s21 = sphi %s5197_s21, %s8002_s21   ;;  %s5113_s20 = sphi %s5195_s20, %s8001_s20  }
   0xc   : > { %s4862_s26 = sadd.s32 4294967294, %s5133_s25   ;;  %s37_s27 = sadd.s32 1, %s5129_s24 }
   0xd   : > { %s67_s28 = sadd.s32 1, %s5121_s22  ;;  %p39_p0 = scmp.ge.s32.totalorder %s37_s27, 2 }
   0xe   : > { %p74_p1 = scmp.ne.s32.totalorder %s5121_s22, %s5117_s21  ;;  %p75_p2 = scmp.eq.s32.totalorder %s5133_s25, 0 }
   0xf   : > { %p80_p3 = scmp.ne.s32.totalorder %s5117_s21, %s5113_s20  ;;  %s8006_s27 = smov (%p39_p0, %s37_s27), 0 }
  0x10   : > { %7679 = sst [smem:[#allocation13_spill]] %s8006_s27  ;;  %p5236_p4 = por %p75_p2, %p74_p1 }
  0x11   : > { %p81_p5 = scmp.eq.s32.totalorder %s4861_s0, 0  ;;  %s62_s30 = ssub.s32 %s5129_s24, %s8006_s27 }
  0x12   : > { %p176_p6 = scmp.eq.s32.totalorder %s4861_s0, 1  ;;  %p65_p7 = scmp.eq.s32.totalorder %s62_s30, 0 }
  0x13   : > { %p5242_p8 = por %p81_p5, %p80_p3  ;;  %p182_p10 = scmp.eq.s32.totalorder %s4862_s26, 1 }
  0x14   : > { %p5246_p9 = por %p176_p6, %p74_p1  ;;  %p4864_p12 = scmp.ge.s32.totalorder %s5133_s25, 2 }
  0x15   : > { %s5251_s8 = scalar_select %p65_p7, %s5121_s22, %s67_s28  }
  0x16   : > { %p5253_p11 = por %p182_p10, %p80_p3  ;;  %p4916_p13 = scmp.lt.s32.totalorder %s5133_s25, 2 }
  0x17   : > { %7683 = sst [smem:[#allocation14_spill]] %s5251_s8  ;;  %s5260_s10 = sand.u32 1, %s5121_s22  }
  0x18   : > { %s4865_s11 = sshll.u32 %s5260_s10, 8  ;;  %s4888_s12 = sshll.u32 %s5129_s24, 13 }
  0x19   : > { %s7685_s1 = sld [smem:[#allocation133_spill]]  ;;  %s215_s16 = scalar_lea.vmem [#allocation3], %s4865_s11 }
  0x1a   : > { %s223_s17 = sshll.u32 %s215_s16, 4  ;;  %p5273_p0 = pnand %p4916_p13, %p5236_p4  ;;  %s224_s17 = int_to_ptr.vmem [resolvable:$true] %s223_s17 }
  0x1b   : > { %s212_s19 = scalar_lea.sflag [#allocation4], %s5260_s10  ;;  %s5005_s0 = scalar_lea.vmem %s224_s17, 4096 }
  0x1c   : > { %p4994_p1 = pneg %p5273_p0  ;;  %p5006_p2 = scmp.ne.s32.totalorder %s224_s17, %s5005_s0 }
  0x1d   : > { %s5135_s26 = smov [#allocation3]  }
  0x1e   : > { %p5008_p3 = pnand %p5006_p2, %p4994_p1  ;;  %s5010_s28 = sshll.u32 %s5135_s26, 4  ;;  %s5011_s28 = int_to_ptr.vmem [resolvable:$false] %s5010_s28 }
  0x1f   : > { %s222_s15 = scalar_lea.hbm %s7685_s1, %s4888_s12  ;;  %s5012_s30 = scalar_lea.vmem %s5011_s28, 8192 }
  0x20   : > { %p5009_p5 = pneg %p5008_p3  ;;  %p5013_p6 = scmp.lt.s32.totalorder %s224_s17, %s5011_s28 }
  0x21   : > { %p5014_p4 = scmp.lt.s32.totalorder %s5012_s30, %s5005_s0 }
  0x23   : > { %p5015_p7 = por %p5014_p4, %p5013_p6 }
  0x25   : > { %p5016_p10 = pnand %p5015_p7, %p5009_p5 }
  0x27   : > { %5019 = shalt.err (!%p5016_p10)
}
  0x28   : > { %s5136_s29 = smov 256   ;;  %s5137_s13 = smov 128  }
  0x29   : > { %s5138_s14 = smov 8   ;;  %p4871_p13 = scmp.ge.s32.totalorder %s5133_s25, 1 }
  0x2a   : > { %4908 = dma.hbm_to_vmem [thread:$0]  (!%p5273_p0), %s222_s15, 4096, %s224_s17, %s212_s19, %s5136_s29, %s5137_s13, %s5138_s14  }
  0x2b   : > { %p254_p2 = scmp.lt.s32.totalorder %s5133_s25, 3  ;;  %s4798_s28 = scalar_lea.hbm %s7521_s2, %s4888_s12 }
  0x2c   : > { %s4799_s30 = scalar_lea.hbm %s4798_s28, 128  ;;  %s237_s1 = scalar_lea.vmem [#allocation6], %s4865_s11 }
  0x2d   : > { %p5289_p3 = pnand %p4871_p13, %p254_p2  ;;  %s246_s27 = sshll.u32 %s237_s1, 4  ;;  %s247_s27 = int_to_ptr.vmem [resolvable:$true] %s246_s27 }
  0x2e   : > { %s234_s8 = scalar_lea.sflag [#allocation7], %s5260_s10  ;;  %s5033_s22 = scalar_lea.vmem %s247_s27, 4096 }
  0x2f   : > { %p5034_p5 = scmp.ne.s32.totalorder %s247_s27, %s5033_s22  ;;  %s5139_s15 = smov [#allocation6]  }
  0x30   : > { %s5038_s17 = sshll.u32 %s5139_s15, 4  ;;  %s5039_s17 = int_to_ptr.vmem [resolvable:$false] %s5038_s17 }
  0x31   : > { %p5036_p6 = pnand %p5034_p5, %p4994_p1  ;;  %s5040_s19 = scalar_lea.vmem %s5039_s17, 8192 }
  0x32   : > { %p5041_p7 = scmp.lt.s32.totalorder %s247_s27, %s5039_s17  ;;  %p5042_p10 = scmp.lt.s32.totalorder %s5040_s19, %s5033_s22 }
  0x33   : > { %p5037_p4 = pneg %p5036_p6 }
  0x34   : > { %p5043_p13 = por %p5042_p10, %p5041_p7 }
  0x36   : > { %p5044_p2 = pnand %p5043_p13, %p5037_p4 }
  0x38   : > { %5047 = shalt.err (!%p5044_p2)
}
  0x39   : > { %4911 = dma.hbm_to_vmem [thread:$0]  (!%p5273_p0), %s4799_s30, 4096, %s247_s27, %s234_s8, %s5136_s29, %s5137_s13, %s5138_s14  }
  0x3a   : > { %258 = sbr.rel (%p5289_p3) target bundleno = 1153 (0x481), region = 40 }
  0x3f   : > { %s5311_s1 = sand.u32 1, %s5117_s21  }
  0x40   : > { %s4872_s10 = sshll.u32 %s5311_s1, 8  ;;  %s261_s11 = scalar_lea.sflag [#allocation4], %s5311_s1 }
  0x41   : > { %s5315_s22 = scalar_lea.vmem [#allocation3], %s4872_s10 }
  0x42   : > { %5100 = dma.done.wait (%p5242_p8), %s261_s11, 4096  }
  0x43   : > { %5102 = vsyncadd (%p5242_p8), %s261_s11, 4294963200  ;;  %s270_s27 = scalar_lea.sflag [#allocation7], %s5311_s1  ;;  %s5322_s8 = scalar_lea.vmem [#allocation6], %s4872_s10 }
  0x44   : > { %5104 = dma.done.wait (%p5242_p8), %s270_s27, 4096  }
  0x45   : > { %5106 = vsyncadd (%p5242_p8), %s270_s27, 4294963200  ;;  %s306_s12 = sld [smem:[#allocation2]]  ;;  %v307_v0 = vld [vmem:[%s5315_s22] sm:$0xff]  ;;  %v308_v2 = vld [vmem:[%s5315_s22 + $0x8] sm:$0xff]  ;;  %s5140_s6 = smov 127  }
  0x46   : > { %v309_v3 = vld [vmem:[%s5315_s22 + $0x10] sm:$0xff]  ;;  %vm468_vm0 = vcmp.gt.f32.partialorder %v307_v0, 0.0  ;;  %v310_v6 = vld [vmem:[%s5315_s22 + $0x18] sm:$0xff]  ;;  %vm469_vm1 = vcmp.gt.f32.partialorder %v308_v2, 0.0  ;;  %v311_v9 = vld [vmem:[%s5315_s22 + $0x20] sm:$0xff]  ;;  %s5143_s18 = smov 8  }
  0x47   : > { %vm470_vm2 = vcmp.gt.f32.partialorder %v309_v3, 0.0  ;;  %vm471_vm3 = vcmp.gt.f32.partialorder %v310_v6, 0.0  ;;  %v312_v11 = vld [vmem:[%s5315_s22 + $0x28] sm:$0xff]  ;;  %vm472_vm4 = vcmp.gt.f32.partialorder %v311_v9, 0.0  ;;  %v313_v17 = vld [vmem:[%s5315_s22 + $0x30] sm:$0xff]  ;;  %v314_v18 = vld [vmem:[%s5315_s22 + $0x38] sm:$0xff] }
  0x48   : > { %vm473_vm5 = vcmp.gt.f32.partialorder %v312_v11, 0.0  ;;  %vm474_vm6 = vcmp.gt.f32.partialorder %v313_v17, 0.0  ;;  %v315_v23 = vld [vmem:[%s5315_s22 + $0x40] sm:$0xff]  ;;  %vm475_vm7 = vcmp.gt.f32.partialorder %v314_v18, 0.0  ;;  %v316_v24 = vld [vmem:[%s5315_s22 + $0x48] sm:$0xff]  ;;  %v317_v29 = vld [vmem:[%s5315_s22 + $0x50] sm:$0xff] }
  0x49   : > { %vm476_vm8 = vcmp.gt.f32.partialorder %v315_v23, 0.0  ;;  %vm477_vm9 = vcmp.gt.f32.partialorder %v316_v24, 0.0  ;;  %v318_v30 = vld [vmem:[%s5315_s22 + $0x58] sm:$0xff]  ;;  %vm478_vm10 = vcmp.gt.f32.partialorder %v317_v29, 0.0  ;;  %v319_v35 = vld [vmem:[%s5315_s22 + $0x60] sm:$0xff]  ;;  %v320_v36 = vld [vmem:[%s5315_s22 + $0x68] sm:$0xff] }
  0x4a   : > { %vm479_vm11 = vcmp.gt.f32.partialorder %v318_v30, 0.0  ;;  %vm480_vm12 = vcmp.gt.f32.partialorder %v319_v35, 0.0  ;;  %v321_v41 = vld [vmem:[%s5315_s22 + $0x70] sm:$0xff]  ;;  %vm481_vm13 = vcmp.gt.f32.partialorder %v320_v36, 0.0  ;;  %v322_v42 = vld [vmem:[%s5315_s22 + $0x78] sm:$0xff]  ;;  %v323_v47 = vld [vmem:[%s5315_s22 + $0x80] sm:$0xff] }
  0x4b   : > { %v5329_v1 = vstv %s306_s12  ;;  %vm482_vm14 = vcmp.gt.f32.partialorder %v321_v41, 0.0  ;;  %vm483_vm15 = vcmp.gt.f32.partialorder %v322_v42, 0.0  ;;  %v324_v48 = vld [vmem:[%s5315_s22 + $0x88] sm:$0xff]  ;;  %v325_v53 = vld [vmem:[%s5315_s22 + $0x90] sm:$0xff]  ;;  %v326_v54 = vld [vmem:[%s5315_s22 + $0x98] sm:$0xff]  ;;  %s5144_s29 = smov 16  }
  0x4c   : > { %v500_v4 = vmul.f32 %v5329_v1, %v307_v0  ;;  %v501_v5 = vmul.f32 %v5329_v1, %v308_v2  ;;  %v502_v7 = vmul.f32 %v5329_v1, %v309_v3  ;;  %v503_v8 = vmul.f32 %v5329_v1, %v310_v6  ;;  %v327_v59 = vld [vmem:[%s5315_s22 + $0xa0] sm:$0xff]  ;;  %v328_v60 = vld [vmem:[%s5315_s22 + $0xa8] sm:$0xff]  ;;  %s5145_s13 = smov 24   ;;  %s5146_s14 = smov 32  }
  0x4d   : > { %v504_v14 = vmul.f32 %v5329_v1, %v311_v9  ;;  %v505_v16 = vmul.f32 %v5329_v1, %v312_v11  ;;  %v506_v20 = vmul.f32 %v5329_v1, %v313_v17  ;;  %v507_v22 = vmul.f32 %v5329_v1, %v314_v18  ;;  %s5147_s16 = smov 40   ;;  %s5148_s0 = smov 48  }
  0x4e   : > { %v532_v10 = vsel %vm468_vm0, %v307_v0, %v500_v4  ;;  %v534_v12 = vsel %vm470_vm2, %v309_v3, %v502_v7  ;;  %v533_v13 = vsel %vm469_vm1, %v308_v2, %v501_v5  ;;  %v535_v15 = vsel %vm471_vm3, %v310_v6, %v503_v8  ;;  %v329_v2 = vld [vmem:[%s5315_s22 + $0xb0] sm:$0xff]  ;;  %v330_v3 = vld [vmem:[%s5315_s22 + $0xb8] sm:$0xff]  ;;  %v331_v8 = vld [vmem:[%s5315_s22 + $0xc0] sm:$0xff]  ;;  %s5149_s26 = smov 56   ;;  %s5150_s28 = smov 64  }
  0x4f   : > { %596 = vrot.lane.b32.xlu0 %v532_v10, %s5140_s6  ;;  %600 = vrot.lane.b32.xlu1 %v534_v12, %s5140_s6  ;;  %v536_v19 = vsel %vm472_vm4, %v311_v9, %v504_v14  ;;  %v537_v21 = vsel %vm473_vm5, %v312_v11, %v505_v16  ;;  %v538_v25 = vsel %vm474_vm6, %v313_v17, %v506_v20  ;;  %vm484_vm0 = vcmp.gt.f32.partialorder %v323_v47, 0.0  ;;  %v332_v9 = vld [vmem:[%s5315_s22 + $0xc8] sm:$0xff]  ;;  %v333_v14 = vld [vmem:[%s5315_s22 + $0xd0] sm:$0xff]  ;;  %s5151_s30 = smov 72   ;;  %s5152_s15 = smov 80  }
  0x50   : > { %v508_v26 = vmul.f32 %v5329_v1, %v315_v23  ;;  %v539_v27 = vsel %vm475_vm7, %v314_v18, %v507_v22  ;;  %v509_v28 = vmul.f32 %v5329_v1, %v316_v24  ;;  %v510_v32 = vmul.f32 %v5329_v1, %v317_v29  ;;  %v335_v20 = vld [vmem:[%s5315_s22 + $0xe0] sm:$0xff]  ;;  %s5153_s17 = smov 88   ;;  %s5154_s19 = smov 96  }
  0x51   : > { %v511_v34 = vmul.f32 %v5329_v1, %v318_v30  ;;  %v512_v38 = vmul.f32 %v5329_v1, %v319_v35  ;;  %v513_v40 = vmul.f32 %v5329_v1, %v320_v36  ;;  %v514_v44 = vmul.f32 %v5329_v1, %v321_v41  ;;  %s5155_s10 = smov 104   ;;  %s5156_s11 = smov 112  }
  0x52   : > { %v540_v31 = vsel %vm476_vm8, %v315_v23, %v508_v26  ;;  %v541_v33 = vsel %vm477_vm9, %v316_v24, %v509_v28  ;;  %v542_v37 = vsel %vm478_vm10, %v317_v29, %v510_v32  ;;  %v515_v46 = vmul.f32 %v5329_v1, %v322_v42  ;;  %v337_v26 = vld [vmem:[%s5315_s22 + $0xf0] sm:$0xff]  ;;  %s4742_s12 = scalar_lea.sflag [#allocation5], %s5311_s1 }
  0x53   : > { %598 = vrot.lane.b32.xlu0 %v533_v13, %s5140_s6  ;;  %602 = vrot.lane.b32.xlu1 %v535_v15, %s5140_s6  ;;  %v543_v39 = vsel %vm479_vm11, %v318_v30, %v511_v34  ;;  %v544_v43 = vsel %vm480_vm12, %v319_v35, %v512_v38  ;;  %v545_v45 = vsel %vm481_vm13, %v320_v36, %v513_v40  ;;  %vm485_vm1 = vcmp.gt.f32.partialorder %v324_v48, 0.0  ;;  %v334_v15 = vld [vmem:[%s5315_s22 + $0xd8] sm:$0xff]  ;;  %v339_v34 = vld [vmem:[%s5322_s8] sm:$0xff] }
  0x54   : > { %v546_v49 = vsel %vm482_vm14, %v321_v41, %v514_v44  ;;  %v516_v50 = vmul.f32 %v5329_v1, %v323_v47  ;;  %v547_v51 = vsel %vm483_vm15, %v322_v42, %v515_v46  ;;  %v517_v52 = vmul.f32 %v5329_v1, %v324_v48  ;;  %v340_v36 = vld [vmem:[%s5322_s8 + $0x8] sm:$0xff]  ;;  %v341_v42 = vld [vmem:[%s5322_s8 + $0x10] sm:$0xff]  ;;  %v342_v46 = vld [vmem:[%s5322_s8 + $0x18] sm:$0xff] }
  0x55   : > { %v518_v56 = vmul.f32 %v5329_v1, %v325_v53  ;;  %v519_v58 = vmul.f32 %v5329_v1, %v326_v54  ;;  %vm486_vm2 = vcmp.gt.f32.partialorder %v325_v53, 0.0  ;;  %vm487_vm3 = vcmp.gt.f32.partialorder %v326_v54, 0.0 }
  0x56   : > { %v548_v55 = vsel %vm484_vm0, %v323_v47, %v516_v50  ;;  %v549_v57 = vsel %vm485_vm1, %v324_v48, %v517_v52  ;;  %v520_v62 = vmul.f32 %v5329_v1, %v327_v59  ;;  %v521_v0 = vmul.f32 %v5329_v1, %v328_v60 }
  0x57   : > { %604 = vrot.lane.b32.xlu0 %v536_v19, %s5140_s6  ;;  %606 = vrot.lane.b32.xlu1 %v537_v21, %s5140_s6  ;;  %v550_v61 = vsel %vm486_vm2, %v325_v53, %v518_v56  ;;  %v551_v63 = vsel %vm487_vm3, %v326_v54, %v519_v58  ;;  %vm488_vm4 = vcmp.gt.f32.partialorder %v327_v59, 0.0  ;;  %vm489_vm5 = vcmp.gt.f32.partialorder %v328_v60, 0.0  ;;  %v336_v21 = vld [vmem:[%s5315_s22 + $0xe8] sm:$0xff]  ;;  %v343_v53 = vld [vmem:[%s5322_s8 + $0x20] sm:$0xff] }
  0x58   : > { %v552_v4 = vsel %vm488_vm4, %v327_v59, %v520_v62  ;;  %v522_v5 = vmul.f32 %v5329_v1, %v329_v2  ;;  %v553_v6 = vsel %vm489_vm5, %v328_v60, %v521_v0  ;;  %v523_v7 = vmul.f32 %v5329_v1, %v330_v3  ;;  %v344_v56 = vld [vmem:[%s5322_s8 + $0x28] sm:$0xff] }
  0x59   : > { %vm490_vm6 = vcmp.gt.f32.partialorder %v329_v2, 0.0  ;;  %vm491_vm7 = vcmp.gt.f32.partialorder %v330_v3, 0.0  ;;  %v524_v11 = vmul.f32 %v5329_v1, %v331_v8  ;;  %v525_v13 = vmul.f32 %v5329_v1, %v332_v9 }
  0x5a   : > { %v554_v10 = vsel %vm490_vm6, %v329_v2, %v522_v5  ;;  %v555_v12 = vsel %vm491_vm7, %v330_v3, %v523_v7  ;;  %vm492_vm8 = vcmp.gt.f32.partialorder %v331_v8, 0.0  ;;  %vm493_vm9 = vcmp.gt.f32.partialorder %v332_v9, 0.0  ;;  %v346_v3 = vld [vmem:[%s5322_s8 + $0x38] sm:$0xff] }
  0x5b   : > { %608 = vrot.lane.b32.xlu0 %v538_v25, %s5140_s6  ;;  %610 = vrot.lane.b32.xlu1 %v539_v27, %s5140_s6  ;;  %v556_v16 = vsel %vm492_vm8, %v331_v8, %v524_v11  ;;  %v526_v17 = vmul.f32 %v5329_v1, %v333_v14  ;;  %v557_v18 = vsel %vm493_vm9, %v332_v9, %v525_v13  ;;  %vm494_vm10 = vcmp.gt.f32.partialorder %v333_v14, 0.0  ;;  %v338_v27 = vld [vmem:[%s5315_s22 + $0xf8] sm:$0xff]  ;;  %v348_v13 = vld [vmem:[%s5322_s8 + $0x48] sm:$0xff]  ;;  %s5157_s22 = smov 120  }
  0x5c   : > { %v527_v19 = vmul.f32 %v5329_v1, %v334_v15  ;;  %vm495_vm11 = vcmp.gt.f32.partialorder %v334_v15, 0.0  ;;  %v528_v23 = vmul.f32 %v5329_v1, %v335_v20  ;;  %v529_v25 = vmul.f32 %v5329_v1, %v336_v21 }
  0x5d   : > { %v558_v22 = vsel %vm494_vm10, %v333_v14, %v526_v17  ;;  %vm496_vm12 = vcmp.gt.f32.partialorder %v335_v20, 0.0  ;;  %vm497_vm13 = vcmp.gt.f32.partialorder %v336_v21, 0.0  ;;  %v530_v29 = vmul.f32 %v5329_v1, %v337_v26 }
  0x5e   : > { %v559_v24 = vsel %vm495_vm11, %v334_v15, %v527_v19  ;;  %v560_v28 = vsel %vm496_vm12, %v335_v20, %v528_v23  ;;  %v561_v30 = vsel %vm497_vm13, %v336_v21, %v529_v25  ;;  %vm498_vm14 = vcmp.gt.f32.partialorder %v337_v26, 0.0  ;;  %v349_v20 = vld [vmem:[%s5322_s8 + $0x50] sm:$0xff]  ;;  %v350_v23 = vld [vmem:[%s5322_s8 + $0x58] sm:$0xff] }
  0x5f   : > { %612 = vrot.lane.b32.xlu0 %v540_v31, %s5140_s6  ;;  %614 = vrot.lane.b32.xlu1 %v541_v33, %s5140_s6  ;;  %v531_v31 = vmul.f32 %v5329_v1, %v338_v27  ;;  %vm499_vm15 = vcmp.gt.f32.partialorder %v338_v27, 0.0  ;;  %v562_v32 = vsel %vm498_vm14, %v337_v26, %v530_v29  ;;  %v404_v35 = vmul.f32 %v5329_v1, %v339_v34 }
  0x60   : > { %vm371_vm0 = vcmp.gt.f32.partialorder %v339_v34, 0.0  ;;  %v405_v38 = vmul.f32 %v5329_v1, %v340_v36  ;;  %vm372_vm1 = vcmp.gt.f32.partialorder %v340_v36, 0.0  ;;  %vm373_vm2 = vcmp.gt.f32.partialorder %v341_v42, 0.0 }
  0x61   : > { %v563_v33 = vsel %vm499_vm15, %v338_v27, %v531_v31  ;;  %vm374_vm3 = vcmp.gt.f32.partialorder %v342_v46, 0.0  ;;  %vm375_vm4 = vcmp.gt.f32.partialorder %v343_v53, 0.0  ;;  %v409_v59 = vmul.f32 %v5329_v1, %v344_v56  ;;  %v351_v31 = vld [vmem:[%s5322_s8 + $0x60] sm:$0xff] }
  0x62   : > { %v437_v41 = vsel %vm372_vm1, %v340_v36, %v405_v38  ;;  %vm376_vm5 = vcmp.gt.f32.partialorder %v344_v56, 0.0  ;;  %vm378_vm7 = vcmp.gt.f32.partialorder %v346_v3, 0.0  ;;  %v413_v14 = vmul.f32 %v5329_v1, %v348_v13 }
  0x63   : > { %616 = vrot.lane.b32.xlu0 %v542_v37, %s5140_s6  ;;  %618 = vrot.lane.b32.xlu1 %v543_v39, %s5140_s6  ;;  %v436_v37 = vsel %vm371_vm0, %v339_v34, %v404_v35  ;;  %v441_v62 = vsel %vm376_vm5, %v344_v56, %v409_v59  ;;  %vm380_vm9 = vcmp.gt.f32.partialorder %v348_v13, 0.0  ;;  %vm381_vm10 = vcmp.gt.f32.partialorder %v349_v20, 0.0  ;;  %v352_v35 = vld [vmem:[%s5322_s8 + $0x68] sm:$0xff] }
  0x64   : > { %v445_v19 = vsel %vm380_vm9, %v348_v13, %v413_v14  ;;  %vm382_vm11 = vcmp.gt.f32.partialorder %v350_v23, 0.0  ;;  %vm383_vm12 = vcmp.gt.f32.partialorder %v351_v31, 0.0  ;;  %v417_v38 = vmul.f32 %v5329_v1, %v352_v35  ;;  %v356_v59 = vld [vmem:[%s5322_s8 + $0x88] sm:$0xff] }
  0x65   : > { %vm384_vm13 = vcmp.gt.f32.partialorder %v352_v35, 0.0  ;;  %vm388_vm1 = vcmp.gt.f32.partialorder %v356_v59, 0.0 }
  0x67   : > { %620 = vrot.lane.b32.xlu0 %v544_v43, %s5140_s6  ;;  %622 = vrot.lane.b32.xlu1 %v545_v45, %s5140_s6  ;;  %v406_v45 = vmul.f32 %v5329_v1, %v341_v42 }
  0x69   : > { %v438_v48 = vsel %vm373_vm2, %v341_v42, %v406_v45 }
  0x6b   : > { %624 = vrot.lane.b32.xlu0 %v546_v49, %s5140_s6  ;;  %626 = vrot.lane.b32.xlu1 %v547_v51, %s5140_s6  ;;  %v407_v49 = vmul.f32 %v5329_v1, %v342_v46 }
  0x6d   : > { %v439_v52 = vsel %vm374_vm3, %v342_v46, %v407_v49 }
  0x6f   : > { %628 = vrot.lane.b32.xlu0 %v548_v55, %s5140_s6  ;;  %630 = vrot.lane.b32.xlu1 %v549_v57, %s5140_s6  ;;  %v408_v55 = vmul.f32 %v5329_v1, %v343_v53 }
  0x71   : > { %v440_v58 = vsel %vm375_vm4, %v343_v53, %v408_v55  ;;  %v355_v55 = vld [vmem:[%s5322_s8 + $0x80] sm:$0xff] }
  0x72   : > { %vm387_vm0 = vcmp.gt.f32.partialorder %v355_v55, 0.0 }
  0x73   : > { %632 = vrot.lane.b32.xlu0 %v550_v61, %s5140_s6  ;;  %634 = vrot.lane.b32.xlu1 %v551_v63, %s5140_s6  ;;  %v345_v63 = vld [vmem:[%s5322_s8 + $0x30] sm:$0xff] }
  0x74   : > { %v410_v2 = vmul.f32 %v5329_v1, %v345_v63  ;;  %vm377_vm6 = vcmp.gt.f32.partialorder %v345_v63, 0.0 }
  0x76   : > { %v442_v5 = vsel %vm377_vm6, %v345_v63, %v410_v2 }
  0x77   : > { %636 = vrot.lane.b32.xlu0 %v552_v4, %s5140_s6  ;;  %638 = vrot.lane.b32.xlu1 %v553_v6, %s5140_s6  ;;  %v411_v6 = vmul.f32 %v5329_v1, %v346_v3 }
  0x79   : > { %v443_v9 = vsel %vm378_vm7, %v346_v3, %v411_v6 }
  0x7b   : > { %640 = vrot.lane.b32.xlu0 %v554_v10, %s5140_s6  ;;  %642 = vrot.lane.b32.xlu1 %v555_v12, %s5140_s6  ;;  %v347_v10 = vld [vmem:[%s5322_s8 + $0x40] sm:$0xff] }
  0x7c   : > { %v412_v12 = vmul.f32 %v5329_v1, %v347_v10  ;;  %vm379_vm8 = vcmp.gt.f32.partialorder %v347_v10, 0.0 }
  0x7f   : > { %644 = vrot.lane.b32.xlu0 %v556_v16, %s5140_s6  ;;  %646 = vrot.lane.b32.xlu1 %v557_v18, %s5140_s6  ;;  %v444_v16 = vsel %vm379_vm8, %v347_v10, %v412_v12 }
  0x83   : > { %648 = vrot.lane.b32.xlu0 %v558_v22, %s5140_s6  ;;  %650 = vrot.lane.b32.xlu1 %v559_v24, %s5140_s6  ;;  %v414_v22 = vmul.f32 %v5329_v1, %v349_v20  ;;  %v415_v24 = vmul.f32 %v5329_v1, %v350_v23 }
  0x85   : > { %v446_v26 = vsel %vm381_vm10, %v349_v20, %v414_v22  ;;  %v447_v29 = vsel %vm382_vm11, %v350_v23, %v415_v24 }
  0x87   : > { %652 = vrot.lane.b32.xlu0 %v560_v28, %s5140_s6  ;;  %654 = vrot.lane.b32.xlu1 %v561_v30, %s5140_s6 }
  0x8b   : > { %656 = vrot.lane.b32.xlu0 %v562_v32, %s5140_s6  ;;  %658 = vrot.lane.b32.xlu1 %v563_v33, %s5140_s6  ;;  %v416_v33 = vmul.f32 %v5329_v1, %v351_v31 }
  0xc1   : > { %v597_v39 = vpop.permute.xlu0 %596  ;;  %v601_v47 = vpop.permute.xlu1 %600 }
  0xc2   : > { %v692_v40 = vadd.f32 %v597_v39, %v436_v37  ;;  %v694_v50 = vadd.f32 %v601_v47, %v438_v48  ;;  %v448_v37 = vsel %vm383_vm12, %v351_v31, %v416_v33  ;;  %v354_v47 = vld [vmem:[%s5322_s8 + $0x78] sm:$0xff] }
  0xc3   : > { %v419_v49 = vmul.f32 %v5329_v1, %v354_v47  ;;  %vm386_vm15 = vcmp.gt.f32.partialorder %v354_v47, 0.0 }
  0xc4   : > { %724 = vxpose.xlu0.b32.start.end [1/1] (short) (narrow) %v692_v40, 32 }
  0xc5   : > { %v599_v43 = vpop.permute.xlu0 %598  ;;  %v603_v51 = vpop.permute.xlu1 %602  ;;  %v451_v53 = vsel %vm386_vm15, %v354_v47, %v419_v49  ;;  %v363_v49 = vld [vmem:[%s5322_s8 + $0xc0] sm:$0xff] }
  0xc6   : > { %v693_v44 = vadd.f32 %v599_v43, %v437_v41  ;;  %v695_v54 = vadd.f32 %v603_v51, %v439_v52  ;;  %v449_v41 = vsel %vm384_vm13, %v352_v35, %v417_v38  ;;  %v353_v43 = vld [vmem:[%s5322_s8 + $0x70] sm:$0xff]  ;;  %v1753_v38 = vlaneseq }
  0xc7   : > { %v418_v46 = vmul.f32 %v5329_v1, %v353_v43  ;;  %vm385_vm14 = vcmp.gt.f32.partialorder %v353_v43, 0.0  ;;  %vm395_vm8 = vcmp.gt.f32.partialorder %v363_v49, 0.0 }
  0xc8   : > { %756 = vxpose.xlu1.b32.start.end [1/1] (short) (narrow) %v693_v44, 32 }
  0xc9   : > { %v605_v57 = vpop.permute.xlu0 %604  ;;  %v607_v61 = vpop.permute.xlu1 %606 }
  0xca   : > { %v696_v60 = vadd.f32 %v605_v57, %v440_v58  ;;  %v697_v0 = vadd.f32 %v607_v61, %v441_v62  ;;  %v420_v58 = vmul.f32 %v5329_v1, %v355_v55  ;;  %v421_v61 = vmul.f32 %v5329_v1, %v356_v59 }
  0xcc   : > { %v452_v62 = vsel %vm387_vm0, %v355_v55, %v420_v58  ;;  %v453_v3 = vsel %vm388_vm1, %v356_v59, %v421_v61  ;;  %v428_v55 = vmul.f32 %v5329_v1, %v363_v49  ;;  %vm4384_vm0 = vcmask 64512  }
  0xcd   : > { %v609_v4 = vpop.permute.xlu0 %608  ;;  %v611_v8 = vpop.permute.xlu1 %610  ;;  %vm4389_vm1 = vcmask 130048  }
  0xce   : > { %v698_v7 = vadd.f32 %v609_v4, %v442_v5  ;;  %v699_v11 = vadd.f32 %v611_v8, %v443_v9  ;;  %v357_v4 = vld [vmem:[%s5322_s8 + $0x90] sm:$0xff]  ;;  %v358_v9 = vld [vmem:[%s5322_s8 + $0x98] sm:$0xff] }
  0xcf   : > { %vm389_vm2 = vcmp.gt.f32.partialorder %v357_v4, 0.0  ;;  %v423_v10 = vmul.f32 %v5329_v1, %v358_v9  ;;  %vm390_vm3 = vcmp.gt.f32.partialorder %v358_v9, 0.0 }
  0xd1   : > { %788 = vxpose.xlu0.b32.start.end [1/1] (short) (narrow) %v694_v50, 32  ;;  %v613_v15 = vpop.permute.xlu0 %612  ;;  %v615_v18 = vpop.permute.xlu1 %614  ;;  %v450_v50 = vsel %vm385_vm14, %v353_v43, %v418_v46 }
  0xd2   : > { %v700_v17 = vadd.f32 %v613_v15, %v444_v16  ;;  %v701_v21 = vadd.f32 %v615_v18, %v445_v19  ;;  %v455_v15 = vsel %vm390_vm3, %v358_v9, %v423_v10  ;;  %v359_v16 = vld [vmem:[%s5322_s8 + $0xa0] sm:$0xff]  ;;  %vm4399_vm3 = vcmask 261120  }
  0xd3   : > { %v424_v20 = vmul.f32 %v5329_v1, %v359_v16  ;;  %vm391_vm4 = vcmp.gt.f32.partialorder %v359_v16, 0.0 }
  0xd5   : > { %820 = vxpose.xlu1.b32.start.end [1/1] (short) (narrow) %v695_v54, 32  ;;  %v617_v25 = vpop.permute.xlu0 %616  ;;  %v619_v28 = vpop.permute.xlu1 %618 }
  0xd6   : > { %v702_v27 = vadd.f32 %v617_v25, %v446_v26  ;;  %v703_v32 = vadd.f32 %v619_v28, %v447_v29  ;;  %v456_v25 = vsel %vm391_vm4, %v359_v16, %v424_v20  ;;  %vm4404_vm4 = vcmask 326656  }
  0xd9   : > { %v621_v30 = vpop.permute.xlu0 %620  ;;  %v623_v34 = vpop.permute.xlu1 %622 }
  0xda   : > { %v704_v40 = vadd.f32 %v621_v30, %v448_v37  ;;  %v705_v44 = vadd.f32 %v623_v34, %v449_v41  ;;  %v361_v30 = vld [vmem:[%s5322_s8 + $0xb0] sm:$0xff]  ;;  %v362_v34 = vld [vmem:[%s5322_s8 + $0xb8] sm:$0xff] }
  0xdb   : > { %v426_v35 = vmul.f32 %v5329_v1, %v361_v30  ;;  %vm393_vm6 = vcmp.gt.f32.partialorder %v361_v30, 0.0  ;;  %v427_v41 = vmul.f32 %v5329_v1, %v362_v34  ;;  %vm394_vm7 = vcmp.gt.f32.partialorder %v362_v34, 0.0 }
  0xdd   : > { %v625_v36 = vpop.permute.xlu0 %624  ;;  %v627_v39 = vpop.permute.xlu1 %626  ;;  %v459_v47 = vsel %vm394_vm7, %v362_v34, %v427_v41  ;;  %vm4419_vm7 = vcmask 523264  }
  0xde   : > { %852 = vxpose.xlu0.b32.start.end [1/1] (short) (narrow) %v696_v60, 32  ;;  %v706_v52 = vadd.f32 %v625_v36, %v450_v50  ;;  %v707_v56 = vadd.f32 %v627_v39, %v451_v53  ;;  %v5141_v36 = vmov 1983009808  }
  0xdf   : > { %v1751_v37 = vunpack.c.l.s4 %v5141_v36 }
  0xe1   : > { %v629_v42 = vpop.permute.xlu0 %628  ;;  %v631_v45 = vpop.permute.xlu1 %630  ;;  %v1752_v43 = vunpack.c.0.s8 %v1751_v37 }
  0xe2   : > { %884 = vxpose.xlu1.b32.start.end [1/1] (short) (narrow) %v697_v0, 32  ;;  %v708_v0 = vadd.f32 %v629_v42, %v452_v62  ;;  %v709_v5 = vadd.f32 %v631_v45, %v453_v3  ;;  %v458_v42 = vsel %vm393_vm6, %v361_v30, %v426_v35  ;;  %vm4414_vm6 = vcmask 457728  }
  0xe5   : > { %v633_v48 = vpop.permute.xlu0 %632  ;;  %v635_v51 = vpop.permute.xlu1 %634 }
  0xe6   : > { %v711_v18 = vadd.f32 %v635_v51, %v455_v15 }
  0xe9   : > { %v637_v54 = vpop.permute.xlu0 %636  ;;  %v639_v57 = vpop.permute.xlu1 %638 }
  0xea   : > { %v712_v26 = vadd.f32 %v637_v54, %v456_v25 }
  0xeb   : > { %916 = vxpose.xlu0.b32.start.end [1/1] (short) (narrow) %v698_v7, 32  ;;  %v422_v7 = vmul.f32 %v5329_v1, %v357_v4 }
  0xed   : > { %v5461_v60 = vpop.permute.xlu0 %640  ;;  %v5464_v63 = vpop.permute.xlu1 %642 }
  0xee   : > { %v715_v54 = vadd.f32 %v5464_v63, %v459_v47 }
  0xef   : > { %948 = vxpose.xlu1.b32.start.end [1/1] (short) (narrow) %v699_v11, 32  ;;  %v454_v11 = vsel %vm389_vm2, %v357_v4, %v422_v7  ;;  %vm4394_vm2 = vcmask 195584  }
  0xf0   : > { %v710_v14 = vadd.f32 %v633_v48, %v454_v11  ;;  %v714_v48 = vadd.f32 %v5461_v60, %v458_v42  ;;  %v365_v42 = vld [vmem:[%s5322_s8 + $0xd0] sm:$0xff] }
  0xf1   : > { %v5466_v2 = vpop.permute.xlu0 %644  ;;  %v5469_v6 = vpop.permute.xlu1 %646  ;;  %vm397_vm10 = vcmp.gt.f32.partialorder %v365_v42, 0.0 }
  0xf5   : > { %v5472_v8 = vpop.permute.xlu0 %648  ;;  %v5476_v12 = vpop.permute.xlu1 %650 }
  0xf8   : > { %980 = vxpose.xlu0.b32.start.end [1/1] (short) (narrow) %v700_v17, 32 }
  0xf9   : > { %v5478_v13 = vpop.permute.xlu0 %652  ;;  %v5481_v17 = vpop.permute.xlu1 %654 }
  0xfc   : > { %1012 = vxpose.xlu1.b32.start.end [1/1] (short) (narrow) %v701_v21, 32  ;;  %v360_v21 = vld [vmem:[%s5322_s8 + $0xa8] sm:$0xff] }
  0xfd   : > { %v5483_v19 = vpop.permute.xlu0 %656  ;;  %v5487_v22 = vpop.permute.xlu1 %658  ;;  %v425_v24 = vmul.f32 %v5329_v1, %v360_v21  ;;  %vm392_vm5 = vcmp.gt.f32.partialorder %v360_v21, 0.0 }
  0xff   : > { %v457_v29 = vsel %vm392_vm5, %v360_v21, %v425_v24  ;;  %vm4409_vm5 = vcmask 392192  }
 0x100   : > { %v713_v31 = vadd.f32 %v639_v57, %v457_v29 }
 0x105   : > { %1044 = vxpose.xlu0.b32.start.end [1/1] (short) (narrow) %v702_v27, 32 }
 0x109   : > { %1076 = vxpose.xlu1.b32.start.end [1/1] (short) (narrow) %v703_v32, 32 }
 0x112   : > { %1108 = vxpose.xlu0.b32.start.end [1/1] (short) (narrow) %v704_v40, 32 }
 0x116   : > { %1140 = vxpose.xlu1.b32.start.end [1/1] (short) (narrow) %v705_v44, 32  ;;  %v5500_v44 = vshrl.u32 %v1753_v38, 7 }
 0x118   : > { %v5508_v53 = vsub.s32 %v1752_v43, %v5500_v44 }
 0x11f   : > { %1172 = vxpose.xlu0.b32.start.end [1/1] (short) (narrow) %v706_v52, 32  ;;  %v364_v52 = vld [vmem:[%s5322_s8 + $0xc8] sm:$0xff] }
 0x120   : > { %v429_v60 = vmul.f32 %v5329_v1, %v364_v52  ;;  %vm396_vm9 = vcmp.gt.f32.partialorder %v364_v52, 0.0 }
 0x123   : > { %1204 = vxpose.xlu1.b32.start.end [1/1] (short) (narrow) %v707_v56, 32 }
 0x12c   : > { %1236 = vxpose.xlu0.b32.start.end [1/1] (short) (narrow) %v708_v0, 32 }
 0x130   : > { %1268 = vxpose.xlu1.b32.start.end [1/1] (short) (narrow) %v709_v5, 32  ;;  %v460_v5 = vsel %vm395_vm8, %v363_v49, %v428_v55  ;;  %v430_v55 = vmul.f32 %v5329_v1, %v365_v42  ;;  %vm4424_vm8 = vcmask 588800  }
 0x131   : > { %v716_v24 = vadd.f32 %v5466_v2, %v460_v5 }
 0x139   : > { %1300 = vxpose.xlu0.b32.start.end [1/1] (short) (narrow) %v710_v14, 32 }
 0x13d   : > { %1332 = vxpose.xlu1.b32.start.end [1/1] (short) (narrow) %v711_v18, 32 }
 0x140   : > { %v740_v23 = vpop.trf.xlu0 }
 0x144   : > { %v772_v27 = vpop.trf.xlu1  ;;  %v741_v28 = vpop.trf.xlu0 }
 0x146   : > { %1364 = vxpose.xlu0.b32.start.end [1/1] (short) (narrow) %v712_v26, 32 }
 0x148   : > { %v773_v32 = vpop.trf.xlu1  ;;  %v5491_v33 = vpop.trf.xlu0 }
 0x14a   : > { %1396 = vxpose.xlu1.b32.start.end [1/1] (short) (narrow) %v713_v31, 32 }
 0x14c   : > { %v5495_v39 = vpop.trf.xlu1  ;;  %v5497_v40 = vpop.trf.xlu0 }
 0x150   : > { %v5502_v45 = vpop.trf.xlu1  ;;  %v804_v46 = vpop.trf.xlu0 }
 0x151   : > { %v1748_v50 = vcombine.low %v740_v23, %v804_v46  ;;  %v1749_v51 = vcombine.high %v740_v23, %v804_v46  ;;  %v461_v23 = vsel %vm396_vm9, %v364_v52, %v429_v60  ;;  %vm4429_vm9 = vcmask 654336  }
 0x153   : > { %1428 = vxpose.xlu0.b32.start.end [1/1] (short) (narrow) %v714_v48, 32  ;;  %v5514_v0 = vrot.slane %v1748_v50, %v5508_v53  ;;  %v5517_v3 = vrot.slane %v1749_v51, %v5508_v53  ;;  %v717_v51 = vadd.f32 %v5469_v6, %v461_v23  ;;  %v370_v23 = vld [vmem:[%s5322_s8 + $0xf8] sm:$0xff] }
 0x154   : > { %v836_v56 = vpop.trf.xlu1  ;;  %v805_v57 = vpop.trf.xlu0  ;;  %vm402_vm14 = vcmp.gt.f32.partialorder %v370_v23, 0.0 }
 0x155   : > { %v1764_v58 = vcombine.low %v772_v27, %v836_v56  ;;  %v1765_v59 = vcombine.high %v772_v27, %v836_v56  ;;  %v2292_v61 = vcombine.low %v741_v28, %v805_v57  ;;  %v2293_v62 = vcombine.high %v741_v28, %v805_v57 }
 0x157   : > { %v5520_v4 = vrot.slane %v1764_v58, %v5508_v53  ;;  %v5523_v63 = vrot.slane %v1765_v59, %v5508_v53  ;;  %1460 = vxpose.xlu1.b32.start.end [1/1] (short) (narrow) %v715_v54, 32  ;;  %v5537_v25 = vrot.slane %v2292_v61, %v5508_v53  ;;  %v5540_v26 = vrot.slane %v2293_v62, %v5508_v53  ;;  %v366_v61 = vld [vmem:[%s5322_s8 + $0xd8] sm:$0xff] }
 0x158   : > { %v837_v7 = vpop.trf.xlu1  ;;  %v806_v9 = vpop.trf.xlu0  ;;  %v5142_v62 = vmov 1934713408   ;;  %vm398_vm11 = vcmp.gt.f32.partialorder %v366_v61, 0.0 }
 0x159   : > { %v1812_v10 = vcombine.low %v5514_v0, %v5520_v4  ;;  %v1813_v11 = vcombine.high %v5514_v0, %v5520_v4  ;;  %v1828_v14 = vcombine.low %v5517_v3, %v5523_v63  ;;  %v1829_v15 = vcombine.high %v5517_v3, %v5523_v63 }
 0x15a   : > { %v2308_v16 = vcombine.low %v773_v32, %v837_v7  ;;  %v2309_v18 = vcombine.high %v773_v32, %v837_v7  ;;  %v2836_v20 = vcombine.low %v5491_v33, %v806_v9  ;;  %v2837_v21 = vcombine.high %v5491_v33, %v806_v9 }
 0x15b   : > { %v1815_v60 = vunpack.c.l.s4 %v5142_v62 }
 0x15c   : > { %v5543_v27 = vrot.slane %v2308_v16, %v5508_v53  ;;  %v5546_v28 = vrot.slane %v2309_v18, %v5508_v53  ;;  %v838_v29 = vpop.trf.xlu1  ;;  %v807_v30 = vpop.trf.xlu0  ;;  %v5561_v38 = vrot.slane %v2836_v20, %v5508_v53  ;;  %v368_v18 = vld [vmem:[%s5322_s8 + $0xe8] sm:$0xff]  ;;  %v367_v20 = vld [vmem:[%s5322_s8 + $0xe0] sm:$0xff] }
 0x15d   : > { %v2852_v31 = vcombine.low %v5495_v39, %v838_v29  ;;  %v2853_v32 = vcombine.high %v5495_v39, %v838_v29  ;;  %v3380_v2 = vcombine.low %v5497_v40, %v807_v30  ;;  %v3381_v33 = vcombine.high %v5497_v40, %v807_v30  ;;  %v369_v29 = vld [vmem:[%s5322_s8 + $0xf0] sm:$0xff] }
 0x15e   : > { %v2356_v34 = vcombine.low %v5537_v25, %v5543_v27  ;;  %v2357_v35 = vcombine.high %v5537_v25, %v5543_v27  ;;  %v2372_v36 = vcombine.low %v5540_v26, %v5546_v28  ;;  %v2373_v37 = vcombine.high %v5540_v26, %v5546_v28 }
 0x15f   : > { %v5564_v39 = vrot.slane %v2837_v21, %v5508_v53  ;;  %v5567_v40 = vrot.slane %v2852_v31, %v5508_v53  ;;  %v5570_v41 = vrot.slane %v2853_v32, %v5508_v53  ;;  %v5588_v56 = vrot.slane %v3380_v2, %v5508_v53 }
 0x160   : > { %v839_v43 = vpop.trf.xlu1  ;;  %1492 = vxpose.xlu0.b32.start.end [1/1] (short) (narrow) %v716_v24, 32  ;;  %v5573_v46 = vpop.trf.xlu0  ;;  %v5591_v57 = vrot.slane %v3381_v33, %v5508_v53  ;;  %v431_v21 = vmul.f32 %v5329_v1, %v366_v61  ;;  %v462_v24 = vsel %vm397_vm10, %v365_v42, %v430_v55  ;;  %vm400_vm12 = vcmp.gt.f32.partialorder %v368_v18, 0.0 }
 0x161   : > { %v2900_v47 = vcombine.low %v5561_v38, %v5567_v40  ;;  %v2901_v48 = vcombine.high %v5561_v38, %v5567_v40  ;;  %v2916_v49 = vcombine.low %v5564_v39, %v5570_v41  ;;  %v2917_v50 = vcombine.high %v5564_v39, %v5570_v41 }
 0x162   : > { %v3396_v52 = vcombine.low %v5502_v45, %v839_v43  ;;  %v3397_v54 = vcombine.high %v5502_v45, %v839_v43  ;;  %v433_v32 = vmul.f32 %v5329_v1, %v368_v18  ;;  %v432_v2 = vmul.f32 %v5329_v1, %v367_v20 }
 0x163   : > { %v1816_v33 = vunpack.c.0.s8 %v1815_v60  ;;  %v435_v43 = vmul.f32 %v5329_v1, %v370_v23  ;;  %vm399_vm13 = vcmp.gt.f32.partialorder %v367_v20, 0.0  ;;  %v463_v42 = vsel %vm398_vm11, %v366_v61, %v431_v21 }
 0x164   : > { %v5594_v58 = vrot.slane %v3396_v52, %v5508_v53  ;;  %v5597_v6 = vrot.slane %v3397_v54, %v5508_v53  ;;  %1524 = vxpose.xlu1.b32.start.end [1/1] (short) (narrow) %v717_v51, 32  ;;  %v5599_v45 = vpop.trf.xlu1  ;;  %v5601_v59 = vpop.trf.xlu0  ;;  %v718_v51 = vadd.f32 %v5472_v8, %v462_v24  ;;  %v434_v52 = vmul.f32 %v5329_v1, %v369_v29 }
 0x165   : > { %vm401_vm15 = vcmp.gt.f32.partialorder %v369_v29, 0.0  ;;  %v5631_v62 = vsub.s32 %v1816_v33, %v5500_v44  ;;  %v719_v60 = vadd.f32 %v5476_v12, %v463_v42  ;;  %v467_v16 = vsel %vm402_vm14, %v370_v23, %v435_v43 }
 0x166   : > { %v3444_v5 = vcombine.low %v5588_v56, %v5594_v58  ;;  %v3445_v7 = vcombine.high %v5588_v56, %v5594_v58  ;;  %v465_v56 = vsel %vm400_vm12, %v368_v18, %v433_v32  ;;  %v464_v58 = vsel %vm399_vm13, %v367_v20, %v432_v2 }
 0x167   : > { %v466_v8 = vsel %vm401_vm15, %v369_v29, %v434_v52  ;;  %v5637_v61 = vadd.f32 %v5481_v17, %v465_v56  ;;  %v720_v21 = vadd.f32 %v5478_v13, %v464_v58  ;;  %v5643_v44 = vadd.f32 %v5487_v22, %v467_v16 }
 0x168   : > { %v5617_v30 = vpop.trf.xlu1  ;;  %v5619_v31 = vpop.trf.xlu0  ;;  %v5646_v12 = vadd.f32 %v5483_v19, %v466_v8  ;;  %v5652_v20 = vrot.slane %v1812_v10, %v5631_v62  ;;  %v5658_v13 = vrot.slane %v1813_v11, %v5631_v62  ;;  %v5664_v17 = vrot.slane %v1828_v14, %v5631_v62 }
 0x169   : > { %v5670_v19 = vrot.slane %v1829_v15, %v5631_v62  ;;  %v5676_v22 = vrot.slane %v2356_v34, %v5631_v62  ;;  %v5682_v0 = vrot.slane %v2357_v35, %v5631_v62  ;;  %v5688_v4 = vrot.slane %v2372_v36, %v5631_v62 }
 0x16a   : > { %7688 = vst [vmem:[#allocation15_spill] sm:$0xff] %v5652_v20  ;;  %7689 = vst [vmem:[#allocation16_spill] sm:$0xff] %v5658_v13  ;;  %v5694_v3 = vrot.slane %v2373_v37, %v5631_v62  ;;  %v5700_v11 = vrot.slane %v2900_v47, %v5631_v62  ;;  %v5706_v14 = vrot.slane %v2901_v48, %v5631_v62  ;;  %vm4434_vm10 = vcmask 719872  }
 0x16b   : > { %7690 = vst [vmem:[#allocation17_spill] sm:$0xff] %v5664_v17  ;;  %7691 = vst [vmem:[#allocation18_spill] sm:$0xff] %v5670_v19  ;;  %v5713_v28 = vrot.slane %v3444_v5, %v5631_v62  ;;  %v5716_v34 = vrot.slane %v3445_v7, %v5631_v62  ;;  %v5722_v35 = vrot.slane %v2916_v49, %v5631_v62  ;;  %vm4439_vm11 = vcmask 785408  }
 0x16c   : > { %v5626_v54 = vpop.trf.xlu1  ;;  %v5628_v55 = vpop.trf.xlu0  ;;  %7692 = vst [vmem:[#allocation19_spill] sm:$0xff] %v5676_v22  ;;  %7693 = vst [vmem:[#allocation20_spill] sm:$0xff] %v5682_v0  ;;  %v5728_v36 = vrot.slane %v2917_v50, %v5631_v62  ;;  %v7702_v47 = vcombine.low %v5591_v57, %v5597_v6  ;;  %v7704_v39 = vcombine.high %v5591_v57, %v5597_v6  ;;  %vm4444_vm12 = vcmask 850944  }
 0x16d   : > { %1556 = vxpose.xlu0.b32.start.end [1/1] (short) (narrow) %v718_v51, 32  ;;  %7694 = vst [vmem:[#allocation21_spill] sm:$0xff] %v5688_v4  ;;  %7695 = vst [vmem:[#allocation22_spill] sm:$0xff] %v5694_v3  ;;  %vm4449_vm13 = vcmask 916480   ;;  %vm4454_vm14 = vcmask 982016   ;;  %vm4725_vm15 = vcmask 941056  }
 0x16e   : > { %7696 = vst [vmem:[#allocation23_spill] sm:$0xff] %v5700_v11  ;;  %7697 = vst [vmem:[#allocation24_spill] sm:$0xff] %v5706_v14  ;;  %v5738_v48 = vrot.slane %v7702_v47, %v5631_v62  ;;  %v5744_v41 = vrot.slane %v7704_v39, %v5631_v62 }
 0x16f   : > { %7698 = vst [vmem:[#allocation25_spill] sm:$0xff] %v5713_v28  ;;  %7699 = vst [vmem:[#allocation26_spill] sm:$0xff] %v5716_v34 }
 0x170   : > { %v5634_v24 = vpop.trf.xlu1  ;;  %v932_v1 = vpop.trf.xlu0  ;;  %7700 = vst [vmem:[#allocation27_spill] sm:$0xff] %v5722_v35  ;;  %7701 = vst [vmem:[#allocation28_spill] sm:$0xff] %v5728_v36 }
 0x171   : > { %v1780_v9 = vcombine.low %v5573_v46, %v932_v1  ;;  %v1781_v18 = vcombine.high %v5573_v46, %v932_v1  ;;  %1588 = vxpose.xlu1.b32.start.end [1/1] (short) (narrow) %v719_v60, 32  ;;  %7703 = vst [vmem:[#allocation29_spill] sm:$0xff] %v5738_v48  ;;  %7705 = vst [vmem:[#allocation30_spill] sm:$0xff] %v5744_v41 }
 0x173   : > { %v1788_v37 = vrot.slane %v1780_v9, %v5508_v53  ;;  %v1795_v38 = vrot.slane %v1781_v18, %v5508_v53 }
 0x174   : > { %v964_v63 = vpop.trf.xlu1  ;;  %v933_v10 = vpop.trf.xlu0 }
 0x175   : > { %v1796_v15 = vcombine.low %v5599_v45, %v964_v63  ;;  %v1797_v25 = vcombine.high %v5599_v45, %v964_v63  ;;  %v2324_v26 = vcombine.low %v5601_v59, %v933_v10  ;;  %v2325_v27 = vcombine.high %v5601_v59, %v933_v10 }
 0x177   : > { %v1804_v40 = vrot.slane %v1796_v15, %v5508_v53  ;;  %v1811_v46 = vrot.slane %v1797_v25, %v5508_v53  ;;  %v2332_v49 = vrot.slane %v2324_v26, %v5508_v53  ;;  %v2339_v50 = vrot.slane %v2325_v27, %v5508_v53 }
 0x178   : > { %v965_v45 = vpop.trf.xlu1  ;;  %v934_v59 = vpop.trf.xlu0 }
 0x179   : > { %v1844_v5 = vcombine.low %v1788_v37, %v1804_v40  ;;  %v1845_v7 = vcombine.high %v1788_v37, %v1804_v40  ;;  %v1860_v9 = vcombine.low %v1795_v38, %v1811_v46  ;;  %v1861_v16 = vcombine.high %v1795_v38, %v1811_v46 }
 0x17a   : > { %v2340_v23 = vcombine.low %v5617_v30, %v965_v45  ;;  %v2341_v29 = vcombine.high %v5617_v30, %v965_v45  ;;  %v2868_v32 = vcombine.low %v5619_v31, %v934_v59  ;;  %v2869_v57 = vcombine.high %v5619_v31, %v934_v59  ;;  %1620 = vxpose.xlu0.b32.start.end [1/1] (short) (narrow) %v720_v21, 32 }
 0x17b   : > { %v5753_v6 = vrot.slane %v1844_v5, %v5631_v62  ;;  %v5756_v2 = vrot.slane %v1845_v7, %v5631_v62  ;;  %v5759_v33 = vrot.slane %v1860_v9, %v5631_v62  ;;  %v5762_v43 = vrot.slane %v1861_v16, %v5631_v62 }
 0x17c   : > { %v2348_v51 = vrot.slane %v2340_v23, %v5508_v53  ;;  %v2355_v30 = vrot.slane %v2341_v29, %v5508_v53  ;;  %v2876_v52 = vrot.slane %v2868_v32, %v5508_v53  ;;  %v2883_v31 = vrot.slane %v2869_v57, %v5508_v53  ;;  %v966_v42 = vpop.trf.xlu1  ;;  %v935_v56 = vpop.trf.xlu0 }
 0x17d   : > { %7706 = vst [vmem:[#allocation31_spill] sm:$0xff] %v5753_v6  ;;  %7707 = vst [vmem:[#allocation32_spill] sm:$0xff] %v5756_v2  ;;  %v2884_v58 = vcombine.low %v5626_v54, %v966_v42  ;;  %v2885_v60 = vcombine.high %v5626_v54, %v966_v42  ;;  %v3412_v8 = vcombine.low %v5628_v55, %v935_v56 }
 0x17e   : > { %7708 = vst [vmem:[#allocation33_spill] sm:$0xff] %v5759_v33  ;;  %7709 = vst [vmem:[#allocation34_spill] sm:$0xff] %v5762_v43  ;;  %v3413_v1 = vcombine.high %v5628_v55, %v935_v56  ;;  %v2388_v21 = vcombine.low %v2332_v49, %v2348_v51  ;;  %v2389_v18 = vcombine.high %v2332_v49, %v2348_v51  ;;  %1652 = vxpose.xlu1.b32.start.end [1/1] (short) (narrow) %v5637_v61, 32 }
 0x17f   : > { %v2404_v63 = vcombine.low %v2339_v50, %v2355_v30  ;;  %v2405_v10 = vcombine.high %v2339_v50, %v2355_v30  ;;  %v2892_v15 = vrot.slane %v2884_v58, %v5508_v53  ;;  %v2899_v25 = vrot.slane %v2885_v60, %v5508_v53 }
 0x180   : > { %v3420_v26 = vrot.slane %v3412_v8, %v5508_v53  ;;  %v3427_v27 = vrot.slane %v3413_v1, %v5508_v53  ;;  %v5778_v54 = vrot.slane %v2388_v21, %v5631_v62  ;;  %v5781_v37 = vrot.slane %v2389_v18, %v5631_v62  ;;  %v967_v61 = vpop.trf.xlu1  ;;  %v5789_v40 = vpop.trf.xlu0 }
 0x181   : > { %v5784_v55 = vrot.slane %v2404_v63, %v5631_v62  ;;  %v5787_v38 = vrot.slane %v2405_v10, %v5631_v62  ;;  %7714 = vst [vmem:[#allocation39_spill] sm:$0xff] %v5789_v40  ;;  %v2932_v46 = vcombine.low %v2876_v52, %v2892_v15  ;;  %v2933_v47 = vcombine.high %v2876_v52, %v2892_v15 }
 0x182   : > { %7710 = vst [vmem:[#allocation35_spill] sm:$0xff] %v5778_v54  ;;  %7711 = vst [vmem:[#allocation36_spill] sm:$0xff] %v5781_v37  ;;  %v2948_v39 = vcombine.low %v2883_v31, %v2899_v25  ;;  %v2949_v49 = vcombine.high %v2883_v31, %v2899_v25  ;;  %v3428_v50 = vcombine.low %v5634_v24, %v967_v61 }
 0x183   : > { %7712 = vst [vmem:[#allocation37_spill] sm:$0xff] %v5784_v55  ;;  %7713 = vst [vmem:[#allocation38_spill] sm:$0xff] %v5787_v38  ;;  %v3429_v45 = vcombine.high %v5634_v24, %v967_v61  ;;  %v5798_v7 = vrot.slane %v2932_v46, %v5631_v62  ;;  %v5801_v9 = vrot.slane %v2933_v47, %v5631_v62 }
 0x184   : > { %v3436_v24 = vrot.slane %v3428_v50, %v5508_v53  ;;  %v5809_v32 = vpop.trf.xlu1  ;;  %v5811_v57 = vpop.trf.xlu0  ;;  %v5814_v51 = vrot.slane %v2948_v39, %v5631_v62  ;;  %v5832_v63 = vrot.slane %v2949_v49, %v5631_v62 }
 0x185   : > { %7715 = vst [vmem:[#allocation40_spill] sm:$0xff] %v5798_v7  ;;  %7716 = vst [vmem:[#allocation41_spill] sm:$0xff] %v5801_v9  ;;  %v3443_v29 = vrot.slane %v3429_v45, %v5508_v53 }
 0x186   : > { %7717 = vst [vmem:[#allocation42_spill] sm:$0xff] %v5809_v32  ;;  %7718 = vst [vmem:[#allocation43_spill] sm:$0xff] %v5811_v57  ;;  %v3476_v58 = vcombine.low %v3420_v26, %v3436_v24  ;;  %v3477_v60 = vcombine.high %v3420_v26, %v3436_v24 }
 0x187   : > { %7719 = vst [vmem:[#allocation44_spill] sm:$0xff] %v5814_v51  ;;  %v3492_v8 = vcombine.low %v3427_v27, %v3443_v29  ;;  %v3493_v1 = vcombine.high %v3427_v27, %v3443_v29  ;;  %1684 = vxpose.xlu0.b32.start.end [1/1] (short) (narrow) %v5646_v12, 32  ;;  %7720 = vst [vmem:[#allocation45_spill] sm:$0xff] %v5832_v63 }
 0x188   : > { %v5836_v15 = vpop.trf.xlu1  ;;  %v5838_v25 = vpop.trf.xlu0  ;;  %v5845_v27 = vrot.slane %v3476_v58, %v5631_v62  ;;  %v5862_v24 = vrot.slane %v3477_v60, %v5631_v62 }
 0x189   : > { %7721 = vst [vmem:[#allocation46_spill] sm:$0xff] %v5836_v15  ;;  %7722 = vst [vmem:[#allocation47_spill] sm:$0xff] %v5838_v25  ;;  %v5870_v12 = vrot.slane %v3492_v8, %v5631_v62  ;;  %v5875_v39 = vrot.slane %v3493_v1, %v5631_v62 }
 0x18a   : > { %7723 = vst [vmem:[#allocation48_spill] sm:$0xff] %v5845_v27  ;;  %7724 = vst [vmem:[#allocation49_spill] sm:$0xff] %v5862_v24 }
 0x18b   : > { %1716 = vxpose.xlu1.b32.start.end [1/1] (short) (narrow) %v5643_v44, 32  ;;  %7725 = vst [vmem:[#allocation50_spill] sm:$0xff] %v5870_v12  ;;  %7726 = vst [vmem:[#allocation51_spill] sm:$0xff] %v5875_v39 }
 0x18c   : > { %v5877_v45 = vpop.trf.xlu1  ;;  %v5879_v60 = vpop.trf.xlu0 }
 0x18d   : > { %7727 = vst [vmem:[#allocation52_spill] sm:$0xff] %v5877_v45  ;;  %7728 = vst [vmem:[#allocation53_spill] sm:$0xff] %v5879_v60 }
 0x190   : > { %v5895_v50 = vpop.trf.xlu1  ;;  %v5897_v29 = vpop.trf.xlu0 }
 0x191   : > { %7729 = vst [vmem:[#allocation54_spill] sm:$0xff] %v5895_v50  ;;  %7730 = vst [vmem:[#allocation55_spill] sm:$0xff] %v5897_v29  ;;  %v1884_v12 = vcombine.low %v5789_v40, %v5897_v29 }
 0x193   : > { %v5978_v54 = vrot.slane %v1884_v12, %v5508_v53 }
 0x194   : > { %v5899_v44 = vpop.trf.xlu1  ;;  %v5901_v26 = vpop.trf.xlu0 }
 0x195   : > { %7731 = vst [vmem:[#allocation56_spill] sm:$0xff] %v5899_v44  ;;  %7732 = vst [vmem:[#allocation57_spill] sm:$0xff] %v5901_v26  ;;  %v1900_v38 = vcombine.low %v5809_v32, %v5899_v44 }
 0x196   : > { %7757 = vst [vmem:[#allocation82_spill] sm:$0xff] %v5978_v54 }
 0x197   : > { %v5963_v37 = vrot.slane %v1900_v38, %v5508_v53 }
 0x198   : > { %v5903_v8 = vpop.trf.xlu1  ;;  %v5905_v58 = vpop.trf.xlu0 }
 0x199   : > { %7733 = vst [vmem:[#allocation58_spill] sm:$0xff] %v5903_v8  ;;  %7734 = vst [vmem:[#allocation59_spill] sm:$0xff] %v5905_v58  ;;  %v2972_v48 = vcombine.low %v5838_v25, %v5905_v58 }
 0x19a   : > { %7753 = vst [vmem:[#allocation78_spill] sm:$0xff] %v5963_v37 }
 0x19b   : > { %v5981_v22 = vrot.slane %v2972_v48, %v5508_v53 }
 0x19c   : > { %v5907_v47 = vpop.trf.xlu1  ;;  %v5909_v1 = vpop.trf.xlu0 }
 0x19d   : > { %7735 = vst [vmem:[#allocation60_spill] sm:$0xff] %v5907_v47  ;;  %7736 = vst [vmem:[#allocation61_spill] sm:$0xff] %v5909_v1  ;;  %v2988_v3 = vcombine.low %v5877_v45, %v5907_v47 }
 0x19e   : > { %7758 = vst [vmem:[#allocation83_spill] sm:$0xff] %v5981_v22 }
 0x19f   : > { %v5966_v0 = vrot.slane %v2988_v3, %v5508_v53 }
 0x1a0   : > { %v5911_v49 = vpop.trf.xlu1  ;;  %v5913_v10 = vpop.trf.xlu0 }
 0x1a1   : > { %7737 = vst [vmem:[#allocation62_spill] sm:$0xff] %v5911_v49  ;;  %7738 = vst [vmem:[#allocation63_spill] sm:$0xff] %v5913_v10  ;;  %v3036_v12 = vcombine.low %v5981_v22, %v5966_v0 }
 0x1a2   : > { %7754 = vst [vmem:[#allocation79_spill] sm:$0xff] %v5966_v0 }
 0x1a3   : > { %v6009_v60 = vrot.slane %v3036_v12, %v5631_v62 }
 0x1a4   : > { %v5915_v61 = vpop.trf.xlu1  ;;  %v5917_v46 = vpop.trf.xlu0 }
 0x1a5   : > { %7739 = vst [vmem:[#allocation64_spill] sm:$0xff] %v5915_v61  ;;  %7740 = vst [vmem:[#allocation65_spill] sm:$0xff] %v5917_v46 }
 0x1a6   : > { %7764 = vst [vmem:[#allocation89_spill] sm:$0xff] %v6009_v60 }
 0x1a8   : > { %v5919_v56 = vpop.trf.xlu1  ;;  %v5921_v18 = vpop.trf.xlu0 }
 0x1a9   : > { %7741 = vst [vmem:[#allocation66_spill] sm:$0xff] %v5919_v56  ;;  %7742 = vst [vmem:[#allocation67_spill] sm:$0xff] %v5921_v18 }
 0x1ac   : > { %v5923_v30 = vpop.trf.xlu1  ;;  %v5925_v21 = vpop.trf.xlu0 }
 0x1ad   : > { %7743 = vst [vmem:[#allocation68_spill] sm:$0xff] %v5923_v30  ;;  %7744 = vst [vmem:[#allocation69_spill] sm:$0xff] %v5925_v21 }
 0x1b0   : > { %v5927_v23 = vpop.trf.xlu1  ;;  %v5929_v42 = vpop.trf.xlu0 }
 0x1b1   : > { %7745 = vst [vmem:[#allocation70_spill] sm:$0xff] %v5927_v23  ;;  %7746 = vst [vmem:[#allocation71_spill] sm:$0xff] %v5929_v42  ;;  %v1916_v39 = vcombine.low %v5913_v10, %v5929_v42 }
 0x1b3   : > { %v5969_v27 = vrot.slane %v1916_v39, %v5508_v53 }
 0x1b4   : > { %v5931_v16 = vpop.trf.xlu1  ;;  %v5933_v31 = vpop.trf.xlu0 }
 0x1b5   : > { %7747 = vst [vmem:[#allocation72_spill] sm:$0xff] %v5931_v16  ;;  %7748 = vst [vmem:[#allocation73_spill] sm:$0xff] %v5933_v31  ;;  %v1932_v5 = vcombine.low %v5915_v61, %v5931_v16 }
 0x1b7   : > { %v5954_v55 = vrot.slane %v1932_v5, %v5508_v53 }
 0x1b8   : > { %v5937_v52 = vpop.trf.xlu1  ;;  %v5939_v59 = vpop.trf.xlu0 }
 0x1b9   : > { %7749 = vst [vmem:[#allocation74_spill] sm:$0xff] %v5937_v52  ;;  %7750 = vst [vmem:[#allocation75_spill] sm:$0xff] %v5939_v59  ;;  %v3004_v41 = vcombine.low %v5921_v18, %v5939_v59  ;;  %v1980_v38 = vcombine.low %v5969_v27, %v5954_v55 }
 0x1bb   : > { %v5972_v28 = vrot.slane %v3004_v41, %v5508_v53  ;;  %v6000_v36 = vrot.slane %v1980_v38, %v5631_v62 }
 0x1bc   : > { %v5956_v4 = vpop.trf.xlu1  ;;  %v5958_v24 = vpop.trf.xlu0 }
 0x1bd   : > { %7751 = vst [vmem:[#allocation76_spill] sm:$0xff] %v5956_v4  ;;  %7752 = vst [vmem:[#allocation77_spill] sm:$0xff] %v5958_v24  ;;  %v3020_v34 = vcombine.low %v5923_v30, %v5956_v4 }
 0x1be   : > { %7755 = vst [vmem:[#allocation80_spill] sm:$0xff] %v5972_v28  ;;  %7761 = vst [vmem:[#allocation86_spill] sm:$0xff] %v6000_v36 }
 0x1bf   : > { %v5975_v5 = vrot.slane %v3020_v34, %v5508_v53  ;;  %v1948_v34 = vcombine.low %v5978_v54, %v5963_v37 }
 0x1c0   : > { %v5985_v3 = vpop.trf.xlu1  ;;  %v5987_v63 = vpop.trf.xlu0 }
 0x1c1   : > { %7756 = vst [vmem:[#allocation81_spill] sm:$0xff] %v5975_v5  ;;  %7759 = vst [vmem:[#allocation84_spill] sm:$0xff] %v5985_v3  ;;  %v3068_v41 = vcombine.low %v5972_v28, %v5975_v5  ;;  %v6006_v19 = vrot.slane %v1948_v34, %v5631_v62 }
 0x1c3   : > { %v6003_v43 = vrot.slane %v3068_v41, %v5631_v62  ;;  %7763 = vst [vmem:[#allocation88_spill] sm:$0xff] %v6006_v19 }
 0x1c4   : > { %v5995_v39 = vpop.trf.xlu1  ;;  %v5997_v48 = vpop.trf.xlu0 }
 0x1c5   : > { %7760 = vst [vmem:[#allocation85_spill] sm:$0xff] %v5997_v48  ;;  %7762 = vst [vmem:[#allocation87_spill] sm:$0xff] %v6003_v43 }
 0x1c8   : > { %v6011_v1 = vpop.trf.xlu1  ;;  %v6013_v50 = vpop.trf.xlu0 }
 0x1c9   : > { %7765 = vst [vmem:[#allocation90_spill] sm:$0xff] %v6011_v1  ;;  %7766 = vst [vmem:[#allocation91_spill] sm:$0xff] %v6013_v50 }
 0x1cc   : > { %v6019_v21 = vpop.trf.xlu1  ;;  %v6021_v41 = vpop.trf.xlu0 }
 0x1cd   : > { %7767 = vst [vmem:[#allocation92_spill] sm:$0xff] %v6019_v21  ;;  %7768 = vst [vmem:[#allocation93_spill] sm:$0xff] %v6021_v41 }
 0x1d0   : > { %v6023_v24 = vpop.trf.xlu1  ;;  %v6025_v34 = vpop.trf.xlu0 }
 0x1d1   : > { %7769 = vst [vmem:[#allocation94_spill] sm:$0xff] %v6023_v24 }
 0x1d4   : > { %v6027_v12 = vpop.trf.xlu1  ;;  %v6029_v23 = vpop.trf.xlu0 }
 0x1d5   : > { %7770 = vst [vmem:[#allocation95_spill] sm:$0xff] %v6029_v23  ;;  %v2036_v48 = vcombine.low %v5995_v39, %v6027_v12 }
 0x1d7   : > { %v6091_v9 = vrot.slane %v2036_v48, %v5508_v53 }
 0x1d8   : > { %v6031_v3 = vpop.trf.xlu1  ;;  %v6033_v57 = vpop.trf.xlu0 }
 0x1d9   : > { %7771 = vst [vmem:[#allocation96_spill] sm:$0xff] %v6031_v3  ;;  %7772 = vst [vmem:[#allocation97_spill] sm:$0xff] %v6033_v57 }
 0x1dc   : > { %v6035_v49 = vpop.trf.xlu1  ;;  %v6037_v26 = vpop.trf.xlu0 }
 0x1dd   : > { %7773 = vst [vmem:[#allocation98_spill] sm:$0xff] %v6035_v49  ;;  %7774 = vst [vmem:[#allocation99_spill] sm:$0xff] %v6037_v26 }
 0x1e0   : > { %v6039_v38 = vpop.trf.xlu1  ;;  %v6041_v46 = vpop.trf.xlu0 }
 0x1e1   : > { %7775 = vst [vmem:[#allocation100_spill] sm:$0xff] %v6039_v38 }
 0x1e4   : > { %v6043_v31 = vpop.trf.xlu1  ;;  %v6045_v15 = vpop.trf.xlu0 }
 0x1e5   : > { %7776 = vst [vmem:[#allocation101_spill] sm:$0xff] %v6045_v15  ;;  %v2020_v15 = vcombine.low %v5987_v63, %v6025_v34 }
 0x1e8   : > { %v6047_v8 = vpop.trf.xlu1  ;;  %v6049_v56 = vpop.trf.xlu0 }
 0x1e9   : > { %7777 = vst [vmem:[#allocation102_spill] sm:$0xff] %v6047_v8  ;;  %7778 = vst [vmem:[#allocation103_spill] sm:$0xff] %v6049_v56 }
 0x1ec   : > { %v6051_v52 = vpop.trf.xlu1  ;;  %v6053_v51 = vpop.trf.xlu0 }
 0x1ed   : > { %7779 = vst [vmem:[#allocation104_spill] sm:$0xff] %v6053_v51  ;;  %v3124_v51 = vcombine.low %v6019_v21, %v6035_v49 }
 0x1ef   : > { %v6094_v14 = vrot.slane %v3124_v51, %v5508_v53 }
 0x1f0   : > { %v6055_v35 = vpop.trf.xlu1  ;;  %v6057_v33 = vpop.trf.xlu0 }
 0x1f1   : > { %7780 = vst [vmem:[#allocation105_spill] sm:$0xff] %v6055_v35  ;;  %v2052_v35 = vcombine.low %v6041_v46, %v6057_v33 }
 0x1f3   : > { %v6097_v2 = vrot.slane %v2052_v35, %v5508_v53 }
 0x1f4   : > { %v6059_v17 = vpop.trf.xlu1  ;;  %v6061_v41 = vpop.trf.xlu0 }
 0x1f5   : > { %7781 = vst [vmem:[#allocation106_spill] sm:$0xff] %v6061_v41  ;;  %v2068_v26 = vcombine.low %v6043_v31, %v6059_v17  ;;  %v3108_v41 = vcombine.low %v6013_v50, %v6033_v57 }
 0x1f7   : > { %v6082_v1 = vrot.slane %v2068_v26, %v5508_v53  ;;  %v6109_v25 = vrot.slane %v3108_v41, %v5508_v53 }
 0x1f8   : > { %v6065_v24 = vpop.trf.xlu1  ;;  %v6067_v38 = vpop.trf.xlu0 }
 0x1f9   : > { %7782 = vst [vmem:[#allocation107_spill] sm:$0xff] %v6065_v24  ;;  %7783 = vst [vmem:[#allocation108_spill] sm:$0xff] %v6067_v38  ;;  %v3140_v23 = vcombine.low %v6049_v56, %v6067_v38  ;;  %v2116_v48 = vcombine.low %v6097_v2, %v6082_v1 }
 0x1fb   : > { %v6100_v13 = vrot.slane %v3140_v23, %v5508_v53  ;;  %v6128_v18 = vrot.slane %v2116_v48, %v5631_v62 }
 0x1fc   : > { %v6084_v3 = vpop.trf.xlu1  ;;  %v6086_v8 = vpop.trf.xlu0 }
 0x1fd   : > { %7784 = vst [vmem:[#allocation109_spill] sm:$0xff] %v6086_v8  ;;  %v3156_v24 = vcombine.low %v6051_v52, %v6084_v3  ;;  %v6106_v8 = vrot.slane %v2020_v15, %v5508_v53  ;;  %v3172_v15 = vcombine.low %v6109_v25, %v6094_v14  ;;  %7787 = vst [vmem:[#allocation112_spill] sm:$0xff] %v6128_v18 }
 0x1ff   : > { %v6103_v26 = vrot.slane %v3156_v24, %v5508_v53  ;;  %v2084_v23 = vcombine.low %v6106_v8, %v6091_v9  ;;  %v6137_v45 = vrot.slane %v3172_v15, %v5631_v62 }
 0x200   : > { %v6113_v51 = vpop.trf.xlu1  ;;  %v6115_v58 = vpop.trf.xlu0 }
 0x201   : > { %7785 = vst [vmem:[#allocation110_spill] sm:$0xff] %v6113_v51  ;;  %v3204_v35 = vcombine.low %v6100_v13, %v6103_v26  ;;  %v6134_v59 = vrot.slane %v2084_v23, %v5631_v62  ;;  %7790 = vst [vmem:[#allocation115_spill] sm:$0xff] %v6137_v45 }
 0x203   : > { %v6131_v51 = vrot.slane %v3204_v35, %v5631_v62  ;;  %7789 = vst [vmem:[#allocation114_spill] sm:$0xff] %v6134_v59 }
 0x204   : > { %v6123_v24 = vpop.trf.xlu1  ;;  %v6125_v41 = vpop.trf.xlu0 }
 0x205   : > { %7786 = vst [vmem:[#allocation111_spill] sm:$0xff] %v6125_v41  ;;  %7788 = vst [vmem:[#allocation113_spill] sm:$0xff] %v6131_v51 }
 0x208   : > { %v6139_v47 = vpop.trf.xlu1  ;;  %v6141_v30 = vpop.trf.xlu0 }
 0x209   : > { %7791 = vst [vmem:[#allocation116_spill] sm:$0xff] %v6139_v47 }
 0x20c   : > { %v6147_v41 = vpop.trf.xlu1  ;;  %v6149_v35 = vpop.trf.xlu0 }
 0x20d   : > { %7792 = vst [vmem:[#allocation117_spill] sm:$0xff] %v6149_v35 }
 0x210   : > { %v6151_v7 = vpop.trf.xlu1  ;;  %v6153_v23 = vpop.trf.xlu0 }
 0x211   : > { %7793 = vst [vmem:[#allocation118_spill] sm:$0xff] %v6151_v7  ;;  %v2156_v16 = vcombine.low %v6115_v58, %v6153_v23 }
 0x213   : > { %v2164_v0 = vrot.slane %v2156_v16, %v5508_v53 }
 0x214   : > { %v6155_v15 = vpop.trf.xlu1  ;;  %v6157_v11 = vpop.trf.xlu0 }
 0x215   : > { %7794 = vst [vmem:[#allocation119_spill] sm:$0xff] %v6157_v11 }
 0x218   : > { %v6159_v47 = vpop.trf.xlu1  ;;  %v6161_v40 = vpop.trf.xlu0 }
 0x219   : > { %7795 = vst [vmem:[#allocation120_spill] sm:$0xff] %v6159_v47  ;;  %v3244_v60 = vcombine.low %v6141_v30, %v6161_v40 }
 0x21b   : > { %v3252_v16 = vrot.slane %v3244_v60, %v5508_v53 }
 0x21c   : > { %v6163_v4 = vpop.trf.xlu1  ;;  %v6165_v29 = vpop.trf.xlu0 }
 0x21d   : > { %7796 = vst [vmem:[#allocation121_spill] sm:$0xff] %v6165_v29  ;;  %v2172_v29 = vcombine.low %v6123_v24, %v6155_v15 }
 0x21f   : > { %v2180_v20 = vrot.slane %v2172_v29, %v5508_v53 }
 0x220   : > { %v6167_v48 = vpop.trf.xlu1  ;;  %v6169_v10 = vpop.trf.xlu0 }
 0x221   : > { %7797 = vst [vmem:[#allocation122_spill] sm:$0xff] %v6167_v48  ;;  %v2220_v43 = vcombine.low %v2164_v0, %v2180_v20  ;;  %v2221_v56 = vcombine.high %v2164_v0, %v2180_v20 }
 0x223   : > { %v6211_v38 = vrot.slane %v2220_v43, %v5631_v62  ;;  %v2235_v20 = vrot.slane %v2221_v56, %v5631_v62  ;;  %v2173_v56 = vcombine.high %v6123_v24, %v6155_v15  ;;  %v3205_v15 = vcombine.high %v6100_v13, %v6103_v26 }
 0x224   : > { %v1668_v35 = vpop.trf.xlu1  ;;  %v6171_v7 = vpop.trf.xlu0  ;;  %v3173_v13 = vcombine.high %v6109_v25, %v6094_v14 }
 0x225   : > { %7798 = vst [vmem:[#allocation123_spill] sm:$0xff] %v6171_v7  ;;  %7805 = vst [vmem:[#allocation130_spill] sm:$0xff] %v6211_v38 }
 0x228   : > { %v6173_v42 = vpop.trf.xlu1  ;;  %v6175_v32 = vpop.trf.xlu0 }
 0x229   : > { %7799 = vst [vmem:[#allocation124_spill] sm:$0xff] %v6173_v42 }
 0x22c   : > { %v6177_v11 = vpop.trf.xlu1  ;;  %v6179_v47 = vpop.trf.xlu0 }
 0x22d   : > { %7800 = vst [vmem:[#allocation125_spill] sm:$0xff] %v6179_v47  ;;  %v3260_v47 = vcombine.low %v6147_v41, %v6163_v4 }
 0x22f   : > { %v3268_v29 = vrot.slane %v3260_v47, %v5508_v53 }
 0x230   : > { %v6181_v44 = vpop.trf.xlu1  ;;  %v1700_v61 = vpop.trf.xlu0 }
 0x231   : > { %7801 = vst [vmem:[#allocation126_spill] sm:$0xff] %v6181_v44  ;;  %v2188_v48 = vcombine.low %v6169_v10, %v1700_v61  ;;  %v3308_v21 = vcombine.low %v3252_v16, %v3268_v29  ;;  %v3309_v0 = vcombine.high %v3252_v16, %v3268_v29 }
 0x233   : > { %v2196_v44 = vrot.slane %v2188_v48, %v5508_v53  ;;  %v6221_v43 = vrot.slane %v3308_v21, %v5631_v62  ;;  %v3323_v21 = vrot.slane %v3309_v0, %v5631_v62 }
 0x234   : > { %v1732_v7 = vpop.trf.xlu1  ;;  %v6188_v6 = vpop.trf.xlu0 }
 0x235   : > { %7802 = vst [vmem:[#allocation127_spill] sm:$0xff] %v6188_v6  ;;  %v2204_v42 = vcombine.low %v1668_v35, %v1732_v7  ;;  %7806 = vst [vmem:[#allocation131_spill] sm:$0xff] %v6221_v43  ;;  %v2205_v60 = vcombine.high %v1668_v35, %v1732_v7  ;;  %v2117_v7 = vcombine.high %v6097_v2, %v6082_v1 }
 0x236   : > { %v2157_v35 = vcombine.high %v6115_v58, %v6153_v23  ;;  %v2085_v2 = vcombine.high %v6106_v8, %v6091_v9  ;;  %v6253_v58 = vrot.slane %v2173_v56, %v5508_v53  ;;  %v3261_v1 = vcombine.high %v6147_v41, %v6163_v4 }
 0x237   : > { %v2212_v22 = vrot.slane %v2204_v42, %v5508_v53  ;;  %v6244_v24 = vrot.slane %v2205_v60, %v5508_v53  ;;  %v3237_v8 = vcombine.high %v6137_v45, %v6131_v51  ;;  %v3245_v4 = vcombine.high %v6141_v30, %v6161_v40 }
 0x238   : > { %v6196_v28 = vpop.trf.xlu1  ;;  %v6198_v5 = vpop.trf.xlu0  ;;  %v6266_v9 = vrot.slane %v2157_v35, %v5508_v53  ;;  %v2099_v26 = vrot.slane %v2085_v2, %v5631_v62  ;;  %v3157_v2 = vcombine.high %v6051_v52, %v6084_v3 }
 0x239   : > { %7803 = vst [vmem:[#allocation128_spill] sm:$0xff] %v6196_v28  ;;  %v2252_v6 = vcombine.low %v2196_v44, %v2212_v22  ;;  %v3276_v50 = vcombine.low %v6175_v32, %v6198_v5  ;;  %v2253_v57 = vcombine.high %v2196_v44, %v2212_v22  ;;  %v6293_v14 = vrot.slane %v3245_v4, %v5508_v53 }
 0x23a   : > { %v2236_v16 = vcombine.low %v6266_v9, %v6253_v58 }
 0x23b   : > { %v6206_v42 = vrot.slane %v2252_v6, %v5631_v62  ;;  %v3284_v49 = vrot.slane %v3276_v50, %v5508_v53  ;;  %v2267_v44 = vrot.slane %v2253_v57, %v5631_v62 }
 0x23c   : > { %v1734_v48 = vpop.trf.xlu1 }
 0x23d   : > { %7804 = vst [vmem:[#allocation129_spill] sm:$0xff] %v6206_v42  ;;  %v3292_v28 = vcombine.low %v6177_v11, %v1734_v48  ;;  %v2285_v22 = vcombine.high %v6211_v38, %v6206_v42  ;;  %v7868_v38 = vld [vmem:[#allocation90_spill] sm:$0xff] }
 0x23f   : > { %v3300_v47 = vrot.slane %v3292_v28, %v5508_v53  ;;  %3930 = vrot.lane.b32.xlu0 %v2285_v22, %s5143_s18  ;;  %v2286_v28 = vcombine.low %v2235_v20, %v2267_v44  ;;  %v3219_v22 = vrot.slane %v3205_v15, %v5631_v62 }
 0x241   : > { %v3340_v6 = vcombine.low %v3284_v49, %v3300_v47  ;;  %v3341_v54 = vcombine.high %v3284_v49, %v3300_v47  ;;  %v2189_v49 = vcombine.high %v6169_v10, %v1700_v61  ;;  %v3293_v10 = vcombine.high %v6177_v11, %v1734_v48  ;;  %v7856_v61 = vld [vmem:[#allocation122_spill] sm:$0xff] }
 0x242   : > { %v3277_v11 = vcombine.high %v6175_v32, %v6198_v5  ;;  %v2131_v48 = vrot.slane %v2117_v7, %v5631_v62  ;;  %v2287_v5 = vcombine.high %v2235_v20, %v2267_v44  ;;  %v6285_v47 = vrot.slane %v3261_v1, %v5508_v53 }
 0x243   : > { %v6224_v50 = vrot.slane %v3340_v6, %v5631_v62  ;;  %v3355_v57 = vrot.slane %v3341_v54, %v5631_v62  ;;  %3946 = vrot.lane.b32.xlu0 %v2286_v28, %s5144_s29  ;;  %v2149_v54 = vcombine.high %v6134_v59, %v6128_v18  ;;  %v6258_v23 = vrot.slane %v2189_v49, %v5508_v53  ;;  %v7869_v18 = vld [vmem:[#allocation106_spill] sm:$0xff] }
 0x244   : > { %v6276_v32 = vrot.slane %v3293_v10, %v5508_v53  ;;  %v6288_v40 = vrot.slane %v3277_v11, %v5508_v53  ;;  %v2150_v30 = vcombine.low %v2099_v26, %v2131_v48  ;;  %v3187_v20 = vrot.slane %v3173_v13, %v5631_v62 }
 0x245   : > { %7807 = vst [vmem:[#allocation132_spill] sm:$0xff] %v6224_v50  ;;  %v3373_v37 = vcombine.high %v6221_v43, %v6224_v50  ;;  %v2268_v41 = vcombine.low %v6258_v23, %v6244_v24  ;;  %v3375_v44 = vcombine.high %v3323_v21, %v3355_v57  ;;  %v3324_v0 = vcombine.low %v6293_v14, %v6285_v47  ;;  %v7862_v43 = vld [vmem:[#allocation41_spill] sm:$0xff] }
 0x246   : > { %v3356_v25 = vcombine.low %v6288_v40, %v6276_v32  ;;  %v2244_v28 = vrot.slane %v2236_v16, %v5631_v62  ;;  %v3238_v60 = vcombine.low %v3187_v20, %v3219_v22  ;;  %v2069_v7 = vcombine.high %v6043_v31, %v6059_v17 }
 0x247   : > { %4170 = vrot.lane.b32.xlu1 %v3373_v37, %s5143_s18  ;;  %v3374_v37 = vcombine.low %v3323_v21, %v3355_v57  ;;  %3928 = vrot.lane.b32.xlu0 %v2149_v54, %s5143_s18  ;;  %v2276_v6 = vrot.slane %v2268_v41, %v5631_v62  ;;  %v3332_v57 = vrot.slane %v3324_v0, %v5631_v62 }
 0x248   : > { %v3364_v49 = vrot.slane %v3356_v25, %v5631_v62  ;;  %v2013_v21 = vcombine.high %v6006_v19, %v6000_v36  ;;  %v1981_v54 = vcombine.high %v5969_v27, %v5954_v55  ;;  %v2037_v10 = vcombine.high %v5995_v39, %v6027_v12  ;;  %v7808_v55 = vld [vmem:[#allocation78_spill] sm:$0xff]  ;;  %v7811_v12 = vld [vmem:[#allocation92_spill] sm:$0xff]  ;;  %v7816_v25 = vld [vmem:[#allocation87_spill] sm:$0xff] }
 0x249   : > { %v2288_v56 = vcombine.low %v2244_v28, %v2276_v6  ;;  %v2289_v1 = vcombine.high %v2244_v28, %v2276_v6  ;;  %v2021_v17 = vcombine.high %v5987_v63, %v6025_v34  ;;  %v6325_v31 = vrot.slane %v2069_v7, %v5508_v53  ;;  %v7809_v27 = vld [vmem:[#allocation82_spill] sm:$0xff]  ;;  %v7814_v34 = vld [vmem:[#allocation97_spill] sm:$0xff] }
 0x24a   : > { %v3376_v35 = vcombine.low %v3332_v57, %v3364_v49  ;;  %v2151_v11 = vcombine.high %v2099_v26, %v2131_v48  ;;  %v1949_v15 = vcombine.high %v7809_v27, %v7808_v55  ;;  %v7810_v39 = vld [vmem:[#allocation98_spill] sm:$0xff]  ;;  %v6335_v52 = vrot.slane %v2037_v10, %v5508_v53  ;;  %v7815_v48 = vld [vmem:[#allocation91_spill] sm:$0xff]  ;;  %v7818_v7 = vld [vmem:[#allocation81_spill] sm:$0xff] }
 0x24b   : > { %4186 = vrot.lane.b32.xlu1 %v3374_v37, %s5144_s29  ;;  %4168 = vrot.lane.b32.xlu0 %v3237_v8, %s5143_s18  ;;  %v2053_v37 = vcombine.high %v6041_v46, %v6057_v33  ;;  %v3125_v8 = vcombine.high %v7811_v12, %v7810_v39  ;;  %v7812_v33 = vld [vmem:[#allocation108_spill] sm:$0xff]  ;;  %v7813_v46 = vld [vmem:[#allocation103_spill] sm:$0xff]  ;;  %v1995_v3 = vrot.slane %v1981_v54, %v5631_v62  ;;  %v7859_v19 = vld [vmem:[#allocation121_spill] sm:$0xff] }
 0x24c   : > { %v3141_v4 = vcombine.high %v7813_v46, %v7812_v33  ;;  %v3109_v41 = vcombine.high %v7815_v48, %v7814_v34  ;;  %v2269_v13 = vcombine.high %v6258_v23, %v6244_v24  ;;  %v3239_v26 = vcombine.high %v3187_v20, %v3219_v22  ;;  %v7822_v34 = vld [vmem:[#allocation15_spill] sm:$0xff] }
 0x24d   : > { %v6338_v63 = vrot.slane %v2053_v37, %v5508_v53  ;;  %v6350_v16 = vrot.slane %v2021_v17, %v5508_v53  ;;  %v6357_v0 = vrot.slane %v3125_v8, %v5508_v53  ;;  %v1963_v24 = vrot.slane %v1949_v15, %v5631_v62  ;;  %v7823_v48 = vld [vmem:[#allocation31_spill] sm:$0xff] }
 0x24e   : > { %v6360_v28 = vrot.slane %v3141_v4, %v5508_v53  ;;  %v6370_v22 = vrot.slane %v3109_v41, %v5508_v53  ;;  %v3325_v12 = vcombine.high %v6293_v14, %v6285_v47  ;;  %v7824_v41 = vcombine.high %v7822_v34, %v7823_v48  ;;  %v7825_v47 = vld [vmem:[#allocation72_spill] sm:$0xff]  ;;  %v7860_v48 = vld [vmem:[#allocation117_spill] sm:$0xff] }
 0x24f   : > { %3962 = vrot.lane.b32.xlu1 %v2287_v5, %s5145_s13  ;;  %3944 = vrot.lane.b32.xlu0 %v2150_v30, %s5144_s29  ;;  %v6345_v5 = vrot.slane %v3157_v2, %v5508_v53  ;;  %v2132_v30 = vcombine.low %v6338_v63, %v6325_v31  ;;  %v2100_v23 = vcombine.low %v6350_v16, %v6335_v52  ;;  %v7820_v2 = vld [vmem:[#allocation79_spill] sm:$0xff]  ;;  %v7826_v14 = vld [vmem:[#allocation64_spill] sm:$0xff] }
 0x250   : > { %v3188_v10 = vcombine.low %v6370_v22, %v6357_v0  ;;  %v3785_v34 = vcombine.low %v7860_v48, %v7859_v19 }
 0x251   : > { %v3220_v20 = vcombine.low %v6360_v28, %v6345_v5  ;;  %v2140_v54 = vrot.slane %v2132_v30, %v5631_v62  ;;  %v2015_v30 = vcombine.high %v1963_v24, %v1995_v3 }
 0x252   : > { %v3196_v39 = vrot.slane %v3188_v10, %v5631_v62  ;;  %v6530_v50 = vrot.slane %v3785_v34, %v5508_v53 }
 0x253   : > { %4202 = vrot.lane.b32.xlu1 %v3375_v44, %s5145_s13  ;;  %4184 = vrot.lane.b32.xlu0 %v3238_v60, %s5144_s29  ;;  %v7817_v44 = vld [vmem:[#allocation89_spill] sm:$0xff]  ;;  %v2237_v60 = vcombine.high %v6266_v9, %v6253_v58  ;;  %v7819_v58 = vld [vmem:[#allocation80_spill] sm:$0xff]  ;;  %v3228_v27 = vrot.slane %v3220_v20, %v5631_v62  ;;  %v7829_v20 = vld [vmem:[#allocation71_spill] sm:$0xff] }
 0x254   : > { %v3101_v6 = vcombine.high %v7817_v44, %v7816_v25  ;;  %v3069_v9 = vcombine.high %v7819_v58, %v7818_v7  ;;  %v7831_v58 = vld [vmem:[#allocation55_spill] sm:$0xff] }
 0x255   : > { %v2251_v37 = vrot.slane %v2237_v60, %v5631_v62  ;;  %v3240_v33 = vcombine.low %v3196_v39, %v3228_v27  ;;  %v7828_v60 = vld [vmem:[#allocation42_spill] sm:$0xff] }
 0x256   : > { %v3083_v15 = vrot.slane %v3069_v9, %v5631_v62  ;;  %v7832_v9 = vld [vmem:[#allocation39_spill] sm:$0xff] }
 0x257   : > { %3978 = vrot.lane.b32.xlu1 %v2288_v56, %s5146_s14  ;;  %3926 = vrot.lane.b32.xlu0 %v2013_v21, %s5143_s18  ;;  %v2014_v56 = vcombine.low %v1963_v24, %v1995_v3  ;;  %v2283_v21 = vrot.slane %v2269_v13, %v5631_v62  ;;  %v1933_v13 = vcombine.high %v7826_v14, %v7825_v47  ;;  %v7842_v47 = vld [vmem:[#allocation76_spill] sm:$0xff] }
 0x258   : > { %v7843_v14 = vld [vmem:[#allocation68_spill] sm:$0xff] }
 0x259   : > { %v2290_v55 = vcombine.low %v2251_v37, %v2283_v21  ;;  %v6416_v10 = vrot.slane %v1933_v13, %v5508_v53  ;;  %v2291_v3 = vcombine.high %v2251_v37, %v2283_v21  ;;  %v3021_v13 = vcombine.high %v7843_v14, %v7842_v47 }
 0x25b   : > { %4218 = vrot.lane.b32.xlu1 %v3376_v35, %s5146_s14  ;;  %3994 = vrot.lane.b32.xlu0 %v2289_v1, %s5147_s16  ;;  %v3377_v35 = vcombine.high %v3332_v57, %v3364_v49  ;;  %v7821_v1 = vld [vmem:[#allocation83_spill] sm:$0xff]  ;;  %v3357_v49 = vcombine.high %v6288_v40, %v6276_v32  ;;  %v3339_v32 = vrot.slane %v3325_v12, %v5631_v62  ;;  %v7838_v12 = vld [vmem:[#allocation120_spill] sm:$0xff] }
 0x25c   : > { %v3037_v17 = vcombine.high %v7821_v1, %v7820_v2  ;;  %v7833_v2 = vld [vmem:[#allocation128_spill] sm:$0xff] }
 0x25d   : > { %v3371_v4 = vrot.slane %v3357_v49, %v5631_v62  ;;  %v7834_v1 = vld [vmem:[#allocation124_spill] sm:$0xff] }
 0x25e   : > { %v3051_v8 = vrot.slane %v3037_v17, %v5631_v62 }
 0x25f   : > { %3960 = vrot.lane.b32.xlu1 %v2151_v11, %s5145_s13  ;;  %4200 = vrot.lane.b32.xlu0 %v3239_v26, %s5145_s13  ;;  %v2108_v11 = vrot.slane %v2100_v23, %v5631_v62  ;;  %v3378_v40 = vcombine.low %v3339_v32, %v3371_v4 }
 0x260   : > { %v3102_v46 = vcombine.low %v3051_v8, %v3083_v15 }
 0x261   : > { %v2152_v57 = vcombine.low %v2108_v11, %v2140_v54  ;;  %v2153_v26 = vcombine.high %v2108_v11, %v2140_v54  ;;  %v2748_v54 = vcombine.low %v7834_v1, %v7833_v2  ;;  %v7835_v11 = vld [vmem:[#allocation23_spill] sm:$0xff] }
 0x263   : > { %4166 = vrot.lane.b32.xlu1 %v3101_v6, %s5143_s18  ;;  %3942 = vrot.lane.b32.xlu0 %v2014_v56, %s5144_s29  ;;  %v7827_v6 = vld [vmem:[#allocation56_spill] sm:$0xff]  ;;  %v7830_v56 = vld [vmem:[#allocation63_spill] sm:$0xff] }
 0x264   : > { %v1901_v23 = vcombine.high %v7828_v60, %v7827_v6  ;;  %v1917_v7 = vcombine.high %v7830_v56, %v7829_v20  ;;  %v7844_v6 = vld [vmem:[#allocation119_spill] sm:$0xff]  ;;  %v6447_v20 = vrot.slane %v2748_v54, %v5508_v53  ;;  %v3103_v56 = vcombine.high %v3051_v8, %v3083_v15 }
 0x265   : > { %v7845_v60 = vld [vmem:[#allocation111_spill] sm:$0xff] }
 0x266   : > { %v6421_v24 = vrot.slane %v1901_v23, %v5508_v53  ;;  %v6424_v17 = vrot.slane %v1917_v7, %v5508_v53  ;;  %v2700_v23 = vcombine.low %v7845_v60, %v7844_v6  ;;  %v7850_v8 = vld [vmem:[#allocation59_spill] sm:$0xff] }
 0x267   : > { %4234 = vrot.lane.b32.xlu1 %v3377_v35, %s5147_s16  ;;  %4010 = vrot.lane.b32.xlu0 %v2290_v55, %s5148_s0  ;;  %v1885_v35 = vcombine.high %v7832_v9, %v7831_v58  ;;  %v7836_v55 = vld [vmem:[#allocation40_spill] sm:$0xff]  ;;  %v7851_v54 = vld [vmem:[#allocation47_spill] sm:$0xff] }
 0x268   : > { %v7837_v49 = vcombine.high %v7835_v11, %v7836_v55  ;;  %v1996_v37 = vcombine.low %v6424_v17, %v6416_v10  ;;  %v7846_v58 = vld [vmem:[#allocation60_spill] sm:$0xff]  ;;  %v2973_v47 = vcombine.high %v7851_v54, %v7850_v8 }
 0x269   : > { %v7847_v9 = vld [vmem:[#allocation52_spill] sm:$0xff] }
 0x26b   : > { %3976 = vrot.lane.b32.xlu1 %v2152_v57, %s5146_s14  ;;  %4216 = vrot.lane.b32.xlu0 %v3240_v33, %s5146_s14  ;;  %v6431_v57 = vrot.slane %v1885_v35, %v5508_v53  ;;  %v7839_v33 = vld [vmem:[#allocation116_spill] sm:$0xff]  ;;  %v2989_v35 = vcombine.high %v7847_v9, %v7846_v58  ;;  %v3379_v9 = vcombine.high %v3339_v32, %v3371_v4  ;;  %v7857_v4 = vld [vmem:[#allocation118_spill] sm:$0xff] }
 0x26c   : > { %v3801_v32 = vcombine.low %v7857_v4, %v7856_v61 }
 0x26d   : > { %v1964_v7 = vcombine.low %v6431_v57, %v6421_v24 }
 0x26f   : > { %4182 = vrot.lane.b32.xlu1 %v3102_v46, %s5144_s29  ;;  %3924 = vrot.lane.b32.xlu0 %v7824_v41, %s5143_s18  ;;  %v2716_v46 = vcombine.low %v7839_v33, %v7838_v12  ;;  %v7841_v41 = vld [vmem:[#allocation123_spill] sm:$0xff] }
 0x273   : > { %4250 = vrot.lane.b32.xlu1 %v3378_v40, %s5148_s0  ;;  %3992 = vrot.lane.b32.xlu0 %v2153_v26, %s5147_s16  ;;  %v7840_v40 = vld [vmem:[#allocation127_spill] sm:$0xff]  ;;  %v2133_v26 = vcombine.high %v6338_v63, %v6325_v31 }
 0x274   : > { %v2732_v21 = vcombine.low %v7841_v41, %v7840_v40  ;;  %v7848_v31 = vld [vmem:[#allocation75_spill] sm:$0xff] }
 0x275   : > { %v7849_v63 = vld [vmem:[#allocation67_spill] sm:$0xff]  ;;  %v2147_v14 = vrot.slane %v2133_v26, %v5631_v62  ;;  %v1972_v26 = vrot.slane %v1964_v7, %v5631_v62  ;;  %v3221_v7 = vcombine.high %v6360_v28, %v6345_v5  ;;  %v6521_v28 = vrot.slane %v3801_v32, %v5508_v53  ;;  %v7861_v32 = vld [vmem:[#allocation24_spill] sm:$0xff] }
 0x276   : > { %v6464_v15 = vrot.slane %v2732_v21, %v5508_v53 }
 0x277   : > { %3958 = vrot.lane.b32.xlu1 %v2015_v30, %s5145_s13  ;;  %4164 = vrot.lane.b32.xlu0 %v7837_v49, %s5143_s18  ;;  %v3241_v30 = vcombine.high %v3196_v39, %v3228_v27  ;;  %v6455_v49 = vpop.trf.xlu1  ;;  %v3005_v27 = vcombine.high %v7849_v63, %v7848_v31  ;;  %v6461_v39 = vrot.slane %v2716_v46, %v5508_v53  ;;  %v7854_v63 = vld [vmem:[#allocation32_spill] sm:$0xff]  ;;  %s5160_s18 = smov [#allocation8]  }
 0x278   : > { %v6477_v46 = vrot.slane %v2700_v23, %v5508_v53  ;;  %v2796_v21 = vcombine.low %v6464_v15, %v6447_v20  ;;  %v6484_v31 = vrot.slane %v2989_v35, %v5508_v53  ;;  %v7858_v35 = vld [vmem:[#allocation125_spill] sm:$0xff] }
 0x279   : > { %v6493_v23 = vrot.slane %v3005_v27, %v5508_v53 }
 0x27a   : > { %v2764_v54 = vcombine.low %v6477_v46, %v6461_v39  ;;  %v2804_v44 = vrot.slane %v2796_v21, %v5631_v62  ;;  %v3235_v21 = vrot.slane %v3221_v7, %v5631_v62 }
 0x27b   : > { %4026 = vrot.lane.b32.xlu1 %v2291_v3, %s5149_s26  ;;  %v2101_v3 = vcombine.high %v6350_v16, %v6335_v52  ;;  %4232 = vrot.lane.b32.xlu0 %v3241_v30, %s5147_s16  ;;  %v6470_v52 = vrot.slane %v3021_v13, %v5508_v53  ;;  %v6472_v16 = vpop.trf.xlu0  ;;  %v2004_v30 = vrot.slane %v1996_v37, %v5631_v62  ;;  %v7853_v13 = vld [vmem:[#allocation16_spill] sm:$0xff] }
 0x27c   : > { %v7855_v8 = vcombine.low %v7853_v13, %v7854_v63  ;;  %v3817_v29 = vcombine.low %v7858_v35, %v6472_v16 }
 0x27d   : > { %v2115_v37 = vrot.slane %v2101_v3, %v5631_v62  ;;  %v2016_v27 = vcombine.low %v1972_v26, %v2004_v30  ;;  %v3084_v36 = vcombine.low %v6493_v23, %v6470_v52  ;;  %v2017_v42 = vcombine.high %v1972_v26, %v2004_v30 }
 0x27f   : > { %4198 = vrot.lane.b32.xlu1 %v3103_v56, %s5145_s13  ;;  %v7852_v56 = vld [vmem:[#allocation126_spill] sm:$0xff]  ;;  %3940 = vrot.lane.b32.xlu0 %v7855_v8, %s5144_s29  ;;  %v6503_v8 = vrot.slane %v2973_v47, %v5508_v53  ;;  %v2154_v3 = vcombine.low %v2115_v37, %v2147_v14  ;;  %v3189_v47 = vcombine.high %v6370_v22, %v6357_v0 }
 0x280   : > { %v3833_v58 = vcombine.low %v7852_v56, %v6455_v49  ;;  %v2155_v45 = vcombine.high %v2115_v37, %v2147_v14  ;;  %v7873_v37 = vcombine.high %v7861_v32, %v7862_v43 }
 0x281   : > { %v3052_v5 = vcombine.low %v6503_v8, %v6484_v31 }
 0x282   : > { %v6512_v25 = vrot.slane %v3833_v58, %v5508_v53  ;;  %v2772_v58 = vrot.slane %v2764_v54, %v5631_v62  ;;  %v3849_v54 = vcombine.low %v6530_v50, %v6521_v28 }
 0x283   : > { %4266 = vrot.lane.b32.xlu1 %v3379_v9, %s5149_s26  ;;  %4008 = vrot.lane.b32.xlu0 %v2154_v3, %s5148_s0  ;;  %v6524_v9 = vrot.slane %v3817_v29, %v5508_v53  ;;  %v3092_v3 = vrot.slane %v3084_v36, %v5631_v62  ;;  %v7863_v29 = vcombine.low %v7861_v32, %v7862_v43  ;;  %v7876_v32 = vld [vmem:[#allocation100_spill] sm:$0xff] }
 0x284   : > { %v2828_v22 = vcombine.low %v2772_v58, %v2804_v44  ;;  %v3060_v34 = vrot.slane %v3052_v5, %v5631_v62  ;;  %v3857_v36 = vrot.slane %v3849_v54, %v5631_v62  ;;  %v7866_v5 = vld [vmem:[#allocation102_spill] sm:$0xff]  ;;  %v7871_v54 = vld [vmem:[#allocation95_spill] sm:$0xff] }
 0x285   : > { %v3881_v0 = vcombine.low %v6524_v9, %v6512_v25 }
 0x286   : > { %v3104_v55 = vcombine.low %v3060_v34, %v3092_v3 }
 0x287   : > { %3974 = vrot.lane.b32.xlu1 %v2016_v27, %s5146_s14  ;;  %4180 = vrot.lane.b32.xlu0 %v7863_v29, %s5144_s29  ;;  %v3203_v27 = vrot.slane %v3189_v47, %v5631_v62  ;;  %v3889_v11 = vrot.slane %v3881_v0, %v5631_v62  ;;  %v7864_v47 = vcombine.high %v7853_v13, %v7854_v63  ;;  %v7867_v0 = vld [vmem:[#allocation96_spill] sm:$0xff]  ;;  %v7872_v13 = vld [vmem:[#allocation85_spill] sm:$0xff] }
 0x288   : > { %v2564_v63 = vcombine.low %v7872_v13, %v7871_v54  ;;  %v7878_v13 = vld [vmem:[#allocation109_spill] sm:$0xff] }
 0x289   : > { %v3242_v7 = vcombine.low %v3203_v27, %v3235_v21  ;;  %v3913_v29 = vcombine.low %v3857_v36, %v3889_v11 }
 0x28b   : > { %4042 = vrot.lane.b32.xlu1 %v2828_v22, %s5150_s28  ;;  %4248 = vrot.lane.b32.xlu0 %v3242_v7, %s5148_s0  ;;  %v7865_v22 = vld [vmem:[#allocation107_spill] sm:$0xff]  ;;  %v2580_v7 = vcombine.low %v7868_v38, %v7867_v0 }
 0x28c   : > { %v2612_v51 = vcombine.low %v7866_v5, %v7865_v22 }
 0x28d   : > { %v6567_v14 = vrot.slane %v2580_v7, %v5508_v53  ;;  %v3105_v7 = vcombine.high %v3060_v34, %v3092_v3  ;;  %v2797_v34 = vcombine.high %v6464_v15, %v6447_v20 }
 0x28f   : > { %4214 = vrot.lane.b32.xlu1 %v3104_v55, %s5146_s14  ;;  %3956 = vrot.lane.b32.xlu0 %v7864_v47, %s5145_s13  ;;  %v7870_v55 = vld [vmem:[#allocation101_spill] sm:$0xff]  ;;  %v2829_v47 = vcombine.high %v2772_v58, %v2804_v44  ;;  %v3243_v58 = vcombine.high %v3203_v27, %v3235_v21  ;;  %v7880_v21 = vld [vmem:[#allocation99_spill] sm:$0xff] }
 0x290   : > { %v2596_v59 = vcombine.low %v7870_v55, %v7869_v18  ;;  %v7875_v44 = vld [vmem:[#allocation105_spill] sm:$0xff]  ;;  %v1965_v55 = vcombine.high %v6431_v57, %v6421_v24 }
 0x291   : > { %v7881_v27 = vld [vmem:[#allocation93_spill] sm:$0xff] }
 0x292   : > { %v6570_v30 = vrot.slane %v2596_v59, %v5508_v53  ;;  %v1997_v59 = vcombine.high %v6424_v17, %v6416_v10  ;;  %v3650_v10 = vcombine.low %v7881_v27, %v7880_v21  ;;  %v7882_v57 = vld [vmem:[#allocation17_spill] sm:$0xff] }
 0x293   : > { %4282 = vrot.lane.b32.xlu1 %v3913_v29, %s5150_s28  ;;  %4024 = vrot.lane.b32.xlu0 %v2155_v45, %s5149_s26  ;;  %v6564_v29 = vrot.slane %v2612_v51, %v5508_v53  ;;  %v6578_v45 = vrot.slane %v2564_v63, %v5508_v53  ;;  %v7879_v63 = vld [vmem:[#allocation104_spill] sm:$0xff]  ;;  %v7894_v21 = vld [vmem:[#allocation65_spill] sm:$0xff] }
 0x294   : > { %v3682_v54 = vcombine.low %v7879_v63, %v7878_v13  ;;  %v2011_v63 = vrot.slane %v1997_v59, %v5631_v62  ;;  %v6621_v20 = vrot.slane %v3650_v10, %v5508_v53  ;;  %v7886_v10 = vld [vmem:[#allocation44_spill] sm:$0xff] }
 0x295   : > { %v2660_v51 = vcombine.low %v6570_v30, %v6564_v29  ;;  %v2628_v43 = vcombine.low %v6578_v45, %v6567_v14 }
 0x296   : > { %v6609_v24 = vrot.slane %v3682_v54, %v5508_v53  ;;  %v3085_v54 = vcombine.high %v6493_v23, %v6470_v52  ;;  %v3882_v52 = vcombine.high %v6524_v9, %v6512_v25 }
 0x297   : > { %3990 = vrot.lane.b32.xlu1 %v2017_v42, %s5147_s16  ;;  %4196 = vrot.lane.b32.xlu0 %v7873_v37, %s5145_s13  ;;  %v7874_v42 = vld [vmem:[#allocation110_spill] sm:$0xff]  ;;  %v2668_v3 = vrot.slane %v2660_v51, %v5631_v62  ;;  %v2765_v51 = vcombine.high %v6477_v46, %v6461_v39  ;;  %v3053_v46 = vcombine.high %v6503_v8, %v6484_v31  ;;  %s5053_s13 = sshll.u32 %s5160_s18, 4  ;;  %s5054_s13 = int_to_ptr.vmem [resolvable:$false] %s5053_s13 }
 0x298   : > { %v3698_v26 = vcombine.low %v7875_v44, %v7874_v42  ;;  %v7877_v37 = vld [vmem:[#allocation94_spill] sm:$0xff]  ;;  %v3850_v31 = vcombine.high %v6530_v50, %v6521_v28  ;;  %v6649_v9 = vrot.slane %v3882_v52, %v5631_v62 }
 0x299   : > { %v3067_v8 = vrot.slane %v3053_v46, %v5631_v62  ;;  %v7889_v28 = vld [vmem:[#allocation74_spill] sm:$0xff] }
 0x29a   : > { %v6599_v17 = vrot.slane %v3698_v26, %v5508_v53  ;;  %v2636_v26 = vrot.slane %v2628_v43, %v5631_v62  ;;  %v2811_v43 = vrot.slane %v2797_v34, %v5631_v62 }
 0x29b   : > { %4058 = vrot.lane.b32.xlu1 %v2829_v47, %s5151_s30  ;;  %v3666_v47 = vcombine.low %v7877_v37, %v7876_v32  ;;  %4264 = vrot.lane.b32.xlu0 %v3243_v58, %s5149_s26  ;;  %v3914_v37 = vcombine.high %v3857_v36, %v3889_v11  ;;  %v1979_v11 = vrot.slane %v1965_v55, %v5631_v62  ;;  %v7895_v32 = vld [vmem:[#allocation57_spill] sm:$0xff] }
 0x29c   : > { %v3746_v15 = vcombine.low %v6609_v24, %v6599_v17  ;;  %v2692_v36 = vcombine.low %v2636_v26, %v2668_v3  ;;  %v2779_v55 = vrot.slane %v2765_v51, %v5631_v62  ;;  %v2693_v52 = vcombine.high %v2636_v26, %v2668_v3 }
 0x29d   : > { %v6606_v58 = vrot.slane %v3666_v47, %v5508_v53  ;;  %v2018_v59 = vcombine.low %v1979_v11, %v2011_v63  ;;  %v3099_v47 = vrot.slane %v3085_v54, %v5631_v62 }
 0x29e   : > { %v2830_v23 = vcombine.low %v2779_v55, %v2811_v43  ;;  %v2831_v26 = vcombine.high %v2779_v55, %v2811_v43  ;;  %v7898_v43 = vld [vmem:[#allocation84_spill] sm:$0xff]  ;;  %v7899_v55 = vld [vmem:[#allocation70_spill] sm:$0xff] }
 0x29f   : > { %4230 = vrot.lane.b32.xlu1 %v3105_v7, %s5147_s16  ;;  %v7883_v7 = vld [vmem:[#allocation33_spill] sm:$0xff]  ;;  %v3714_v39 = vcombine.low %v6621_v20, %v6606_v58  ;;  %v3106_v25 = vcombine.low %v3067_v8, %v3099_v47 }
 0x2a0   : > { %v7884_v27 = vcombine.low %v7882_v57, %v7883_v7  ;;  %v7888_v50 = vcombine.high %v7882_v57, %v7883_v7  ;;  %v7896_v57 = vld [vmem:[#allocation43_spill] sm:$0xff] }
 0x2a1   : > { %v2428_v7 = vcombine.low %v7896_v57, %v7895_v32 }
 0x2a2   : > { %3972 = vrot.lane.b32.xlu0 %v7884_v27, %s5146_s14  ;;  %v7885_v27 = vld [vmem:[#allocation27_spill] sm:$0xff] }
 0x2a3   : > { %4298 = vrot.lane.b32.xlu1 %v3914_v37, %s5151_s30  ;;  %v3754_v37 = vrot.slane %v3746_v15, %v5631_v62  ;;  %v7887_v34 = vcombine.low %v7885_v27, %v7886_v10  ;;  %v3864_v15 = vrot.slane %v3850_v31, %v5631_v62  ;;  %v7893_v31 = vld [vmem:[#allocation73_spill] sm:$0xff] }
 0x2a4   : > { %v2460_v13 = vcombine.low %v7894_v21, %v7893_v31 }
 0x2a5   : > { %v3915_v54 = vcombine.low %v3864_v15, %v6649_v9 }
 0x2a6   : > { %4040 = vrot.lane.b32.xlu0 %v2692_v36, %s5150_s28  ;;  %v3722_v36 = vrot.slane %v3714_v39, %v5631_v62 }
 0x2a7   : > { %4006 = vrot.lane.b32.xlu1 %v2018_v59, %s5148_s0  ;;  %v7890_v59 = vld [vmem:[#allocation66_spill] sm:$0xff] }
 0x2a8   : > { %v3778_v51 = vcombine.low %v3722_v36, %v3754_v37  ;;  %v2476_v39 = vcombine.low %v7890_v59, %v7889_v28 }
 0x2aa   : > { %4212 = vrot.lane.b32.xlu0 %v7887_v34, %s5146_s14  ;;  %v7891_v34 = vld [vmem:[#allocation58_spill] sm:$0xff]  ;;  %s5055_s14 = scalar_lea.vmem %s5054_s13, 4096 }
 0x2ab   : > { %4074 = vrot.lane.b32.xlu1 %v2830_v23, %s5152_s15  ;;  %v2019_v23 = vcombine.high %v1979_v11, %v2011_v63  ;;  %v2749_v63 = vcombine.high %v7834_v1, %v7833_v2  ;;  %v2717_v2 = vcombine.high %v7839_v33, %v7838_v12  ;;  %v2733_v1 = vcombine.high %v7841_v41, %v7840_v40 }
 0x2ac   : > { %v2701_v12 = vcombine.high %v7845_v60, %v7844_v6  ;;  %v3107_v41 = vcombine.high %v3067_v8, %v3099_v47  ;;  %v7904_v47 = vld [vmem:[#allocation61_spill] sm:$0xff] }
 0x2ad   : > { %v6710_v33 = vrot.slane %v2749_v63, %v5508_v53  ;;  %v6724_v60 = vrot.slane %v2717_v2, %v5508_v53  ;;  %v7905_v8 = vld [vmem:[#allocation53_spill] sm:$0xff] }
 0x2ae   : > { %4280 = vrot.lane.b32.xlu0 %v3778_v51, %s5150_s28  ;;  %v7892_v51 = vld [vmem:[#allocation46_spill] sm:$0xff]  ;;  %v3515_v63 = vcombine.low %v7905_v8, %v7904_v47  ;;  %v6744_v2 = vrot.slane %v2701_v12, %v5508_v53 }
 0x2af   : > { %4246 = vrot.lane.b32.xlu1 %v3106_v25, %s5148_s0  ;;  %v2444_v25 = vcombine.low %v7892_v51, %v7891_v34  ;;  %v7916_v34 = vld [vmem:[#allocation101_spill] sm:$0xff] }
 0x2b1   : > { %v6662_v46 = vpop.permute.xlu0 %3930  ;;  %v6682_v11 = vrot.slane %v2444_v25, %v5508_v53  ;;  %v3563_v25 = vcombine.low %v7899_v55, %v7898_v43  ;;  %v7901_v55 = vld [vmem:[#allocation69_spill] sm:$0xff] }
 0x2b2   : > { %3988 = vrot.lane.b32.xlu0 %v7888_v50, %s5147_s16 }
 0x2b3   : > { %4314 = vrot.lane.b32.xlu1 %v3915_v54, %s5152_s15  ;;  %v6673_v54 = vrot.slane %v2476_v39, %v5508_v53  ;;  %v6692_v39 = vrot.slane %v2428_v7, %v5508_v53  ;;  %v3779_v7 = vcombine.high %v3722_v36, %v3754_v37  ;;  %v7903_v37 = vld [vmem:[#allocation54_spill] sm:$0xff]  ;;  %v6727_v36 = vrot.slane %v2733_v1, %v5508_v53 }
 0x2b5   : > { %v6675_v50 = vpop.permute.xlu0 %3946  ;;  %v2812_v1 = vcombine.low %v6727_v36, %v6710_v33 }
 0x2b6   : > { %4056 = vrot.lane.b32.xlu0 %v2693_v52, %s5151_s30  ;;  %v6685_v52 = vrot.slane %v2460_v13, %v5508_v53 }
 0x2b7   : > { %4022 = vrot.lane.b32.xlu1 %v2019_v23, %s5149_s26  ;;  %v7897_v23 = vcombine.high %v7885_v27, %v7886_v10  ;;  %v2661_v27 = vcombine.high %v6570_v30, %v6564_v29  ;;  %v2629_v29 = vcombine.high %v6578_v45, %v6567_v14  ;;  %v7902_v30 = vld [vmem:[#allocation62_spill] sm:$0xff] }
 0x2b8   : > { %v2524_v13 = vcombine.low %v6685_v52, %v6673_v54  ;;  %v3531_v6 = vcombine.low %v7903_v37, %v7902_v30 }
 0x2b9   : > { %v6679_v3 = vpop.permute.xlu1 %4170  ;;  %v6705_v10 = vpop.permute.xlu0 %3928  ;;  %v6738_v45 = vrot.slane %v2661_v27, %v5631_v62  ;;  %v7906_v27 = vld [vmem:[#allocation18_spill] sm:$0xff]  ;;  %v2643_v12 = vrot.slane %v2629_v29, %v5631_v62 }
 0x2ba   : > { %4228 = vrot.lane.b32.xlu0 %v7897_v23, %s5147_s16  ;;  %v7900_v23 = vld [vmem:[#allocation77_spill] sm:$0xff]  ;;  %v6763_v30 = vrot.slane %v3531_v6, %v5508_v53  ;;  %v2820_v6 = vrot.slane %v2812_v1, %v5631_v62 }
 0x2bb   : > { %4090 = vrot.lane.b32.xlu1 %v2831_v26, %s5153_s17  ;;  %v2492_v26 = vcombine.low %v6692_v39, %v6682_v11  ;;  %v3547_v43 = vcombine.low %v7901_v55, %v7900_v23  ;;  %v6733_v55 = vrot.slane %v3563_v25, %v5508_v53  ;;  %v3916_v25 = vcombine.high %v3864_v15, %v6649_v9 }
 0x2bc   : > { %v3818_v9 = vcombine.high %v7858_v35, %v6472_v16  ;;  %v6773_v15 = vrot.slane %v3515_v63, %v5508_v53  ;;  %v2694_v29 = vcombine.low %v2643_v12, %v6738_v45  ;;  %v3715_v63 = vcombine.high %v6621_v20, %v6606_v58 }
 0x2bd   : > { %v6712_v40 = vpop.permute.xlu1 %4186  ;;  %v6735_v14 = vpop.permute.xlu0 %4168  ;;  %v6754_v47 = vrot.slane %v3547_v43, %v5508_v53  ;;  %v2500_v37 = vrot.slane %v2492_v26, %v5631_v62  ;;  %v3747_v26 = vcombine.high %v6609_v24, %v6599_v17 }
 0x2be   : > { %4296 = vrot.lane.b32.xlu0 %v3779_v7, %s5151_s30  ;;  %v6741_v7 = vrot.slane %v2524_v13, %v5631_v62  ;;  %v7907_v13 = vld [vmem:[#allocation34_spill] sm:$0xff]  ;;  %v3579_v17 = vcombine.low %v6773_v15, %v6763_v30 }
 0x2bf   : > { %4262 = vrot.lane.b32.xlu1 %v3107_v41, %s5149_s26  ;;  %v3834_v41 = vcombine.high %v7852_v56, %v6455_v49  ;;  %v7908_v23 = vcombine.low %v7906_v27, %v7907_v13  ;;  %v2780_v49 = vcombine.low %v6744_v2, %v6724_v60  ;;  %v3802_v56 = vcombine.high %v7857_v4, %v7856_v61 }
 0x2c0   : > { %v3611_v43 = vcombine.low %v6754_v47, %v6733_v55  ;;  %v3786_v61 = vcombine.high %v7860_v48, %v7859_v19  ;;  %v2556_v35 = vcombine.low %v2500_v37, %v6741_v7  ;;  %v6800_v19 = vrot.slane %v3818_v9, %v5508_v53 }
 0x2c1   : > { %v6750_v8 = vpop.permute.xlu1 %3962  ;;  %v6785_v16 = vrot.slane %v3834_v41, %v5508_v53  ;;  %v6797_v24 = vrot.slane %v3802_v56, %v5508_v53  ;;  %v2788_v48 = vrot.slane %v2780_v49, %v5631_v62  ;;  %v3761_v1 = vrot.slane %v3747_v26, %v5631_v62 }
 0x2c2   : > { %4004 = vrot.lane.b32.xlu0 %v7908_v23, %s5148_s0  ;;  %v6779_v23 = vpop.permute.xlu0 %3944  ;;  %v6808_v58 = vrot.slane %v3786_v61, %v5508_v53  ;;  %v3619_v9 = vrot.slane %v3611_v43, %v5631_v62  ;;  %v3729_v49 = vrot.slane %v3715_v63, %v5631_v62  ;;  %v3587_v61 = vrot.slane %v3579_v17, %v5631_v62 }
 0x2c3   : > { %4330 = vrot.lane.b32.xlu1 %v3916_v25, %s5153_s17  ;;  %v3897_v20 = vcombine.low %v6800_v19, %v6785_v16  ;;  %v2832_v56 = vcombine.low %v2788_v48, %v2820_v6  ;;  %v7915_v17 = vcombine.high %v7906_v27, %v7907_v13  ;;  %v2597_v27 = vcombine.high %v7916_v34, %v7869_v18  ;;  %v7917_v13 = vld [vmem:[#allocation95_spill] sm:$0xff] }
 0x2c4   : > { %v3865_v26 = vcombine.low %v6808_v58, %v6797_v24  ;;  %v3643_v43 = vcombine.low %v3587_v61, %v3619_v9 }
 0x2c5   : > { %v6787_v4 = vpop.permute.xlu1 %4202  ;;  %v3905_v31 = vrot.slane %v3897_v20, %v5631_v62  ;;  %v2613_v20 = vcombine.high %v7866_v5, %v7865_v22  ;;  %v7918_v22 = vld [vmem:[#allocation85_spill] sm:$0xff]  ;;  %v6868_v18 = vrot.slane %v2597_v27, %v5508_v53 }
 0x2c6   : > { %7909 = vst [vmem:[#allocation78_spill] sm:$0xff] %v6787_v4  ;;  %4072 = vrot.lane.b32.xlu0 %v2694_v29, %s5152_s15  ;;  %v6804_v41 = vpop.permute.xlu0 %4184  ;;  %v7910_v29 = vld [vmem:[#allocation28_spill] sm:$0xff]  ;;  %v3780_v4 = vcombine.low %v3729_v49, %v3761_v1  ;;  %v2565_v5 = vcombine.high %v7918_v22, %v7917_v13  ;;  %v7922_v13 = vld [vmem:[#allocation109_spill] sm:$0xff] }
 0x2c7   : > { %4038 = vrot.lane.b32.xlu1 %v2556_v35, %s5150_s28  ;;  %v7911_v35 = vld [vmem:[#allocation45_spill] sm:$0xff]  ;;  %v7923_v22 = vld [vmem:[#allocation104_spill] sm:$0xff] }
 0x2c8   : > { %v7912_v57 = vcombine.low %v7910_v29, %v7911_v35 }
 0x2c9   : > { %v6812_v25 = vpop.permute.xlu1 %3978 }
 0x2ca   : > { %4244 = vrot.lane.b32.xlu0 %v7912_v57, %s5148_s0  ;;  %v6824_v32 = vpop.permute.xlu0 %3926  ;;  %v3873_v57 = vrot.slane %v3865_v26, %v5631_v62 }
 0x2cb   : > { %4106 = vrot.lane.b32.xlu1 %v2832_v56, %s5154_s19  ;;  %7913 = vst [vmem:[#allocation82_spill] sm:$0xff] %v6824_v32  ;;  %v2557_v32 = vcombine.high %v2500_v37, %v6741_v7  ;;  %v2833_v37 = vcombine.high %v2788_v48, %v2820_v6  ;;  %v3781_v6 = vcombine.high %v3729_v49, %v3761_v1 }
 0x2cc   : > { %v3917_v56 = vcombine.low %v3873_v57, %v3905_v31  ;;  %v2525_v48 = vcombine.high %v6685_v52, %v6673_v54  ;;  %v7925_v54 = vld [vmem:[#allocation93_spill] sm:$0xff] }
 0x2cd   : > { %v6826_v21 = vpop.permute.xlu1 %4218 }
 0x2ce   : > { %7914 = vst [vmem:[#allocation98_spill] sm:$0xff] %v6826_v21  ;;  %4312 = vrot.lane.b32.xlu0 %v3780_v4, %s5152_s15  ;;  %v6832_v63 = vpop.permute.xlu0 %3994  ;;  %v2581_v21 = vcombine.high %v7868_v38, %v7867_v0  ;;  %v7919_v0 = vcombine.high %v7910_v29, %v7911_v35  ;;  %v3644_v35 = vcombine.high %v3587_v61, %v3619_v9 }
 0x2cf   : > { %4278 = vrot.lane.b32.xlu1 %v3643_v43, %s5150_s28  ;;  %v2695_v43 = vcombine.high %v2643_v12, %v6738_v45  ;;  %v2813_v61 = vcombine.high %v6727_v36, %v6710_v33  ;;  %v2781_v33 = vcombine.high %v6744_v2, %v6724_v60  ;;  %v7929_v60 = vld [vmem:[#allocation114_spill] sm:$0xff] }
 0x2d0   : > { %v6865_v38 = vrot.slane %v2581_v21, %v5508_v53  ;;  %v3699_v21 = vcombine.high %v7875_v44, %v7874_v42  ;;  %v2493_v42 = vcombine.high %v6692_v39, %v6682_v11  ;;  %v7924_v44 = vld [vmem:[#allocation99_spill] sm:$0xff]  ;;  %v6911_v11 = vrot.slane %v2525_v48, %v5631_v62 }
 0x2d1   : > { %v6834_v51 = vpop.permute.xlu1 %3960  ;;  %v3651_v52 = vcombine.high %v7925_v54, %v7924_v44  ;;  %v6966_v54 = vrot.slane %v2781_v33, %v5631_v62  ;;  %v3898_v33 = vcombine.high %v6800_v19, %v6785_v16  ;;  %v3866_v19 = vcombine.high %v6808_v58, %v6797_v24  ;;  %v7939_v24 = vld [vmem:[#allocation113_spill] sm:$0xff] }
 0x2d2   : > { %4020 = vrot.lane.b32.xlu0 %v7915_v17, %s5149_s26  ;;  %v6843_v4 = vpop.permute.xlu0 %4200  ;;  %v6899_v1 = vrot.slane %v3699_v21, %v5508_v53  ;;  %v6932_v36 = vrot.slane %v2493_v42, %v5631_v62 }
 0x2d3   : > { %4346 = vrot.lane.b32.xlu1 %v3917_v56, %s5154_s19  ;;  %v6858_v56 = vrot.slane %v2613_v20, %v5508_v53  ;;  %v7920_v20 = vld [vmem:[#allocation100_spill] sm:$0xff] }
 0x2d5   : > { %v6846_v26 = vpop.permute.xlu1 %4166  ;;  %v2676_v34 = vcombine.low %v6868_v18, %v6858_v56 }
 0x2d6   : > { %4088 = vrot.lane.b32.xlu0 %v2695_v43, %s5153_s17  ;;  %v6860_v45 = vpop.permute.xlu0 %3942  ;;  %v7921_v43 = vld [vmem:[#allocation94_spill] sm:$0xff] }
 0x2d7   : > { %4054 = vrot.lane.b32.xlu1 %v2557_v32, %s5151_s30  ;;  %v6876_v32 = vrot.slane %v2565_v5, %v5508_v53  ;;  %v3667_v27 = vcombine.high %v7921_v43, %v7920_v20  ;;  %v3683_v5 = vcombine.high %v7923_v22, %v7922_v13  ;;  %v6904_v49 = vrot.slane %v2676_v34, %v5631_v62 }
 0x2d8   : > { %v2558_v13 = vcombine.low %v6932_v36, %v6911_v11  ;;  %v6953_v22 = vrot.slane %v2813_v61, %v5631_v62 }
 0x2d9   : > { %v6862_v12 = vpop.permute.xlu1 %4234  ;;  %v2644_v17 = vcombine.low %v6876_v32, %v6865_v38  ;;  %v6914_v39 = vrot.slane %v3667_v27, %v5508_v53  ;;  %v6917_v21 = vrot.slane %v3683_v5, %v5508_v53  ;;  %v3580_v5 = vcombine.high %v6773_v15, %v6763_v30  ;;  %v7932_v15 = vld [vmem:[#allocation130_spill] sm:$0xff] }
 0x2da   : > { %4260 = vrot.lane.b32.xlu0 %v7919_v0, %s5149_s26  ;;  %v6882_v7 = vpop.permute.xlu0 %4010  ;;  %v3918_v0 = vcombine.high %v3873_v57, %v3905_v31  ;;  %v3612_v31 = vcombine.high %v6754_v47, %v6733_v55  ;;  %v6935_v57 = vrot.slane %v3651_v52, %v5508_v53  ;;  %v7930_v47 = vld [vmem:[#allocation112_spill] sm:$0xff]  ;;  %v7933_v52 = vld [vmem:[#allocation129_spill] sm:$0xff] }
 0x2db   : > { %4122 = vrot.lane.b32.xlu1 %v2833_v37, %s5155_s10  ;;  %v6924_v20 = vrot.slane %v2644_v17, %v5631_v62  ;;  %v3762_v48 = vcombine.low %v6917_v21, %v6899_v1  ;;  %v7931_v2 = vcombine.low %v7929_v60, %v7930_v47  ;;  %v7934_v61 = vcombine.low %v7932_v15, %v7933_v52  ;;  %v7936_v47 = vld [vmem:[#allocation48_spill] sm:$0xff]  ;;  %v7941_v15 = vld [vmem:[#allocation23_spill] sm:$0xff] }
 0x2dc   : > { %v3730_v42 = vcombine.low %v6935_v57, %v6914_v39  ;;  %v6969_v30 = vrot.slane %v3612_v31, %v5631_v62  ;;  %v7942_v52 = vld [vmem:[#allocation40_spill] sm:$0xff] }
 0x2dd   : > { %v3977_v29 = vpop.permute.xlu1 %3976  ;;  %v2696_v55 = vcombine.low %v6924_v20, %v6904_v49  ;;  %v4387_v43 = vsel %vm4384_vm0, %v7931_v2, %v6705_v10 }
 0x2de   : > { %4328 = vrot.lane.b32.xlu0 %v3781_v6, %s5153_s17  ;;  %v6901_v9 = vpop.permute.xlu0 %4216  ;;  %v7926_v6 = vld [vmem:[#allocation19_spill] sm:$0xff]  ;;  %v4392_v44 = vsel %vm4389_vm1, %v4387_v43, %v6779_v23  ;;  %v4388_v23 = vsel %vm4384_vm0, %v7934_v61, %v6662_v46  ;;  %v2834_v46 = vcombine.low %v6966_v54, %v6953_v22  ;;  %v6998_v16 = vrot.slane %v3730_v42, %v5631_v62 }
 0x2df   : > { %4294 = vrot.lane.b32.xlu1 %v3644_v35, %s5151_s30  ;;  %v7927_v35 = vld [vmem:[#allocation35_spill] sm:$0xff]  ;;  %v4397_v10 = vsel %vm4394_vm2, %v4392_v44, %v6834_v51  ;;  %v6978_v51 = vrot.slane %v3762_v48, %v5631_v62  ;;  %v4393_v31 = vsel %vm4389_vm1, %v4388_v23, %v6675_v50  ;;  %v7935_v48 = vld [vmem:[#allocation25_spill] sm:$0xff]  ;;  %v7001_v50 = vrot.slane %v3580_v5, %v5631_v62 }
 0x2e0   : > { %v7928_v34 = vcombine.low %v7926_v6, %v7927_v35  ;;  %v7937_v2 = vcombine.low %v7935_v48, %v7936_v47  ;;  %v7938_v44 = vld [vmem:[#allocation115_spill] sm:$0xff]  ;;  %v7943_v61 = vcombine.low %v7941_v15, %v7942_v52  ;;  %v7954_v52 = vld [vmem:[#allocation78_spill] sm:$0xff] }
 0x2e1   : > { %v6908_v37 = vpop.permute.xlu1 %4182  ;;  %v3782_v42 = vcombine.low %v6998_v16, %v6978_v51  ;;  %v3645_v5 = vcombine.low %v7001_v50, %v6969_v30  ;;  %v7940_v58 = vcombine.low %v7938_v44, %v7939_v24  ;;  %v7950_v24 = vld [vmem:[#allocation58_spill] sm:$0xff] }
 0x2e2   : > { %4036 = vrot.lane.b32.xlu0 %v7928_v34, %s5150_s28  ;;  %v6939_v17 = vpop.permute.xlu0 %3924 }
 0x2e3   : > { %4362 = vrot.lane.b32.xlu1 %v3918_v0, %s5155_s10  ;;  %v4402_v0 = vsel %vm4399_vm3, %v4397_v10, %v3977_v29  ;;  %v4398_v29 = vsel %vm4394_vm2, %v4393_v31, %v6750_v8 }
 0x2e4   : > { %v4403_v43 = vsel %vm4399_vm3, %v4398_v29, %v6812_v25  ;;  %v4461_v25 = vsel %vm4384_vm0, %v7940_v58, %v6735_v14  ;;  %v7945_v29 = vld [vmem:[#allocation132_spill] sm:$0xff]  ;;  %v7951_v58 = vld [vmem:[#allocation46_spill] sm:$0xff] }
 0x2e5   : > { %v6948_v27 = vpop.permute.xlu1 %4250  ;;  %v4408_v8 = vsel %vm4404_vm4, %v4403_v43, %v6832_v63  ;;  %v7947_v43 = vld [vmem:[#allocation89_spill] sm:$0xff] }
 0x2e6   : > { %4104 = vrot.lane.b32.xlu0 %v2696_v55, %s5154_s19  ;;  %v3993_v34 = vpop.permute.xlu0 %3992  ;;  %v4413_v10 = vsel %vm4409_vm5, %v4408_v8, %v6882_v7  ;;  %v3880_v7 = vrot.slane %v3866_v19, %v5631_v62  ;;  %v7948_v8 = vld [vmem:[#allocation87_spill] sm:$0xff] }
 0x2e7   : > { %4070 = vrot.lane.b32.xlu1 %v2558_v13, %s5152_s15  ;;  %v6985_v55 = vsel %vm4404_vm4, %v4402_v0, %v3993_v34  ;;  %v3912_v0 = vrot.slane %v3898_v33, %v5631_v62  ;;  %v4465_v34 = vsel %vm4389_vm1, %v4461_v25, %v6804_v41  ;;  %v7944_v33 = vld [vmem:[#allocation131_spill] sm:$0xff]  ;;  %v2445_v25 = vcombine.high %v7951_v58, %v7950_v24  ;;  %v7967_v24 = vld [vmem:[#allocation70_spill] sm:$0xff] }
 0x2e8   : > { %v4469_v14 = vsel %vm4394_vm2, %v4465_v34, %v6843_v4  ;;  %v7958_v34 = vld [vmem:[#allocation98_spill] sm:$0xff] }
 0x2e9   : > { %v6987_v60 = vpop.permute.xlu1 %3958  ;;  %v4473_v4 = vsel %vm4399_vm3, %v4469_v14, %v6901_v9  ;;  %v3919_v44 = vcombine.low %v3880_v7, %v3912_v0 }
 0x2ea   : > { %4276 = vrot.lane.b32.xlu0 %v7937_v2, %s5150_s28  ;;  %v4165_v13 = vpop.permute.xlu0 %4164  ;;  %v7946_v2 = vcombine.low %v7944_v33, %v7945_v29 }
 0x2eb   : > { %4138 = vrot.lane.b32.xlu1 %v2834_v46, %s5156_s11  ;;  %v7025_v63 = vsel %vm4384_vm0, %v7943_v61, %v4165_v13  ;;  %v2477_v46 = vcombine.high %v7890_v59, %v7889_v28  ;;  %v7949_v13 = vcombine.low %v7947_v43, %v7948_v8  ;;  %v7956_v61 = vld [vmem:[#allocation57_spill] sm:$0xff]  ;;  %v2697_v43 = vcombine.high %v6924_v20, %v6904_v49  ;;  %v7962_v49 = vld [vmem:[#allocation82_spill] sm:$0xff]  ;;  %v7963_v20 = vld [vmem:[#allocation88_spill] sm:$0xff] }
 0x2ec   : > { %v4462_v41 = vsel %vm4384_vm0, %v7946_v2, %v6679_v3 }
 0x2ed   : > { %v4027_v23 = vpop.permute.xlu1 %4026  ;;  %v4466_v19 = vsel %vm4389_vm1, %v4462_v41, %v6712_v40  ;;  %v7955_v40 = vcombine.high %v7926_v6, %v7927_v35  ;;  %v7078_v7 = vrot.slane %v2477_v46, %v5508_v53  ;;  %v7959_v6 = vld [vmem:[#allocation15_spill] sm:$0xff] }
 0x2ee   : > { %4344 = vrot.lane.b32.xlu0 %v3782_v42, %s5154_s19  ;;  %v7032_v31 = vsel %vm4414_vm6, %v4413_v10, %v4027_v23  ;;  %v4460_v42 = vsel %vm4384_vm0, %v7949_v13, %v6846_v26  ;;  %v7952_v10 = vld [vmem:[#allocation73_spill] sm:$0xff]  ;;  %v4470_v9 = vsel %vm4394_vm2, %v4466_v19, %v7954_v52  ;;  %v7957_v23 = vld [vmem:[#allocation43_spill] sm:$0xff] }
 0x2ef   : > { %4310 = vrot.lane.b32.xlu1 %v3645_v5, %s5152_s15  ;;  %v4233_v5 = vpop.permute.xlu0 %4232  ;;  %v4464_v28 = vsel %vm4389_vm1, %v4460_v42, %v6908_v37  ;;  %v7953_v26 = vld [vmem:[#allocation65_spill] sm:$0xff]  ;;  %v2429_v0 = vcombine.high %v7957_v23, %v7956_v61  ;;  %v4474_v14 = vsel %vm4399_vm3, %v4470_v9, %v7958_v34  ;;  %v7960_v35 = vld [vmem:[#allocation31_spill] sm:$0xff]  ;;  %v2559_v42 = vcombine.high %v6932_v36, %v6911_v11  ;;  %v7970_v61 = vld [vmem:[#allocation54_spill] sm:$0xff] }
 0x2f0   : > { %v7057_v59 = vsel %vm4404_vm4, %v4473_v4, %v4233_v5  ;;  %v2461_v15 = vcombine.high %v7953_v26, %v7952_v10  ;;  %v4478_v33 = vsel %vm4404_vm4, %v4474_v14, %v6862_v12  ;;  %v7961_v29 = vcombine.low %v7959_v6, %v7960_v35  ;;  %v7964_v5 = vld [vmem:[#allocation86_spill] sm:$0xff]  ;;  %v7971_v23 = vld [vmem:[#allocation77_spill] sm:$0xff] }
 0x2f1   : > { %v4199_v3 = vpop.permute.xlu1 %4198  ;;  %v4482_v8 = vsel %vm4409_vm5, %v4478_v33, %v6948_v27  ;;  %v7095_v12 = vrot.slane %v2445_v25, %v5508_v53  ;;  %v7965_v27 = vcombine.low %v7963_v20, %v7964_v5  ;;  %v7109_v11 = vrot.slane %v2429_v0, %v5508_v53  ;;  %v7972_v0 = vld [vmem:[#allocation69_spill] sm:$0xff] }
 0x2f2   : > { %4052 = vrot.lane.b32.xlu0 %v7955_v40, %s5151_s30  ;;  %v7070_v37 = vsel %vm4394_vm2, %v4464_v28, %v4199_v3  ;;  %v4385_v2 = vsel %vm4384_vm0, %v7961_v29, %v6939_v17  ;;  %v7098_v4 = vrot.slane %v2461_v15, %v5508_v53  ;;  %v2835_v15 = vcombine.high %v6966_v54, %v6953_v22  ;;  %v7969_v40 = vld [vmem:[#allocation62_spill] sm:$0xff]  ;;  %v7973_v22 = vld [vmem:[#allocation61_spill] sm:$0xff] }
 0x2f3   : > { %4378 = vrot.lane.b32.xlu1 %v3919_v44, %s5156_s11  ;;  %v3941_v41 = vpop.permute.xlu0 %3940  ;;  %v4386_v19 = vsel %vm4384_vm0, %v7965_v27, %v7962_v49  ;;  %v7966_v44 = vld [vmem:[#allocation84_spill] sm:$0xff]  ;;  %v2508_v52 = vcombine.low %v7109_v11, %v7095_v12  ;;  %v7974_v54 = vld [vmem:[#allocation53_spill] sm:$0xff]  ;;  %v2677_v6 = vcombine.high %v6868_v18, %v6858_v56  ;;  %v2645_v56 = vcombine.high %v6876_v32, %v6865_v38 }
 0x2f4   : > { %v4390_v13 = vsel %vm4389_vm1, %v4385_v2, %v3941_v41  ;;  %v2540_v36 = vcombine.low %v7098_v4, %v7078_v7  ;;  %v4391_v28 = vsel %vm4389_vm1, %v4386_v19, %v6860_v45  ;;  %v3564_v58 = vcombine.high %v7967_v24, %v7966_v44 }
 0x2f5   : > { %v4267_v46 = vpop.permute.xlu1 %4266  ;;  %v4396_v25 = vsel %vm4394_vm2, %v4391_v28, %v6987_v60  ;;  %v7968_v45 = vcombine.high %v7935_v48, %v7936_v47  ;;  %v3532_v60 = vcombine.high %v7970_v61, %v7969_v40  ;;  %v3516_v34 = vcombine.high %v7974_v54, %v7973_v22 }
 0x2f6   : > { %4120 = vrot.lane.b32.xlu0 %v2697_v43, %s5155_s10  ;;  %v4486_v17 = vsel %vm4414_vm6, %v4482_v8, %v4267_v46  ;;  %v3783_v48 = vcombine.high %v6998_v16, %v6978_v51  ;;  %v2548_v47 = vrot.slane %v2540_v36, %v5631_v62  ;;  %v7141_v33 = vrot.slane %v3564_v58, %v5508_v53  ;;  %v7979_v36 = vld [vmem:[#allocation49_spill] sm:$0xff] }
 0x2f7   : > { %4086 = vrot.lane.b32.xlu1 %v2559_v42, %s5153_s17  ;;  %v4009_v3 = vpop.permute.xlu0 %4008  ;;  %v3646_v2 = vcombine.high %v7001_v50, %v6969_v30  ;;  %v2516_v16 = vrot.slane %v2508_v52, %v5631_v62  ;;  %v7154_v41 = vrot.slane %v3532_v60, %v5508_v53  ;;  %v3763_v18 = vcombine.high %v6917_v21, %v6899_v1  ;;  %v7975_v1 = vld [vmem:[#allocation20_spill] sm:$0xff] }
 0x2f8   : > { %v4412_v10 = vsel %vm4409_vm5, %v6985_v55, %v4009_v3  ;;  %v3548_v55 = vcombine.high %v7972_v0, %v7971_v23  ;;  %v2691_v42 = vrot.slane %v2677_v6, %v5631_v62  ;;  %v3731_v38 = vcombine.high %v6935_v57, %v6914_v39  ;;  %v7976_v21 = vld [vmem:[#allocation36_spill] sm:$0xff] }
 0x2f9   : > { %v3975_v26 = vpop.permute.xlu1 %3974  ;;  %v2560_v50 = vcombine.low %v2516_v16, %v2548_v47  ;;  %v7977_v49 = vcombine.low %v7975_v1, %v7976_v21  ;;  %v3777_v5 = vrot.slane %v3763_v18, %v5631_v62 }
 0x2fa   : > { %4292 = vrot.lane.b32.xlu0 %v7968_v45, %s5151_s30  ;;  %v4401_v9 = vsel %vm4399_vm3, %v4396_v25, %v3975_v26  ;;  %v7157_v43 = vrot.slane %v3548_v55, %v5508_v53  ;;  %v3745_v44 = vrot.slane %v3731_v38, %v5631_v62  ;;  %v2561_v45 = vcombine.high %v2516_v16, %v2548_v47 }
 0x2fb   : > { %4154 = vrot.lane.b32.xlu1 %v2835_v15, %s5157_s22  ;;  %v4181_v14 = vpop.permute.xlu0 %4180 }
 0x2fc   : > { %v4463_v35 = vsel %vm4389_vm1, %v7025_v63, %v4181_v14  ;;  %v7165_v63 = vrot.slane %v3516_v34, %v5508_v53  ;;  %v3784_v25 = vcombine.low %v3745_v44, %v3777_v5  ;;  %v2509_v14 = vcombine.high %v7109_v11, %v7095_v12  ;;  %v7995_v44 = vld [vmem:[#allocation38_spill] sm:$0xff] }
 0x2fd   : > { %v4043_v29 = vpop.permute.xlu1 %4042 }
 0x2fe   : > { %4360 = vrot.lane.b32.xlu0 %v3783_v48, %s5155_s10  ;;  %v4423_v51 = vsel %vm4419_vm7, %v7032_v31, %v4043_v29  ;;  %v3627_v31 = vcombine.low %v7157_v43, %v7141_v33  ;;  %v3595_v53 = vcombine.low %v7165_v63, %v7154_v41  ;;  %v7983_v29 = vld [vmem:[#allocation21_spill] sm:$0xff]  ;;  %v3596_v12 = vcombine.high %v7165_v63, %v7154_v41 }
 0x2ff   : > { %4326 = vrot.lane.b32.xlu1 %v3646_v2, %s5153_s17  ;;  %v4249_v30 = vpop.permute.xlu0 %4248  ;;  %v7984_v2 = vld [vmem:[#allocation37_spill] sm:$0xff]  ;;  %v2523_v11 = vrot.slane %v2509_v14, %v5631_v62  ;;  %v4527_v14 = vld [vmem:[%s7523_s4 + $0x20] sm:$0xff] }
 0x300   : > { %v4481_v8 = vsel %vm4409_vm5, %v7057_v59, %v4249_v30  ;;  %v2659_v59 = vrot.slane %v2645_v56, %v5631_v62  ;;  %v3635_v19 = vrot.slane %v3627_v31, %v5631_v62  ;;  %v3603_v24 = vrot.slane %v3595_v53, %v5631_v62  ;;  %v7987_v31 = vld [vmem:[#allocation50_spill] sm:$0xff] }
 0x301   : > { %v4215_v46 = vpop.permute.xlu1 %4214  ;;  %v3610_v41 = vrot.slane %v3596_v12, %v5631_v62  ;;  %v7989_v53 = vcombine.high %v7983_v29, %v7984_v2 }
 0x302   : > { %4102 = vrot.lane.b32.xlu0 %v2560_v50, %s5154_s19  ;;  %v4472_v32 = vsel %vm4399_vm3, %v7070_v37, %v4215_v46  ;;  %v2698_v27 = vcombine.low %v2659_v59, %v2691_v42  ;;  %v7978_v37 = vld [vmem:[#allocation26_spill] sm:$0xff]  ;;  %v3647_v15 = vcombine.low %v3603_v24, %v3635_v19  ;;  %v2699_v22 = vcombine.high %v2659_v59, %v2691_v42  ;;  %v7986_v50 = vld [vmem:[#allocation29_spill] sm:$0xff] }
 0x303   : > { %4068 = vrot.lane.b32.xlu1 %v7977_v49, %s5152_s15  ;;  %v3957_v20 = vpop.permute.xlu0 %3956  ;;  %v7980_v28 = vcombine.low %v7978_v37, %v7979_v36  ;;  %v7982_v54 = vcombine.high %v7978_v37, %v7979_v36  ;;  %v3648_v6 = vcombine.high %v3603_v24, %v3635_v19  ;;  %v5158_v49 = vmov 0.0   ;;  %v7991_v37 = vld [vmem:[#allocation30_spill] sm:$0xff]  ;;  %v7992_v36 = vld [vmem:[#allocation51_spill] sm:$0xff] }
 0x304   : > { %v4395_v39 = vsel %vm4394_vm2, %v4390_v13, %v3957_v20  ;;  %4659 = vmatprep.mubr.f32.mxu0 %v5158_v49  ;;  %4683 = vmatprep.mubr.f32.mxu1 %v5158_v49  ;;  %v7990_v5 = vcombine.high %v7986_v50, %v7987_v31 }
 0x305   : > { %v4283_v57 = vpop.permute.xlu1 %4282 }
 0x306   : > { %4308 = vrot.lane.b32.xlu0 %v7980_v28, %s5152_s15  ;;  %v4490_v3 = vsel %vm4419_vm7, %v4486_v17, %v4283_v57  ;;  %v7993_v28 = vcombine.low %v7991_v37, %v7992_v36 }
 0x307   : > { %4136 = vrot.lane.b32.xlu1 %v2698_v27, %s5156_s11  ;;  %v4025_v58 = vpop.permute.xlu0 %4024 }
 0x308   : > { %v4417_v13 = vsel %vm4414_vm6, %v4412_v10, %v4025_v58  ;;  %v7981_v10 = vcombine.high %v7975_v1, %v7976_v21 }
 0x309   : > { %v3991_v26 = vpop.permute.xlu1 %3990 }
 0x30a   : > { %4376 = vrot.lane.b32.xlu0 %v3784_v25, %s5156_s11  ;;  %v4406_v52 = vsel %vm4404_vm4, %v4401_v9, %v3991_v26  ;;  %v2541_v9 = vcombine.high %v7098_v4, %v7078_v7  ;;  %v3628_v7 = vcombine.high %v7157_v43, %v7141_v33 }
 0x30b   : > { %4342 = vrot.lane.b32.xlu1 %v3647_v15, %s5154_s19  ;;  %v4197_v17 = vpop.permute.xlu0 %4196 }
 0x30c   : > { %v4467_v40 = vsel %vm4394_vm2, %v4463_v35, %v4197_v17  ;;  %v2555_v35 = vrot.slane %v2541_v9, %v5631_v62  ;;  %v3642_v30 = vrot.slane %v3628_v7, %v5631_v62  ;;  %v4524_v17 = vld [vmem:[%s7523_s4 + $0x8] sm:$0xff]  ;;  %v4525_v9 = vld [vmem:[%s7523_s4 + $0x10] sm:$0xff] }
 0x30d   : > { %v4059_v61 = vpop.permute.xlu1 %4058 }
 0x30e   : > { %4118 = vrot.lane.b32.xlu0 %v2561_v45, %s5155_s10  ;;  %v4428_v60 = vsel %vm4424_vm8, %v4423_v51, %v4059_v61  ;;  %v7985_v51 = vcombine.low %v7983_v29, %v7984_v2  ;;  %v2562_v18 = vcombine.low %v2523_v11, %v2555_v35  ;;  %v2563_v20 = vcombine.high %v2523_v11, %v2555_v35  ;;  %v4523_v45 = vld [vmem:[%s7523_s4] sm:$0xff] }
 0x30f   : > { %4084 = vrot.lane.b32.xlu1 %v7981_v10, %s5153_s17  ;;  %v4265_v23 = vpop.permute.xlu0 %4264  ;;  %v4526_v10 = vld [vmem:[%s7523_s4 + $0x18] sm:$0xff] }
 0x310   : > { %v4485_v0 = vsel %vm4414_vm6, %v4481_v8, %v4265_v23  ;;  %v7988_v8 = vcombine.low %v7986_v50, %v7987_v31 }
 0x311   : > { %v4231_v55 = vpop.permute.xlu1 %4230 }
 0x312   : > { %4324 = vrot.lane.b32.xlu0 %v7982_v54, %s5153_s17  ;;  %v4476_v34 = vsel %vm4404_vm4, %v4472_v32, %v4231_v55  ;;  %v3649_v32 = vcombine.low %v3610_v41, %v3642_v30  ;;  %v4528_v54 = vld [vmem:[%s7523_s4 + $0x28] sm:$0xff] }
 0x313   : > { %4152 = vrot.lane.b32.xlu1 %v2699_v22, %s5157_s22 }
 0x314   : > { %v3973_v48 = vpop.permute.xlu0 %3972 }
 0x315   : > { %v4400_v4 = vsel %vm4399_vm3, %v4395_v39, %v3973_v48  ;;  %v4299_v47 = vpop.permute.xlu1 %4298 }
 0x316   : > { %4100 = vrot.lane.b32.xlu0 %v7985_v51, %s5154_s19  ;;  %v7226_v16 = vsel %vm4424_vm8, %v4490_v3, %v4299_v47  ;;  %v7994_v3 = vld [vmem:[#allocation22_spill] sm:$0xff] }
 0x317   : > { %4358 = vrot.lane.b32.xlu1 %v3648_v6, %s5155_s10  ;;  %v7996_v24 = vcombine.low %v7994_v3, %v7995_v44  ;;  %v7997_v15 = vcombine.high %v7994_v3, %v7995_v44  ;;  %v4529_v6 = vld [vmem:[%s7523_s4 + $0x30] sm:$0xff] }
 0x318   : > { %v4041_v33 = vpop.permute.xlu0 %4040 }
 0x319   : > { %v4422_v43 = vsel %vm4419_vm7, %v4417_v13, %v4041_v33  ;;  %v4007_v56 = vpop.permute.xlu1 %4006 }
 0x31a   : > { %4340 = vrot.lane.b32.xlu0 %v7988_v8, %s5154_s19  ;;  %v4411_v46 = vsel %vm4409_vm5, %v4406_v52, %v4007_v56  ;;  %s4874_s19 = sshll.u32 %s5311_s1, 7 }
 0x31b   : > { %4134 = vrot.lane.b32.xlu1 %v2562_v18, %s5156_s11 }
 0x31c   : > { %v4213_v63 = vpop.permute.xlu0 %4212 }
 0x31d   : > { %v4471_v42 = vsel %vm4399_vm3, %v4467_v40, %v4213_v63  ;;  %v4075_v38 = vpop.permute.xlu1 %4074 }
 0x31e   : > { %4116 = vrot.lane.b32.xlu0 %v7989_v53, %s5155_s10  ;;  %v7247_v1 = vsel %vm4429_vm9, %v4428_v60, %v4075_v38  ;;  %v5159_v60 = vmov 0  }
 0x31f   : > { %4374 = vrot.lane.b32.xlu1 %v3649_v32, %s5156_s11  ;;  %4990 = vset.pattern.permute.xlu0 %v5159_v60 }
 0x320   : > { %v4281_v21 = vpop.permute.xlu0 %4280  ;;  %4991 = vset.pattern.permute.xlu1 %v5159_v60 }
 0x321   : > { %v4489_v62 = vsel %vm4419_vm7, %v4485_v0, %v4281_v21  ;;  %v4247_v59 = vpop.permute.xlu1 %4246 }
 0x322   : > { %4356 = vrot.lane.b32.xlu0 %v7990_v5, %s5155_s10  ;;  %v4480_v39 = vsel %vm4409_vm5, %v4476_v34, %v4247_v59  ;;  %s7435_s10 = scalar_lea.vmem [#allocation8], %s4874_s19 }
 0x323   : > { %4150 = vrot.lane.b32.xlu1 %v2563_v20, %s5157_s22 }
 0x324   : > { %v3989_v57 = vpop.permute.xlu0 %3988 }
 0x325   : > { %v4405_v27 = vsel %vm4404_vm4, %v4400_v4, %v3989_v57  ;;  %v7260_v19 = vpop.permute.xlu1 %4314  ;;  %v4530_v4 = vld [vmem:[%s7523_s4 + $0x38] sm:$0xff] }
 0x326   : > { %4372 = vrot.lane.b32.xlu0 %v7993_v28, %s5156_s11  ;;  %v4498_v37 = vsel %vm4429_vm9, %v7226_v16, %v7260_v19 }
 0x327   : > { %4132 = vrot.lane.b32.xlu1 %v7996_v24, %s5156_s11  ;;  %s4890_s11 = sshll.u32 %s5125_s23, 11 }
 0x328   : > { %v4057_v58 = vpop.permute.xlu0 %4056  ;;  %s7462_s23 = scalar_lea.hbm %s7524_s5, %s4890_s11 }
 0x329   : > { %v4427_v25 = vsel %vm4424_vm8, %v4422_v43, %v4057_v58  ;;  %v4023_v13 = vpop.permute.xlu1 %4022 }
 0x32a   : > { %v4416_v26 = vsel %vm4414_vm6, %v4411_v46, %v4023_v13  ;;  %4533 = vperm.xlu0 %4990, %v4523_v45  }
 0x32b   : > { %4148 = vrot.lane.b32.xlu1 %v7997_v15, %s5157_s22  ;;  %s4755_s22 = sshll.u32 %s7435_s10, 4  ;;  %s7466_s22 = int_to_ptr.vmem [resolvable:$true] %s4755_s22 }
 0x32c   : > { %v4229_v52 = vpop.permute.xlu0 %4228  ;;  %s5049_s6 = scalar_lea.vmem %s7466_s22, 2048  ;;  %p5056_p3 = scmp.lt.s32.totalorder %s7466_s22, %s5054_s13 }
 0x32d   : > { %v4475_v40 = vsel %vm4404_vm4, %v4471_v42, %v4229_v52  ;;  %v7283_v61 = vpop.permute.xlu1 %4090  ;;  %p5050_p8 = scmp.ne.s32.totalorder %s7466_s22, %s5049_s6  ;;  %p5057_p5 = scmp.lt.s32.totalorder %s5055_s14, %s5049_s6 }
 0x32e   : > { %4548 = vperm.xlu0 %4990, %v4526_v10   ;;  %v4438_v16 = vsel %vm4434_vm10, %v7247_v1, %v7283_v61 }
 0x32f   : > { %4538 = vperm.xlu1 %4991, %v4524_v17   ;;  %p5051_p0 = pnand %p5050_p8, %p5246_p9  ;;  %p5058_p6 = por %p5057_p5, %p5056_p3 }
 0x330   : > { %v4297_v23 = vpop.permute.xlu0 %4296 }
 0x331   : > { %v7292_v0 = vsel %vm4424_vm8, %v4489_v62, %v4297_v23  ;;  %v4263_v55 = vpop.permute.xlu1 %4262  ;;  %p5052_p1 = pneg %p5051_p0 }
 0x332   : > { %v4484_v22 = vsel %vm4414_vm6, %v4480_v39, %v4263_v55  ;;  %4558 = vperm.xlu0 %4990, %v4528_v54  }
 0x333   : > { %4543 = vperm.xlu1 %4991, %v4525_v9   ;;  %p5059_p4 = pnand %p5058_p6, %p5052_p1 }
 0x334   : > { %v4005_v34 = vpop.permute.xlu0 %4004 }
 0x335   : > { %v4410_v48 = vsel %vm4409_vm5, %v4405_v27, %v4005_v34  ;;  %v4331_v7 = vpop.permute.xlu1 %4330 }
 0x336   : > { %4568 = vperm.xlu0 %4990, %v4530_v4   ;;  %v4502_v36 = vsel %vm4434_vm10, %v4498_v37, %v4331_v7 }
 0x337   : > { %4553 = vperm.xlu1 %4991, %v4527_v14  }
 0x338   : > { %v4073_v47 = vpop.permute.xlu0 %4072 }
 0x339   : > { %v7309_v35 = vsel %vm4429_vm9, %v4427_v25, %v4073_v47  ;;  %v4039_v29 = vpop.permute.xlu1 %4038 }
 0x33a   : > { %v4421_v2 = vsel %vm4419_vm7, %v4416_v26, %v4039_v29 }
 0x33b   : > { %4563 = vperm.xlu1 %4991, %v4529_v6  }
 0x33c   : > { %v4245_v51 = vpop.permute.xlu0 %4244 }
 0x33d   : > { %v4479_v12 = vsel %vm4409_vm5, %v4475_v40, %v4245_v51  ;;  %v4107_v11 = vpop.permute.xlu1 %4106 }
 0x33e   : > { %v4443_v19 = vsel %vm4439_vm11, %v4438_v16, %v4107_v11 }
 0x340   : > { %v4313_v33 = vpop.permute.xlu0 %4312 }
 0x341   : > { %v4279_v43 = vpop.permute.xlu1 %4278  ;;  %v4497_v1 = vsel %vm4429_vm9, %v7292_v0, %v4313_v33 }
 0x342   : > { %v7314_v56 = vsel %vm4419_vm7, %v4484_v22, %v4279_v43 }
 0x344   : > { %v4021_v18 = vpop.permute.xlu0 %4020 }
 0x345   : > { %v4415_v30 = vsel %vm4414_vm6, %v4410_v48, %v4021_v18  ;;  %v4347_v50 = vpop.permute.xlu1 %4346 }
 0x346   : > { %v4506_v28 = vsel %vm4439_vm11, %v4502_v36, %v4347_v50 }
 0x348   : > { %v4089_v31 = vpop.permute.xlu0 %4088 }
 0x349   : > { %v4055_v8 = vpop.permute.xlu1 %4054  ;;  %v4437_v47 = vsel %vm4434_vm10, %v7309_v35, %v4089_v31 }
 0x34a   : > { %v7318_v46 = vsel %vm4424_vm8, %v4421_v2, %v4055_v8 }
 0x34c   : > { %v4261_v41 = vpop.permute.xlu0 %4260 }
 0x34d   : > { %v7321_v63 = vsel %vm4414_vm6, %v4479_v12, %v4261_v41  ;;  %v4123_v42 = vpop.permute.xlu1 %4122 }
 0x34e   : > { %v4448_v26 = vsel %vm4444_vm12, %v4443_v19, %v4123_v42 }
 0x350   : > { %v4329_v38 = vpop.permute.xlu0 %4328 }
 0x351   : > { %v7323_v32 = vpop.permute.xlu1 %4294  ;;  %v4501_v55 = vsel %vm4434_vm10, %v4497_v1, %v4329_v38 }
 0x352   : > { %v4492_v18 = vsel %vm4424_vm8, %v7314_v56, %v7323_v32 }
 0x354   : > { %v4037_v53 = vpop.permute.xlu0 %4036 }
 0x355   : > { %v7326_v21 = vsel %vm4419_vm7, %v4415_v30, %v4037_v53  ;;  %v4363_v62 = vpop.permute.xlu1 %4362 }
 0x356   : > { %v4510_v44 = vsel %vm4444_vm12, %v4506_v28, %v4363_v62 }
 0x358   : > { %v4105_v59 = vpop.permute.xlu0 %4104 }
 0x359   : > { %v7328_v20 = vpop.permute.xlu1 %4070  ;;  %v4442_v0 = vsel %vm4439_vm11, %v4437_v47, %v4105_v59 }
 0x35a   : > { %v4431_v41 = vsel %vm4429_vm9, %v7318_v46, %v7328_v20 }
 0x35c   : > { %v7330_v5 = vpop.permute.xlu0 %4276 }
 0x35d   : > { %v4139_v39 = vpop.permute.xlu1 %4138  ;;  %v4487_v56 = vsel %vm4419_vm7, %v7321_v63, %v7330_v5 }
 0x35e   : > { %v4453_v52 = vsel %vm4449_vm13, %v4448_v26, %v4139_v39 }
 0x360   : > { %v4345_v57 = vpop.permute.xlu0 %4344 }
 0x361   : > { %v4311_v27 = vpop.permute.xlu1 %4310  ;;  %v4505_v22 = vsel %vm4439_vm11, %v4501_v55, %v4345_v57 }
 0x362   : > { %v4496_v30 = vsel %vm4429_vm9, %v4492_v18, %v4311_v27 }
 0x364   : > { %v7337_v3 = vpop.permute.xlu0 %4052 }
 0x365   : > { %v4379_v24 = vpop.permute.xlu1 %4378  ;;  %v4425_v5 = vsel %vm4424_vm8, %v7326_v21, %v7337_v3  ;;  %v4515_v21 = vld [vmem:[%s7522_s3] sm:$0xff] }
 0x366   : > { %v4514_v58 = vsel %vm4449_vm13, %v4510_v44, %v4379_v24  ;;  %v4519_v3 = vld [vmem:[%s7522_s3 + $0x20] sm:$0xff] }
 0x367   : > { %4619 = vmatprep.subr.mxu0 %v4514_v58  ;;  %4891 = vmatprep.subr.mxu1 %v4514_v58 }
 0x368   : > { %v4121_v25 = vpop.permute.xlu0 %4120 }
 0x369   : > { %v4087_v13 = vpop.permute.xlu1 %4086  ;;  %v4447_v6 = vsel %vm4444_vm12, %v4442_v0, %v4121_v25 }
 0x36a   : > { %v4436_v53 = vsel %vm4434_vm10, %v4431_v41, %v4087_v13 }
 0x36c   : > { %v4293_v15 = vpop.permute.xlu0 %4292 }
 0x36d   : > { %v4155_v17 = vpop.permute.xlu1 %4154  ;;  %v4491_v59 = vsel %vm4424_vm8, %v4487_v56, %v4293_v15 }
 0x36e   : > { %v4458_v45 = vsel %vm4454_vm14, %v4453_v52, %v4155_v17  ;;  %v4516_v17 = vld [vmem:[%s7522_s3 + $0x8] sm:$0xff] }
 0x36f   : > { %4620 = vmatpush1.msra.mxu0 %v4458_v45  ;;  %4895 = vmatpush1.msra.mxu1 %v4458_v45  ;;  %v4520_v45 = vld [vmem:[%s7522_s3 + $0x28] sm:$0xff] }
 0x370   : > { %v4361_v40 = vpop.permute.xlu0 %4360 }
 0x371   : > { %v4327_v60 = vpop.permute.xlu1 %4326  ;;  %v4509_v54 = vsel %vm4444_vm12, %v4505_v22, %v4361_v40  ;;  %v4517_v40 = vld [vmem:[%s7522_s3 + $0x10] sm:$0xff] }
 0x372   : > { %v4500_v50 = vsel %vm4434_vm10, %v4496_v30, %v4327_v60  ;;  %v4521_v60 = vld [vmem:[%s7522_s3 + $0x30] sm:$0xff] }
 0x374   : > { %v4103_v10 = vpop.permute.xlu0 %4102 }
 0x375   : > { %v4069_v23 = vpop.permute.xlu1 %4068  ;;  %v4441_v32 = vsel %vm4439_vm11, %v4436_v53, %v4103_v10  ;;  %v4518_v10 = vld [vmem:[%s7522_s3 + $0x18] sm:$0xff] }
 0x376   : > { %v4430_v24 = vsel %vm4429_vm9, %v4425_v5, %v4069_v23  ;;  %v4522_v23 = vld [vmem:[%s7522_s3 + $0x38] sm:$0xff] }
 0x378   : > { %v4309_v9 = vpop.permute.xlu0 %4308 }
 0x379   : > { %v4137_v61 = vpop.permute.xlu1 %4136  ;;  %v4495_v20 = vsel %vm4429_vm9, %v4491_v59, %v4309_v9 }
 0x37a   : > { %v4452_v2 = vsel %vm4449_vm13, %v4447_v6, %v4137_v61 }
 0x37c   : > { %v4377_v34 = vpop.permute.xlu0 %4376 }
 0x37d   : > { %v4513_v14 = vsel %vm4449_vm13, %v4509_v54, %v4377_v34  ;;  %v4343_v48 = vpop.permute.xlu1 %4342 }
 0x37e   : > { %4621 = vmatprep.subr.mxu0 %v4513_v14  ;;  %4892 = vmatprep.subr.mxu1 %v4513_v14  ;;  %v4504_v31 = vsel %vm4439_vm11, %v4500_v50, %v4343_v48 }
 0x380   : > { %v4119_v7 = vpop.permute.xlu0 %4118 }
 0x381   : > { %v4085_v4 = vpop.permute.xlu1 %4084  ;;  %v4446_v39 = vsel %vm4444_vm12, %v4441_v32, %v4119_v7 }
 0x382   : > { %v4435_v13 = vsel %vm4434_vm10, %v4430_v24, %v4085_v4 }
 0x384   : > { %v4325_v29 = vpop.permute.xlu0 %4324 }
 0x385   : > { %v4153_v51 = vpop.permute.xlu1 %4152  ;;  %v4499_v37 = vsel %vm4434_vm10, %v4495_v20, %v4325_v29 }
 0x386   : > { %v4457_v12 = vsel %vm4454_vm14, %v4452_v2, %v4153_v51 }
 0x387   : > { %4622 = vmatpush1.msra.mxu0 %v4457_v12  ;;  %4896 = vmatpush1.msra.mxu1 %v4457_v12 }
 0x388   : > { %v4101_v11 = vpop.permute.xlu0 %4100 }
 0x389   : > { %v4359_v33 = vpop.permute.xlu1 %4358  ;;  %v4440_v16 = vsel %vm4439_vm11, %v4435_v13, %v4101_v11 }
 0x38a   : > { %v4508_v42 = vsel %vm4444_vm12, %v4504_v31, %v4359_v33 }
 0x38c   : > { %v4341_v43 = vpop.permute.xlu0 %4340 }
 0x38d   : > { %v4135_v35 = vpop.permute.xlu1 %4134  ;;  %v4503_v63 = vsel %vm4439_vm11, %v4499_v37, %v4341_v43 }
 0x38e   : > { %v4451_v57 = vsel %vm4449_vm13, %v4446_v39, %v4135_v35 }
 0x390   : > { %v4117_v8 = vpop.permute.xlu0 %4116 }
 0x391   : > { %v4375_v38 = vpop.permute.xlu1 %4374  ;;  %v4445_v19 = vsel %vm4444_vm12, %v4440_v16, %v4117_v8 }
 0x392   : > { %v4512_v62 = vsel %vm4449_vm13, %v4508_v42, %v4375_v38 }
 0x393   : > { %4623 = vmatprep.subr.mxu0 %v4512_v62  ;;  %4893 = vmatprep.subr.mxu1 %v4512_v62 }
 0x394   : > { %v4357_v46 = vpop.permute.xlu0 %4356 }
 0x395   : > { %v4151_v27 = vpop.permute.xlu1 %4150  ;;  %v4507_v28 = vsel %vm4444_vm12, %v4503_v63, %v4357_v46 }
 0x396   : > { %v4456_v36 = vsel %vm4454_vm14, %v4451_v57, %v4151_v27 }
 0x397   : > { %4624 = vmatpush1.msra.mxu0 %v4456_v36  ;;  %4897 = vmatpush1.msra.mxu1 %v4456_v36 }
 0x398   : > { %v4373_v44 = vpop.permute.xlu0 %4372 }
 0x399   : > { %v4511_v58 = vsel %vm4449_vm13, %v4507_v28, %v4373_v44  ;;  %v4133_v25 = vpop.permute.xlu1 %4132 }
 0x39a   : > { %4625 = vmatprep.subr.mxu0 %v4511_v58  ;;  %4894 = vmatprep.subr.mxu1 %v4511_v58  ;;  %v4450_v26 = vsel %vm4449_vm13, %v4445_v19, %v4133_v25 }
 0x39d   : > { %v4149_v15 = vpop.permute.xlu1 %4148 }
 0x39e   : > { %v4455_v52 = vsel %vm4454_vm14, %v4450_v26, %v4149_v15 }
 0x39f   : > { %4626 = vmatpush1.msra.mxu0 %v4455_v52  ;;  %4898 = vmatpush1.msra.mxu1 %v4455_v52 }
 0x3a0   : > { %4875 = vmatmul.mubr.msk.f32.vlgmr.msra.gmra.mxu0 %vm4399_vm3, %v4515_v21  ;;  %4879 = vmatmul.mubr.msk.f32.vlgmr.msra.gmra.mxu1 %vm4399_vm3, %v4519_v3 }
 0x3a1   : > { %4665 = vmatprep.mubr.f32.mxu0 %v5158_v49  ;;  %4689 = vmatprep.mubr.f32.mxu1 %v5158_v49 }
 0x3a4   : > { %4876 = vmatmul.mubr.msk.f32.gmra.mxu0 %vm4399_vm3, %v4516_v17  ;;  %4880 = vmatmul.mubr.msk.f32.gmra.mxu1 %vm4399_vm3, %v4520_v45 }
 0x3a5   : > { %4671 = vmatprep.mubr.f32.mxu0 %v5158_v49  ;;  %4695 = vmatprep.mubr.f32.mxu1 %v5158_v49  ;;  %v4534_v1 = vpop.permute.xlu0 %4533 }
 0x3a8   : > { %4877 = vmatmul.mubr.msk.f32.gmra.mxu0 %vm4399_vm3, %v4517_v40  ;;  %4881 = vmatmul.mubr.msk.f32.gmra.mxu1 %vm4399_vm3, %v4521_v60 }
 0x3a9   : > { %4677 = vmatprep.mubr.f32.mxu0 %v5158_v49  ;;  %4701 = vmatprep.mubr.f32.mxu1 %v5158_v49  ;;  %v7432_v55 = vpop.permute.xlu0 %4548 }
 0x3aa   : > { %v4539_v9 = vpop.permute.xlu1 %4538 }
 0x3ac   : > { %4878 = vmatmul.mubr.msk.f32.gmra.mxu0 %vm4399_vm3, %v4518_v10  ;;  %4882 = vmatmul.mubr.msk.f32.gmra.mxu1 %vm4399_vm3, %v4522_v23 }
 0x3ad   : > { %v4559_v4 = vpop.permute.xlu0 %4558 }
 0x3ae   : > { %v4544_v61 = vpop.permute.xlu1 %4543 }
 0x3b1   : > { %v4569_v46 = vpop.permute.xlu0 %4568 }
 0x3b2   : > { %v4554_v22 = vpop.permute.xlu1 %4553 }
 0x3b6   : > { %v4564_v30 = vpop.permute.xlu1 %4563 }
 0x460   : > { %v4661_v49 = vpop.f32.mrf.mxu0  ;;  %v4685_v54 = vpop.f32.mrf.mxu1 }
 0x461   : > { %v4662_v34 = vadd.f32 %v4661_v49, %v4534_v1  ;;  %v4686_v14 = vadd.f32 %v4685_v54, %v4554_v22 }
 0x462   : > { %v4663_v48 = vpop.f32.mrf.mxu0  ;;  %v4687_v7 = vpop.f32.mrf.mxu1 }
 0x463   : > { %v4708_v47 = vmax.f32 %v4662_v34, 0.0  ;;  %v4716_v0 = vmax.f32 %v4686_v14, 0.0  ;;  %v4664_v6 = vadd.f32 %v4663_v48, %v4534_v1  ;;  %v4688_v29 = vadd.f32 %v4687_v7, %v4554_v22 }
 0x464   : > { %v4667_v2 = vpop.f32.mrf.mxu0  ;;  %v4691_v51 = vpop.f32.mrf.mxu1 }
 0x465   : > { %4724 = vst [vmem:[%s7435_s10] sm:$0xff] %v4708_v47  ;;  %4733 = vst [vmem:[%s7435_s10 + $0x40] sm:$0xff] %v4716_v0  ;;  %v4709_v12 = vmax.f32 %v4664_v6, 0.0  ;;  %v4717_v11 = vmax.f32 %v4688_v29, 0.0  ;;  %v4668_v33 = vadd.f32 %v4667_v2, %v4539_v9  ;;  %v4692_v43 = vadd.f32 %v4691_v51, %v4559_v4 }
 0x466   : > { %v4669_v18 = vpop.f32.mrf.mxu0  ;;  %v4693_v35 = vpop.f32.mrf.mxu1 }
 0x467   : > { %4726 = vst.msk [vmem:[%s7435_s10 + $0x8] sm:$0xff] %vm4725_vm15, %v4709_v12  ;;  %4734 = vst.msk [vmem:[%s7435_s10 + $0x48] sm:$0xff] %vm4725_vm15, %v4717_v11  ;;  %v4710_v50 = vmax.f32 %v4668_v33, 0.0  ;;  %v4718_v31 = vmax.f32 %v4692_v43, 0.0  ;;  %v4670_v8 = vadd.f32 %v4669_v18, %v4539_v9  ;;  %v4694_v41 = vadd.f32 %v4693_v35, %v4559_v4 }
 0x468   : > { %v4673_v42 = vpop.f32.mrf.mxu0  ;;  %v4697_v38 = vpop.f32.mrf.mxu1 }
 0x469   : > { %4727 = vst [vmem:[%s7435_s10 + $0x10] sm:$0xff] %v4710_v50  ;;  %4735 = vst [vmem:[%s7435_s10 + $0x50] sm:$0xff] %v4718_v31  ;;  %v4711_v53 = vmax.f32 %v4670_v8, 0.0  ;;  %v4719_v62 = vmax.f32 %v4694_v41, 0.0  ;;  %v4674_v56 = vadd.f32 %v4673_v42, %v4544_v61  ;;  %v4698_v32 = vadd.f32 %v4697_v38, %v4564_v30 }
 0x46a   : > { %v4675_v59 = vpop.f32.mrf.mxu0  ;;  %v4699_v39 = vpop.f32.mrf.mxu1 }
 0x46b   : > { %4728 = vst.msk [vmem:[%s7435_s10 + $0x18] sm:$0xff] %vm4725_vm15, %v4711_v53  ;;  %4736 = vst.msk [vmem:[%s7435_s10 + $0x58] sm:$0xff] %vm4725_vm15, %v4719_v62  ;;  %v4712_v20 = vmax.f32 %v4674_v56, 0.0  ;;  %v4720_v57 = vmax.f32 %v4698_v32, 0.0  ;;  %v4676_v27 = vadd.f32 %v4675_v59, %v4544_v61  ;;  %v4700_v37 = vadd.f32 %v4699_v39, %v4564_v30 }
 0x46c   : > { %v4679_v36 = vpop.f32.mrf.mxu0  ;;  %v4703_v63 = vpop.f32.mrf.mxu1 }
 0x46d   : > { %4729 = vst [vmem:[%s7435_s10 + $0x20] sm:$0xff] %v4712_v20  ;;  %4737 = vst [vmem:[%s7435_s10 + $0x60] sm:$0xff] %v4720_v57  ;;  %v4713_v5 = vmax.f32 %v4676_v27, 0.0  ;;  %v4721_v28 = vmax.f32 %v4700_v37, 0.0  ;;  %v4680_v44 = vadd.f32 %v4679_v36, %v7432_v55  ;;  %v4704_v24 = vadd.f32 %v4703_v63, %v4569_v46 }
 0x46e   : > { %v4681_v58 = vpop.f32.mrf.mxu0  ;;  %v4705_v25 = vpop.f32.mrf.mxu1 }
 0x46f   : > { %4730 = vst.msk [vmem:[%s7435_s10 + $0x28] sm:$0xff] %vm4725_vm15, %v4713_v5  ;;  %4738 = vst.msk [vmem:[%s7435_s10 + $0x68] sm:$0xff] %vm4725_vm15, %v4721_v28  ;;  %v4714_v13 = vmax.f32 %v4680_v44, 0.0  ;;  %v4722_v16 = vmax.f32 %v4704_v24, 0.0  ;;  %v4682_v19 = vadd.f32 %v4681_v58, %v7432_v55  ;;  %v4706_v26 = vadd.f32 %v4705_v25, %v4569_v46 }
 0x471   : > { %4731 = vst [vmem:[%s7435_s10 + $0x30] sm:$0xff] %v4714_v13  ;;  %4739 = vst [vmem:[%s7435_s10 + $0x70] sm:$0xff] %v4722_v16  ;;  %v4715_v15 = vmax.f32 %v4682_v19, 0.0  ;;  %v4723_v21 = vmax.f32 %v4706_v26, 0.0 }
 0x473   : > { %4732 = vst.msk [vmem:[%s7435_s10 + $0x38] sm:$0xff] %vm4725_vm15, %v4715_v15  ;;  %4740 = vst.msk [vmem:[%s7435_s10 + $0x78] sm:$0xff] %vm4725_vm15, %v4723_v21 }
 0x474   : > { %5062 = shalt.err (!%p5059_p4)
}
 0x475   : > { %s5063_s16 = scalar_lea.hbm %s7462_s23, 2048  ;;  %s5067_s28 = scalar_lea.hbm %s7524_s5, 4096 }
 0x476   : > { %p5064_p7 = scmp.ne.s32.totalorder %s7462_s23, %s5063_s16  ;;  %p5068_p2 = scmp.lt.s32.totalorder %s7462_s23, %s7524_s5 }
 0x477   : > { %p5069_p8 = scmp.lt.s32.totalorder %s5067_s28, %s5063_s16 }
 0x478   : > { %p5065_p10 = pnand %p5064_p7, %p5246_p9 }
 0x479   : > { %p5070_p0 = por %p5069_p8, %p5068_p2 }
 0x47a   : > { %p5066_p13 = pneg %p5065_p10 }
 0x47c   : > { %p5071_p1 = pnand %p5070_p0, %p5066_p13 }
 0x47e   : > { %5074 = shalt.err (!%p5071_p1)
}
 0x47f   : > { %s5161_s17 = smov 256  }
 0x480   : > { %4903 = dma.vmem_to_hbm [thread:$0]  (%p5246_p9), %s7466_s22, 2048, %s7462_s23, %s4742_s12, %s5161_s17, %s5161_s17, %s5144_s29  }
 0x481 PF: > { %s4770_s19 = sand.u32 1, %s5113_s20   ;;  %p4913_p3 = pnand %p4864_p12, %p5253_p11 }
 0x482   : > { %s4771_s10 = scalar_lea.sflag [#allocation5], %s4770_s19 }
 0x483   : > { %p4914_p5 = pneg %p4913_p3 }
 0x485   : > { %5108 = dma.done.wait (%p4914_p5), %s4771_s10, 2048  }
 0x486   : > { %5110 = vsyncadd (%p4914_p5), %s4771_s10, 4294965248  ;;  %s25_s25 = sadd.s32 1, %s5133_s25   ;;  %s7998_s7 = sld [smem:[#allocation12_spill]] }
 0x487   : > { %p22_p6 = scmp.ge.s32.totalorder %s25_s25, 4   ;;  %s7999_s22 = sld [smem:[#allocation14_spill]] }
 0x488   : > { %s8000_s1 = sld [smem:[#allocation13_spill]]  ;;  %s8001_s20 = smov %s5117_s21 }
 0x489   : > { %s8003_s23 = smov %s5129_s24 }
 0x48a   :  { %24 = sbr.rel (!%p22_p6) target bundleno = 11 (0xb), region = 98 }
 0x48c   : > { %s8002_s21 = smov %s7998_s7 }
 0x48e   : > { %s8004_s24 = smov %s8000_s1 }
 0x48f   :  { %4776 = vsyncpa [#allocation4], 1 }
 0x490   :  { %4778 = vsyncpa [#allocation4 + $0x1], 1 }
 0x491   :  { %4779 = vsyncpa [#allocation7], 1 }
 0x492   :  { %4781 = vsyncpa [#allocation7 + $0x1], 1 }
 0x493   :  { %4782 = vsyncpa [#allocation5], 1 }
 0x494   :  { %4784 = vsyncpa [#allocation5 + $0x1], 1 }

</bundles_post_ra>
